<compile_context>
chip_gen: v7x
topology: tpu7x:2x2x1
jax: 0.10.0
libtpu: 0.0.40
codegen_flags: <defaults>
</compile_context>

<pallas_src>
import jax
import jax.numpy as jnp
from jax.experimental import pallas as pl
from jax.experimental.pallas import tpu as pltpu

LANES = 128
MAX_BLOCK_ROWS = 2048          # (2048, 128) f32 tile = 1 MiB -> 4 MiB double-buffered
MIN_PALLAS_ELEMS = 64 * 1024   # below ~256 KiB f32 the call is pure launch overhead


def _make_l1_partial_kernel(total_rows, block_rows):
    """Build a kernel emitting per-row-block lane-wise partial sums of |x - y|."""
    ragged = (total_rows % block_rows) != 0

    def kernel(x_ref, y_ref, o_ref):
        # Upcast after the (native-dtype) DMA; the VPU cast is free vs. HBM traffic.
        d = jnp.abs(x_ref[...].astype(jnp.float32) - y_ref[...].astype(jnp.float32))
        if ragged:
            # Trace-time branch: only ragged grids pay for the mask.  Rows past
            # the true extent hold unspecified data in the VMEM window.
            row0 = pl.program_id(0) * block_rows
            row_ids = row0 + jax.lax.broadcasted_iota(jnp.int32, (block_rows, 1), 0)
            d = jnp.where(row_ids < total_rows, d, 0.0)
        # (1, 128) lane-wise partial for this block; final reduce happens outside.
        o_ref[...] = jnp.sum(d, axis=0, keepdims=True).reshape(o_ref.shape)

    return kernel


def _l1_sum_pallas(x2d, y2d):
    """sum(|x - y|) over (rows, 128) operands via independent row-block partials."""
    rows = x2d.shape[0]
    block_rows = rows if rows <= MAX_BLOCK_ROWS else MAX_BLOCK_ROWS
    num_blocks = pl.cdiv(rows, block_rows)
    partials = pl.pallas_call(
        _make_l1_partial_kernel(rows, block_rows),
        # (num_blocks, 1, LANES): last-two block dims equal the array's last-two
        # dims, so the (8, 128) tiling constraint is trivially satisfied.
        out_shape=jax.ShapeDtypeStruct((num_blocks, 1, LANES), jnp.float32),
        grid=(num_blocks,),
        in_specs=[
            pl.BlockSpec((block_rows, LANES), lambda i: (i, 0)),
            pl.BlockSpec((block_rows, LANES), lambda i: (i, 0)),
        ],
        out_specs=pl.BlockSpec((1, 1, LANES), lambda i: (i, 0, 0)),
        compiler_params=pltpu.CompilerParams(
            dimension_semantics=("parallel",)),   # lets v7x use both TensorCores
    )(x2d, y2d)
    return jnp.sum(partials)


def _l1_mean(x, y):
    """mean(|x - y|) for one feature level (== nn.L1Loss forward)."""
    numel = x.size
    if numel < MIN_PALLAS_ELEMS or numel % LANES != 0:
        # Small or lane-ragged levels: a fused XLA elementwise-reduce is already
        # at HBM roofline and avoids the per-pallas_call fixed cost.
        return jnp.mean(jnp.abs(x.astype(jnp.float32) - y.astype(jnp.float32)))
    rows = numel // LANES
    # Row-major flatten + reshape is layout-preserving: no copy, no cast, no pad.
    x2d = x.reshape(rows, LANES)
    y2d = y.reshape(rows, LANES)
    return _l1_sum_pallas(x2d, y2d) / jnp.float32(numel)


def fm_loss(x_feats, y_feats):
    """FMLoss.forward: sum of per-level L1 means."""
    loss = jnp.float32(0.0)
    for xf, yf in zip(x_feats, y_feats):
        loss = loss + _l1_mean(xf, yf)
    return loss


if __name__ == "__main__":
    key = jax.random.PRNGKey(0)
    # Multi-scale feature pyramid (NCHW) as FMLoss receives from a discriminator:
    # two tiny levels (plain-JAX path) and one level large enough to exercise the
    # Pallas path with a multi-block, ragged grid:
    #   2*10*128*128 = 327680 elems -> 2560 rows -> 2 blocks of 2048 (tail masked).
    shapes = [(2, 4, 16, 16), (2, 8, 8, 8), (2, 10, 128, 128)]
    x_feats, y_feats = [], []
    for s in shapes:
        key, kx, ky = jax.random.split(key, 3)
        x_feats.append(jax.random.normal(kx, s, dtype=jnp.float32))
        y_feats.append(jax.random.normal(ky, s, dtype=jnp.float32))

    out = jax.block_until_ready(fm_loss(x_feats, y_feats))

    # Reference check in plain JAX.
    ref = sum(jnp.mean(jnp.abs(x - y)) for x, y in zip(x_feats, y_feats))
    assert jnp.allclose(out, ref, rtol=1e-5, atol=1e-6), (out, ref)

    print("KERNEL_OK")
</pallas_src>

<mosaic_0001>
module attributes {stable_mosaic.version = 11 : i64} {
  func.func @kernel(%arg0: i32, %arg1: memref<2048x128xf32, #tpu.memory_space<vmem>>, %arg2: memref<2048x128xf32, #tpu.memory_space<vmem>>, %arg3: memref<1x1x128xf32, #tpu.memory_space<vmem>>) attributes {dimension_semantics = [#tpu.dimension_semantics<parallel>], iteration_bounds = array<i64: 2>, scalar_prefetch = 0 : i64, scratch_operands = 0 : i64, tpu.core_type = #tpu.core_type<tc>, window_params = [{transform_indices = @transform_0, window_bounds = array<i64: 2048, 128>}, {transform_indices = @transform_1, window_bounds = array<i64: 2048, 128>}, {transform_indices = @transform_2, window_bounds = array<i64: 1, 1, 128>}]} {
    %c0 = arith.constant 0 : index
    %c0_0 = arith.constant 0 : index
    %0 = vector.load %arg1[%c0, %c0_0] : memref<2048x128xf32, #tpu.memory_space<vmem>>, vector<2048x128xf32>
    %c0_1 = arith.constant 0 : index
    %c0_2 = arith.constant 0 : index
    %1 = vector.load %arg2[%c0_1, %c0_2] : memref<2048x128xf32, #tpu.memory_space<vmem>>, vector<2048x128xf32>
    %2 = arith.subf %0, %1 : vector<2048x128xf32>
    %3 = math.absf %2 : vector<2048x128xf32>
    %c2048_i32 = arith.constant 2048 : i32
    %4 = arith.muli %arg0, %c2048_i32 : i32
    %5 = tpu.iota {dimensions = array<i32: 0>} : vector<2048x1xi32>
    %6 = vector.broadcast %4 : i32 to vector<2048x1xi32>
    %7 = arith.addi %6, %5 : vector<2048x1xi32>
    %c2560_i32 = arith.constant 2560 : i32
    %8 = vector.broadcast %c2560_i32 : i32 to vector<2048x1xi32>
    %9 = arith.cmpi slt, %7, %8 : vector<2048x1xi32>
    %cst = arith.constant 0.000000e+00 : f32
    %10 = vector.shape_cast %9 : vector<2048x1xi1> to vector<2048x1xi1>
    %11 = vector.broadcast %10 : vector<2048x1xi1> to vector<2048x128xi1>
    %12 = vector.broadcast %cst : f32 to vector<2048x128xf32>
    %13 = arith.select %11, %3, %12 : vector<2048x128xi1>, vector<2048x128xf32>
    %cst_3 = arith.constant dense<0.000000e+00> : vector<128xf32>
    %14 = vector.multi_reduction <add>, %13, %cst_3 [0] : vector<2048x128xf32> to vector<128xf32>
    %15 = vector.shape_cast %14 : vector<128xf32> to vector<1x128xf32>
    %16 = vector.shape_cast %15 : vector<1x128xf32> to vector<1x1x128xf32>
    %c0_4 = arith.constant 0 : index
    %c0_5 = arith.constant 0 : index
    %c0_6 = arith.constant 0 : index
    %17 = vector.load %arg3[%c0_4, %c0_5, %c0_6] : memref<1x1x128xf32, #tpu.memory_space<vmem>>, vector<1x1x128xf32>
    tpu.vector_store %arg3[%c0_4, %c0_5, %c0_6], %16 {strides = array<i32>} : memref<1x1x128xf32, #tpu.memory_space<vmem>>, vector<1x1x128xf32>,
    return
  }
  func.func @transform_0(%arg0: i32) -> (i32, i32) {
    %c0_i32 = arith.constant 0 : i32
    %c0_i32_0 = arith.constant 0 : i32
    return %arg0, %c0_i32 : i32, i32
  }
  func.func @transform_1(%arg0: i32) -> (i32, i32) {
    %c0_i32 = arith.constant 0 : i32
    %c0_i32_0 = arith.constant 0 : i32
    return %arg0, %c0_i32 : i32, i32
  }
  func.func @transform_2(%arg0: i32) -> (i32, i32, i32) {
    %c0_i32 = arith.constant 0 : i32
    %c0_i32_0 = arith.constant 0 : i32
    %c0_i32_1 = arith.constant 0 : i32
    return %arg0, %c0_i32, %c0_i32_0 : i32, i32, i32
  }
}

</mosaic_0001>

<bundles_post_ra>
// kernel: tpu_custom_call.1
= control target key start
LH: loop header
LB: loop body
LE: loop exit
PB: predicated region body
PF: predicated region fallthrough
CT: control target
= control target key end

     0   :  { %7 = vsyncpa [#allocation3], 0  ;;  %s4616_s0 = inlined_call_operand.hbm [shape: f32[2560,128], index: 0, kind: input, shape index: {}]   ;;  %s4617_s1 = inlined_call_operand.hbm [shape: f32[2560,128], index: 1, kind: input, shape index: {}]   ;;  %s4618_s2 = inlined_call_operand.hbm [shape: f32[2,1,128], index: 2, kind: output, shape index: {}]  }
   0x1   :  { %9 = vsyncpa [#allocation3 + $0x1], 0 }
   0x2   :  { %10 = vsyncpa [#allocation6], 0 }
   0x3   :  { %12 = vsyncpa [#allocation6 + $0x1], 0 }
   0x4   :  { %13 = vsyncpa [#allocation4], 0 }
   0x5   :  { %15 = vsyncpa [#allocation4 + $0x1], 0  ;;  %s3371_s9 = smov 0   ;;  %s3373_s10 = smov 0  }
   0x6   :  { %s3375_s11 = smov 0   ;;  %s3377_s12 = smov 0  }
   0x7 LB: > { %s3392_s13 = sadd.s32 4294967295, %s3347_s12   ;;  %s3150_s14 = sadd.s32 4294967294, %s3347_s12   ;;  %s3347_s12 = sphi %s3377_s12, %s4631_s12   ;;  %s3343_s11 = sphi %s3375_s11, %s4630_s11   ;;  %s3339_s10 = sphi %s3373_s10, %s4629_s10   ;;  %s3335_s9 = sphi %s3371_s9, %s4628_s9  }
   0x8   : > { %s3396_s15 = sadd.s32 1, %s3347_s12   ;;  %s28_s16 = sadd.s32 1, %s3343_s11 }
   0x9   : > { %s25_s17 = ssub.s32 %s3347_s12, %s3396_s15  ;;  %p35_p0 = scmp.ne.s32.totalorder %s3343_s11, %s3339_s10 }
   0xa   : > { %p26_p1 = scmp.eq.s32.totalorder %s25_s17, 0  ;;  %p36_p2 = scmp.eq.s32.totalorder %s3347_s12, 0 }
   0xb   : > { %p41_p3 = scmp.ne.s32.totalorder %s3339_s10, %s3335_s9  ;;  %p42_p4 = scmp.eq.s32.totalorder %s3392_s13, 0 }
   0xc   : > { %s3408_s18 = scalar_select %p26_p1, %s3343_s11, %s28_s16  }
   0xd   : > { %p3410_p5 = por %p36_p2, %p35_p0  ;;  %p3414_p6 = por %p42_p4, %p41_p3 }
   0xe   : > { %p91_p7 = scmp.eq.s32.totalorder %s3392_s13, 1  ;;  %p97_p8 = scmp.eq.s32.totalorder %s3150_s14, 1 }
   0xf   : > { %p4619_p11 = scmp.ge.s32.totalorder %s3347_s12, 2 }
  0x10   : > { %p3419_p9 = por %p91_p7, %p35_p0  ;;  %p3423_p10 = por %p97_p8, %p41_p3 }
  0x11   : > { %113 = sbr.rel (%p4619_p11) target bundleno = 94 (0x5e), region = 16 }
  0x12   : > { %s4623_s21 = scalar_select %p3419_p9, 1, 0 }
  0x13   : > { %s4624_s22 = scalar_select %p3423_p10, 1, 0 }
  0x18   : > { %116 = sbr.rel (!%p3410_p5) target bundleno = 59 (0x3b), region = 20  ;;  %s117_s23 = sand.u32 (%p3410_p5), 1, %s3343_s11  }
  0x19   : > { %s3154_s24 = sshll.u32 (%p3410_p5), %s3347_s12, 8  ;;  %s3153_s25 = sshll.u32 (%p3410_p5), %s117_s23, 11 }
  0x1a   : > { %s123_s26 = ssub.s32 (%p3410_p5), 320, %s3154_s24  ;;  %s3437_s29 = scalar_lea.sflag (%p3410_p5), [#allocation3], %s117_s23 }
  0x1b   : > { %p124_p12 = scmp.lt.s32.totalorder (%p3410_p5), %s123_s26, 256  ;;  %s121_s30 = scalar_lea.vmem (%p3410_p5), [#allocation2], %s3153_s25 }
  0x1f   : > { %s4633_s26 = smov (!%p124_p12, %s123_s26), 256 }
  0x20   : > { %s3434_s27 = sshll.u32 %s4633_s26, 7 }
  0x21   : > { %s128_s28 = ssub.s32 32768, %s3434_s27 }
  0x22   : > { %129 = vsyncadd %s3437_s29, %s128_s28  ;;  %p3156_p13 = scmp.ne.s32.totalorder %s3434_s27, 0  ;;  %s3174_s3 = sshll.u32 %s3347_s12, 15 }
  0x23   : > { %s3445_s6 = scalar_lea.hbm %s4616_s0, %s3174_s3  ;;  %s134_s7 = sshll.u32 %s121_s30, 4  ;;  %s3447_s7 = int_to_ptr.vmem [resolvable:$true] %s134_s7 }
  0x24   : > { %s3221_s8 = scalar_lea.hbm %s3445_s6, %s3434_s27  ;;  %s3225_s17 = scalar_lea.hbm %s4616_s0, 40960 }
  0x25   : > { %p3222_p0 = scmp.ne.s32.totalorder %s3445_s6, %s3221_s8  ;;  %p3226_p3 = scmp.lt.u32.totalorder %s3445_s6, %s4616_s0 }
  0x26   : > { %p3227_p4 = scmp.lt.u32.totalorder %s3225_s17, %s3221_s8  ;;  %p3229_p8 = scmp.lt.u32.totalorder %s3221_s8, %s3445_s6 }
  0x27   : > { %p3223_p1 = pnand %p3222_p0, %p3156_p13 }
  0x28   : > { %p3228_p7 = por %p3227_p4, %p3226_p3 }
  0x29   : > { %p3224_p2 = pneg %p3223_p1 }
  0x2a   : > { %p3230_p12 = por %p3229_p8, %p3228_p7 }
  0x2c   : > { %p3231_p11 = pnand %p3230_p12, %p3224_p2 }
  0x2e   : > { %3234 = shalt.err (!%p3231_p11)
}
  0x2f   : > { %s3235_s25 = scalar_lea.vmem %s3447_s7, %s3434_s27  ;;  %s3349_s26 = smov [#allocation2]  }
  0x30   : > { %p3236_p0 = scmp.ne.s32.totalorder %s3447_s7, %s3235_s25  ;;  %s3239_s28 = sshll.u32 %s3349_s26, 4  ;;  %s3240_s28 = int_to_ptr.vmem [resolvable:$false] %s3239_s28 }
  0x31   : > { %s3241_s30 = scalar_lea.vmem %s3240_s28, 65536  ;;  %p3242_p9 = scmp.lt.s32.totalorder %s3447_s7, %s3240_s28 }
  0x32   : > { %p3237_p1 = pnand %p3236_p0, %p3156_p13  ;;  %p3243_p3 = scmp.lt.s32.totalorder %s3241_s30, %s3235_s25 }
  0x34   : > { %p3238_p10 = pneg %p3237_p1  ;;  %p3244_p4 = por %p3243_p3, %p3242_p9 }
  0x36   : > { %p3245_p7 = pnand %p3244_p4, %p3238_p10 }
  0x38   : > { %3248 = shalt.err (!%p3245_p7)
}
  0x39   : > { %s3350_s3 = smov 128   ;;  %s3351_s4 = smov 8  }
  0x3a   : > { %140 = dma.hbm_to_vmem [thread:$0]  (%p3156_p13), %s3445_s6, %s3434_s27, %s3447_s7, %s3437_s29, %s3350_s3, %s3350_s3, %s3351_s4  }
  0x3b PF: > { %143 = sbr.rel (!%p3410_p5) target bundleno = 94 (0x5e), region = 24  ;;  %s144_s5 = sand.u32 (%p3410_p5), 1, %s3343_s11  }
  0x3c   : > { %s3161_s8 = sshll.u32 (%p3410_p5), %s3347_s12, 8  ;;  %s3160_s14 = sshll.u32 (%p3410_p5), %s144_s5, 11 }
  0x3d   : > { %s150_s16 = ssub.s32 (%p3410_p5), 320, %s3161_s8  ;;  %s3481_s24 = scalar_lea.sflag (%p3410_p5), [#allocation6], %s144_s5 }
  0x3e   : > { %p151_p9 = scmp.lt.s32.totalorder (%p3410_p5), %s150_s16, 256  ;;  %s148_s27 = scalar_lea.vmem (%p3410_p5), [#allocation5], %s3160_s14 }
  0x42   : > { %s4635_s16 = smov (!%p151_p9, %s150_s16), 256 }
  0x43   : > { %s3478_s17 = sshll.u32 %s4635_s16, 7 }
  0x44   : > { %s155_s23 = ssub.s32 32768, %s3478_s17 }
  0x45   : > { %156 = vsyncadd %s3481_s24, %s155_s23  ;;  %p3163_p5 = scmp.ne.s32.totalorder %s3478_s17, 0  ;;  %s3175_s19 = sshll.u32 %s3347_s12, 15 }
  0x46   : > { %s3489_s7 = scalar_lea.hbm %s4617_s1, %s3175_s19  ;;  %s161_s25 = sshll.u32 %s148_s27, 4  ;;  %s3491_s25 = int_to_ptr.vmem [resolvable:$true] %s161_s25 }
  0x47   : > { %s3249_s26 = scalar_lea.hbm %s3489_s7, %s3478_s17  ;;  %s3253_s3 = scalar_lea.hbm %s4617_s1, 40960 }
  0x48   : > { %p3250_p10 = scmp.ne.s32.totalorder %s3489_s7, %s3249_s26  ;;  %p3254_p2 = scmp.lt.u32.totalorder %s3489_s7, %s4617_s1 }
  0x49   : > { %p3255_p8 = scmp.lt.u32.totalorder %s3253_s3, %s3249_s26  ;;  %p3257_p0 = scmp.lt.u32.totalorder %s3249_s26, %s3489_s7 }
  0x4a   : > { %p3251_p11 = pnand %p3250_p10, %p3163_p5 }
  0x4b   : > { %p3256_p12 = por %p3255_p8, %p3254_p2 }
  0x4c   : > { %p3252_p13 = pneg %p3251_p11 }
  0x4d   : > { %p3258_p1 = por %p3257_p0, %p3256_p12 }
  0x4f   : > { %p3259_p3 = pnand %p3258_p1, %p3252_p13 }
  0x51   : > { %3262 = shalt.err (!%p3259_p3)
}
  0x52   : > { %s3263_s8 = scalar_lea.vmem %s3491_s25, %s3478_s17  ;;  %s3352_s14 = smov [#allocation5]  }
  0x53   : > { %p3264_p4 = scmp.ne.s32.totalorder %s3491_s25, %s3263_s8  ;;  %s3267_s16 = sshll.u32 %s3352_s14, 4  ;;  %s3268_s16 = int_to_ptr.vmem [resolvable:$false] %s3267_s16 }
  0x54   : > { %s3269_s23 = scalar_lea.vmem %s3268_s16, 65536  ;;  %p3270_p10 = scmp.lt.s32.totalorder %s3491_s25, %s3268_s16 }
  0x55   : > { %p3265_p7 = pnand %p3264_p4, %p3163_p5  ;;  %p3271_p11 = scmp.lt.s32.totalorder %s3269_s23, %s3263_s8 }
  0x57   : > { %p3266_p9 = pneg %p3265_p7  ;;  %p3272_p2 = por %p3271_p11, %p3270_p10 }
  0x59   : > { %p3273_p8 = pnand %p3272_p2, %p3266_p9 }
  0x5b   : > { %3276 = shalt.err (!%p3273_p8)
}
  0x5c   : > { %s3353_s27 = smov 128   ;;  %s3354_s19 = smov 8  }
  0x5d   : > { %167 = dma.hbm_to_vmem [thread:$0]  (%p3163_p5), %s3489_s7, %s3478_s17, %s3491_s25, %s3481_s24, %s3353_s27, %s3353_s27, %s3354_s19  }
  0x5e PF: > { %p3167_p13 = scmp.ge.s32.totalorder %s3347_s12, 1  ;;  %p169_p12 = scmp.lt.s32.totalorder %s3347_s12, 3 }
  0x60   : > { %p170_p0 = pnand %p3167_p13, %p169_p12 }
  0x61   : > { %s3521_s29 = sand.u32 (!%p170_p0), 1, %s3339_s10  }
  0x62   : > { %173 = sbr.rel (%p170_p0) target bundleno = 656 (0x290), region = 28  ;;  %s3168_s6 = sshll.u32 (!%p170_p0), %s3521_s29, 11 }
  0x63   : > { %s176_s26 = scalar_lea.sflag (!%p170_p0), [#allocation3], %s3521_s29  ;;  %s3525_s28 = scalar_lea.vmem (!%p170_p0), [#allocation2], %s3168_s6 }
  0x69   : > { %3322 = dma.done.wait (%p3414_p6), %s176_s26, 32768  }
  0x6a   : > { %3324 = vsyncadd (%p3414_p6), %s176_s26, 4294934528  ;;  %s185_s17 = scalar_lea.sflag [#allocation6], %s3521_s29  ;;  %s3532_s24 = scalar_lea.vmem [#allocation5], %s3168_s6 }
  0x6b   : > { %3326 = dma.done.wait (%p3414_p6), %s185_s17, 32768  }
  0x6c   : > { %3328 = vsyncadd (%p3414_p6), %s185_s17, 4294934528  ;;  %v1248_v0 = vlaneseq  ;;  %s3170_s7 = sshll.u32 %s3392_s13, 11  ;;  %v223_v2 = vld [vmem:[%s3525_s28] sm:$0xff]  ;;  %v224_v3 = vld [vmem:[%s3525_s28 + $0x8] sm:$0xff]  ;;  %s3171_s20 = sshll.u32 %s3392_s13, 4 }
  0x6d   : > { %v479_v4 = vld [vmem:[%s3532_s24] sm:$0xff]  ;;  %v480_v5 = vld [vmem:[%s3532_s24 + $0x8] sm:$0xff]  ;;  %v3546_v7 = vstv %s3170_s7  ;;  %v225_v8 = vld [vmem:[%s3525_s28 + $0x10] sm:$0xff]  ;;  %s212_s25 = scalar_lea.vmem [#allocation7], %s3521_s29  ;;  %s4572_s5 = scalar_lea.hbm %s4618_s2, %s3171_s20 }
  0x6e   : > { %v3538_v1 = vshrl.u32 %v1248_v0, 7  ;;  %v481_v9 = vld [vmem:[%s3532_s24 + $0x10] sm:$0xff]  ;;  %v735_v11 = vsub.f32 %v223_v2, %v479_v4  ;;  %v736_v12 = vsub.f32 %v224_v3, %v480_v5  ;;  %v226_v13 = vld [vmem:[%s3525_s28 + $0x18] sm:$0xff]  ;;  %v227_v19 = vld [vmem:[%s3525_s28 + $0x20] sm:$0xff]  ;;  %s3061_s30 = sshll.u32 %s212_s25, 4  ;;  %s3049_s8 = scalar_lea.sflag [#allocation4], %s3521_s29  ;;  %s4574_s30 = int_to_ptr.vmem [resolvable:$true] %s3061_s30 }
  0x6f   : > { %v482_v14 = vld [vmem:[%s3532_s24 + $0x18] sm:$0xff]  ;;  %v737_v18 = vsub.f32 %v225_v8, %v481_v9  ;;  %v483_v20 = vld [vmem:[%s3532_s24 + $0x20] sm:$0xff]  ;;  %v228_v26 = vld [vmem:[%s3525_s28 + $0x28] sm:$0xff]  ;;  %s3277_s14 = scalar_lea.vmem %s4574_s30, 16  ;;  %p4625_p5 = scmp.ne.s32.totalorder %s4623_s21, 0 }
  0x70   : > { %v1250_v6 = vadd.s32 8, %v3538_v1  ;;  %v1251_v10 = vadd.s32 16, %v3538_v1  ;;  %v1252_v15 = vadd.s32 24, %v3538_v1  ;;  %v1506_v16 = vadd.s32 %v3546_v7, %v3538_v1  ;;  %v484_v27 = vld [vmem:[%s3532_s24 + $0x28] sm:$0xff]  ;;  %v229_v32 = vld [vmem:[%s3525_s28 + $0x30] sm:$0xff]  ;;  %v230_v40 = vld [vmem:[%s3525_s28 + $0x38] sm:$0xff]  ;;  %p3278_p6 = scmp.ne.s32.totalorder %s4574_s30, %s3277_s14 }
  0x71   : > { %v1253_v21 = vadd.s32 32, %v3538_v1  ;;  %v738_v23 = vsub.f32 %v226_v13, %v482_v14  ;;  %v991_v24 = vand.u32 2147483647, %v735_v11  ;;  %v992_v25 = vand.u32 2147483647, %v736_v12  ;;  %v485_v33 = vld [vmem:[%s3532_s24 + $0x30] sm:$0xff] }
  0x72   : > { %v1507_v17 = vadd.s32 %v3546_v7, %v1250_v6  ;;  %v1508_v22 = vadd.s32 %v3546_v7, %v1251_v10  ;;  %v1254_v28 = vadd.s32 40, %v3538_v1  ;;  %v1509_v29 = vadd.s32 %v3546_v7, %v1252_v15  ;;  %v486_v41 = vld [vmem:[%s3532_s24 + $0x38] sm:$0xff]  ;;  %v231_v47 = vld [vmem:[%s3525_s28 + $0x40] sm:$0xff]  ;;  %v232_v55 = vld [vmem:[%s3525_s28 + $0x48] sm:$0xff]  ;;  %p3279_p1 = pnand %p3278_p6, %p4625_p5  ;;  %s3355_s13 = smov [#allocation7]  }
  0x73   : > { %vm1762_vm0 = vcmp.lt.s32.totalorder %v1506_v16, 2560  ;;  %v739_v30 = vsub.f32 %v227_v19, %v483_v20  ;;  %v993_v31 = vand.u32 2147483647, %v737_v18  ;;  %v1255_v34 = vadd.s32 48, %v3538_v1  ;;  %v487_v48 = vld [vmem:[%s3532_s24 + $0x40] sm:$0xff]  ;;  %v488_v56 = vld [vmem:[%s3532_s24 + $0x48] sm:$0xff] }
  0x74   : > { %vm1763_vm1 = vcmp.lt.s32.totalorder %v1507_v17, 2560  ;;  %v1510_v35 = vadd.s32 %v3546_v7, %v1253_v21  ;;  %vm1764_vm2 = vcmp.lt.s32.totalorder %v1508_v22, 2560  ;;  %v740_v36 = vsub.f32 %v228_v26, %v484_v27  ;;  %v233_v63 = vld [vmem:[%s3525_s28 + $0x50] sm:$0xff]  ;;  %v234_v9 = vld [vmem:[%s3525_s28 + $0x58] sm:$0xff]  ;;  %v235_v17 = vld [vmem:[%s3525_s28 + $0x60] sm:$0xff]  ;;  %p3280_p3 = pneg %p3279_p1  ;;  %s3281_s16 = sshll.u32 %s3355_s13, 4  ;;  %s3282_s16 = int_to_ptr.vmem [resolvable:$false] %s3281_s16 }
  0x75   : > { %v994_v37 = vand.u32 2147483647, %v738_v23  ;;  %v2530_v38 = vsel %vm1762_vm0, %v991_v24, 0.0  ;;  %v2531_v39 = vsel %vm1763_vm1, %v992_v25, 0.0  ;;  %v1256_v42 = vadd.s32 56, %v3538_v1  ;;  %v489_v0 = vld [vmem:[%s3532_s24 + $0x50] sm:$0xff]  ;;  %p3284_p4 = scmp.lt.s32.totalorder %s4574_s30, %s3282_s16 }
  0x76   : > { %v1511_v43 = vadd.s32 %v3546_v7, %v1254_v28  ;;  %vm1765_vm3 = vcmp.lt.s32.totalorder %v1509_v29, 2560  ;;  %v741_v44 = vsub.f32 %v229_v32, %v485_v33  ;;  %v995_v45 = vand.u32 2147483647, %v739_v30  ;;  %v490_v10 = vld [vmem:[%s3532_s24 + $0x58] sm:$0xff]  ;;  %v491_v18 = vld [vmem:[%s3532_s24 + $0x60] sm:$0xff]  ;;  %v236_v25 = vld [vmem:[%s3525_s28 + $0x68] sm:$0xff] }
  0x77   : > { %v2532_v46 = vsel %vm1764_vm2, %v993_v31, 0.0  ;;  %v1257_v49 = vadd.s32 64, %v3538_v1  ;;  %v1512_v50 = vadd.s32 %v3546_v7, %v1255_v34  ;;  %vm1766_vm4 = vcmp.lt.s32.totalorder %v1510_v35, 2560  ;;  %v492_v26 = vld [vmem:[%s3532_s24 + $0x68] sm:$0xff]  ;;  %v237_v33 = vld [vmem:[%s3525_s28 + $0x70] sm:$0xff]  ;;  %s3283_s23 = scalar_lea.vmem %s3282_s16, 32 }
  0x78   : > { %v2786_v51 = vadd.f32 %v2531_v39, %v2530_v38  ;;  %v742_v52 = vsub.f32 %v230_v40, %v486_v41  ;;  %v996_v53 = vand.u32 2147483647, %v740_v36  ;;  %v2533_v54 = vsel %vm1765_vm3, %v994_v37, 0.0  ;;  %v493_v34 = vld [vmem:[%s3532_s24 + $0x70] sm:$0xff]  ;;  %v238_v41 = vld [vmem:[%s3525_s28 + $0x78] sm:$0xff]  ;;  %p3285_p7 = scmp.lt.s32.totalorder %s3283_s23, %s3277_s14 }
  0x79   : > { %v1258_v57 = vadd.s32 72, %v3538_v1  ;;  %v1513_v58 = vadd.s32 %v3546_v7, %v1256_v42  ;;  %vm1767_vm5 = vcmp.lt.s32.totalorder %v1511_v43, 2560  ;;  %v743_v60 = vsub.f32 %v231_v47, %v487_v48  ;;  %v494_v42 = vld [vmem:[%s3532_s24 + $0x78] sm:$0xff] }
  0x7a   : > { %v2787_v59 = vadd.f32 %v2786_v51, %v2532_v46  ;;  %v997_v61 = vand.u32 2147483647, %v741_v44  ;;  %v2534_v62 = vsel %vm1766_vm4, %v995_v45, 0.0  ;;  %v1259_v2 = vadd.s32 80, %v3538_v1  ;;  %p3286_p9 = por %p3285_p7, %p3284_p4 }
  0x7b   : > { %v1514_v3 = vadd.s32 %v3546_v7, %v1257_v49  ;;  %vm1768_vm6 = vcmp.lt.s32.totalorder %v1512_v50, 2560  ;;  %v744_v5 = vsub.f32 %v232_v55, %v488_v56  ;;  %v998_v6 = vand.u32 2147483647, %v742_v52  ;;  %v239_v49 = vld [vmem:[%s3525_s28 + $0x80] sm:$0xff] }
  0x7c   : > { %v2788_v4 = vadd.f32 %v2787_v59, %v2533_v54  ;;  %v2535_v8 = vsel %vm1767_vm5, %v996_v53, 0.0  ;;  %v1260_v11 = vadd.s32 88, %v3538_v1  ;;  %v1515_v12 = vadd.s32 %v3546_v7, %v1258_v57  ;;  %v495_v50 = vld [vmem:[%s3532_s24 + $0x80] sm:$0xff]  ;;  %v240_v57 = vld [vmem:[%s3525_s28 + $0x88] sm:$0xff]  ;;  %p3287_p10 = pnand %p3286_p9, %p3280_p3 }
  0x7d   : > { %vm1769_vm7 = vcmp.lt.s32.totalorder %v1513_v58, 2560  ;;  %v745_v14 = vsub.f32 %v233_v63, %v489_v0  ;;  %v999_v15 = vand.u32 2147483647, %v743_v60  ;;  %v2536_v16 = vsel %vm1768_vm6, %v997_v61, 0.0  ;;  %v496_v58 = vld [vmem:[%s3532_s24 + $0x88] sm:$0xff] }
  0x7e   : > { %v2789_v13 = vadd.f32 %v2788_v4, %v2534_v62  ;;  %v1261_v19 = vadd.s32 96, %v3538_v1  ;;  %v1516_v20 = vadd.s32 %v3546_v7, %v1259_v2  ;;  %vm1770_vm8 = vcmp.lt.s32.totalorder %v1514_v3, 2560  ;;  %v241_v2 = vld [vmem:[%s3525_s28 + $0x90] sm:$0xff] }
  0x7f   : > { %v746_v22 = vsub.f32 %v234_v9, %v490_v10  ;;  %v1000_v23 = vand.u32 2147483647, %v744_v5  ;;  %v2537_v24 = vsel %vm1769_vm7, %v998_v6, 0.0  ;;  %v1262_v27 = vadd.s32 104, %v3538_v1  ;;  %v497_v3 = vld [vmem:[%s3532_s24 + $0x90] sm:$0xff] }
  0x80   : > { %v2790_v21 = vadd.f32 %v2789_v13, %v2535_v8  ;;  %v1517_v28 = vadd.s32 %v3546_v7, %v1260_v11  ;;  %vm1771_vm9 = vcmp.lt.s32.totalorder %v1515_v12, 2560  ;;  %v747_v30 = vsub.f32 %v235_v17, %v491_v18  ;;  %v242_v11 = vld [vmem:[%s3525_s28 + $0x98] sm:$0xff] }
  0x81   : > { %v1001_v31 = vand.u32 2147483647, %v745_v14  ;;  %v2538_v32 = vsel %vm1770_vm8, %v999_v15, 0.0  ;;  %v1263_v35 = vadd.s32 112, %v3538_v1  ;;  %v1518_v36 = vadd.s32 %v3546_v7, %v1261_v19  ;;  %v498_v12 = vld [vmem:[%s3532_s24 + $0x98] sm:$0xff]  ;;  %v243_v19 = vld [vmem:[%s3525_s28 + $0xa0] sm:$0xff] }
  0x82   : > { %v2791_v29 = vadd.f32 %v2790_v21, %v2536_v16  ;;  %vm1772_vm10 = vcmp.lt.s32.totalorder %v1516_v20, 2560  ;;  %v748_v38 = vsub.f32 %v236_v25, %v492_v26  ;;  %v1002_v39 = vand.u32 2147483647, %v746_v22  ;;  %v499_v20 = vld [vmem:[%s3532_s24 + $0xa0] sm:$0xff] }
  0x83   : > { %v2539_v40 = vsel %vm1771_vm9, %v1000_v23, 0.0  ;;  %v1264_v43 = vadd.s32 120, %v3538_v1  ;;  %v1519_v44 = vadd.s32 %v3546_v7, %v1262_v27  ;;  %vm1773_vm11 = vcmp.lt.s32.totalorder %v1517_v28, 2560  ;;  %v244_v27 = vld [vmem:[%s3525_s28 + $0xa8] sm:$0xff] }
  0x84   : > { %v2792_v37 = vadd.f32 %v2791_v29, %v2537_v24  ;;  %v749_v46 = vsub.f32 %v237_v33, %v493_v34  ;;  %v1003_v47 = vand.u32 2147483647, %v747_v30  ;;  %v2540_v48 = vsel %vm1772_vm10, %v1001_v31, 0.0  ;;  %v500_v28 = vld [vmem:[%s3532_s24 + $0xa8] sm:$0xff] }
  0x85   : > { %v1265_v51 = vadd.s32 128, %v3538_v1  ;;  %v1520_v52 = vadd.s32 %v3546_v7, %v1263_v35  ;;  %vm1774_vm12 = vcmp.lt.s32.totalorder %v1518_v36, 2560  ;;  %v750_v54 = vsub.f32 %v238_v41, %v494_v42  ;;  %v245_v35 = vld [vmem:[%s3525_s28 + $0xb0] sm:$0xff] }
  0x86   : > { %v2793_v45 = vadd.f32 %v2792_v37, %v2538_v32  ;;  %v1004_v55 = vand.u32 2147483647, %v748_v38  ;;  %v2541_v56 = vsel %vm1773_vm11, %v1002_v39, 0.0  ;;  %v1266_v59 = vadd.s32 136, %v3538_v1  ;;  %v501_v36 = vld [vmem:[%s3532_s24 + $0xb0] sm:$0xff] }
  0x87   : > { %v1521_v60 = vadd.s32 %v3546_v7, %v1264_v43  ;;  %vm1775_vm13 = vcmp.lt.s32.totalorder %v1519_v44, 2560  ;;  %v751_v62 = vsub.f32 %v239_v49, %v495_v50  ;;  %v1005_v63 = vand.u32 2147483647, %v749_v46  ;;  %v246_v43 = vld [vmem:[%s3525_s28 + $0xb8] sm:$0xff] }
  0x88   : > { %v2794_v53 = vadd.f32 %v2793_v45, %v2539_v40  ;;  %v2542_v0 = vsel %vm1774_vm12, %v1003_v47, 0.0  ;;  %v1267_v4 = vadd.s32 144, %v3538_v1  ;;  %v1522_v5 = vadd.s32 %v3546_v7, %v1265_v51  ;;  %v502_v44 = vld [vmem:[%s3532_s24 + $0xb8] sm:$0xff]  ;;  %v247_v51 = vld [vmem:[%s3525_s28 + $0xc0] sm:$0xff] }
  0x89   : > { %vm1776_vm14 = vcmp.lt.s32.totalorder %v1520_v52, 2560  ;;  %v752_v8 = vsub.f32 %v240_v57, %v496_v58  ;;  %v1006_v9 = vand.u32 2147483647, %v750_v54  ;;  %v2543_v10 = vsel %vm1775_vm13, %v1004_v55, 0.0  ;;  %v503_v52 = vld [vmem:[%s3532_s24 + $0xc0] sm:$0xff] }
  0x8a   : > { %v2795_v61 = vadd.f32 %v2794_v53, %v2540_v48  ;;  %v1268_v13 = vadd.s32 152, %v3538_v1  ;;  %v1523_v14 = vadd.s32 %v3546_v7, %v1266_v59  ;;  %vm1777_vm15 = vcmp.lt.s32.totalorder %v1521_v60, 2560  ;;  %v248_v59 = vld [vmem:[%s3525_s28 + $0xc8] sm:$0xff] }
  0x8b   : > { %v753_v16 = vsub.f32 %v241_v2, %v497_v3  ;;  %v1007_v17 = vand.u32 2147483647, %v751_v62  ;;  %v2544_v18 = vsel %vm1776_vm14, %v1005_v63, 0.0  ;;  %v1269_v21 = vadd.s32 160, %v3538_v1  ;;  %v504_v60 = vld [vmem:[%s3532_s24 + $0xc8] sm:$0xff] }
  0x8c   : > { %v2796_v6 = vadd.f32 %v2795_v61, %v2541_v56  ;;  %v1524_v22 = vadd.s32 %v3546_v7, %v1267_v4  ;;  %vm1778_vm0 = vcmp.lt.s32.totalorder %v1522_v5, 2560  ;;  %v754_v24 = vsub.f32 %v242_v11, %v498_v12  ;;  %v249_v4 = vld [vmem:[%s3525_s28 + $0xd0] sm:$0xff] }
  0x8d   : > { %v1008_v25 = vand.u32 2147483647, %v752_v8  ;;  %v2545_v26 = vsel %vm1777_vm15, %v1006_v9, 0.0  ;;  %v1270_v29 = vadd.s32 168, %v3538_v1  ;;  %v1525_v30 = vadd.s32 %v3546_v7, %v1268_v13  ;;  %v505_v5 = vld [vmem:[%s3532_s24 + $0xd0] sm:$0xff]  ;;  %v250_v13 = vld [vmem:[%s3525_s28 + $0xd8] sm:$0xff] }
  0x8e   : > { %v2797_v15 = vadd.f32 %v2796_v6, %v2542_v0  ;;  %vm1779_vm1 = vcmp.lt.s32.totalorder %v1523_v14, 2560  ;;  %v755_v32 = vsub.f32 %v243_v19, %v499_v20  ;;  %v1009_v33 = vand.u32 2147483647, %v753_v16  ;;  %v506_v14 = vld [vmem:[%s3532_s24 + $0xd8] sm:$0xff] }
  0x8f   : > { %v2546_v34 = vsel %vm1778_vm0, %v1007_v17, 0.0  ;;  %v1271_v37 = vadd.s32 176, %v3538_v1  ;;  %v1526_v38 = vadd.s32 %v3546_v7, %v1269_v21  ;;  %vm1780_vm2 = vcmp.lt.s32.totalorder %v1524_v22, 2560  ;;  %v251_v21 = vld [vmem:[%s3525_s28 + $0xe0] sm:$0xff] }
  0x90   : > { %v2798_v23 = vadd.f32 %v2797_v15, %v2543_v10  ;;  %v756_v40 = vsub.f32 %v244_v27, %v500_v28  ;;  %v1010_v41 = vand.u32 2147483647, %v754_v24  ;;  %v2547_v42 = vsel %vm1779_vm1, %v1008_v25, 0.0  ;;  %v507_v22 = vld [vmem:[%s3532_s24 + $0xe0] sm:$0xff] }
  0x91   : > { %v1272_v45 = vadd.s32 184, %v3538_v1  ;;  %v1527_v46 = vadd.s32 %v3546_v7, %v1270_v29  ;;  %vm1781_vm3 = vcmp.lt.s32.totalorder %v1525_v30, 2560  ;;  %v757_v48 = vsub.f32 %v245_v35, %v501_v36  ;;  %v252_v29 = vld [vmem:[%s3525_s28 + $0xe8] sm:$0xff] }
  0x92   : > { %v2799_v31 = vadd.f32 %v2798_v23, %v2544_v18  ;;  %v1011_v49 = vand.u32 2147483647, %v755_v32  ;;  %v2548_v50 = vsel %vm1780_vm2, %v1009_v33, 0.0  ;;  %v1273_v53 = vadd.s32 192, %v3538_v1  ;;  %v508_v30 = vld [vmem:[%s3532_s24 + $0xe8] sm:$0xff] }
  0x93   : > { %v1528_v54 = vadd.s32 %v3546_v7, %v1271_v37  ;;  %vm1782_vm4 = vcmp.lt.s32.totalorder %v1526_v38, 2560  ;;  %v758_v56 = vsub.f32 %v246_v43, %v502_v44  ;;  %v1012_v57 = vand.u32 2147483647, %v756_v40  ;;  %v253_v37 = vld [vmem:[%s3525_s28 + $0xf0] sm:$0xff] }
  0x94   : > { %v2800_v39 = vadd.f32 %v2799_v31, %v2545_v26  ;;  %v2549_v58 = vsel %vm1781_vm3, %v1010_v41, 0.0  ;;  %v1274_v61 = vadd.s32 200, %v3538_v1  ;;  %v1529_v62 = vadd.s32 %v3546_v7, %v1272_v45  ;;  %v509_v38 = vld [vmem:[%s3532_s24 + $0xf0] sm:$0xff]  ;;  %v254_v45 = vld [vmem:[%s3525_s28 + $0xf8] sm:$0xff] }
  0x95   : > { %vm1783_vm5 = vcmp.lt.s32.totalorder %v1527_v46, 2560  ;;  %v759_v0 = vsub.f32 %v247_v51, %v503_v52  ;;  %v1013_v2 = vand.u32 2147483647, %v757_v48  ;;  %v2550_v3 = vsel %vm1782_vm4, %v1011_v49, 0.0  ;;  %v510_v46 = vld [vmem:[%s3532_s24 + $0xf8] sm:$0xff] }
  0x96   : > { %v2801_v47 = vadd.f32 %v2800_v39, %v2546_v34  ;;  %v1275_v6 = vadd.s32 208, %v3538_v1  ;;  %v1530_v8 = vadd.s32 %v3546_v7, %v1273_v53  ;;  %vm1784_vm6 = vcmp.lt.s32.totalorder %v1528_v54, 2560  ;;  %v255_v53 = vld [vmem:[%s3525_s28 + $0x100] sm:$0xff] }
  0x97   : > { %v760_v10 = vsub.f32 %v248_v59, %v504_v60  ;;  %v1014_v11 = vand.u32 2147483647, %v758_v56  ;;  %v2551_v12 = vsel %vm1783_vm5, %v1012_v57, 0.0  ;;  %v1276_v15 = vadd.s32 216, %v3538_v1  ;;  %v511_v54 = vld [vmem:[%s3532_s24 + $0x100] sm:$0xff] }
  0x98   : > { %v2802_v55 = vadd.f32 %v2801_v47, %v2547_v42  ;;  %v1531_v16 = vadd.s32 %v3546_v7, %v1274_v61  ;;  %vm1785_vm7 = vcmp.lt.s32.totalorder %v1529_v62, 2560  ;;  %v761_v18 = vsub.f32 %v249_v4, %v505_v5  ;;  %v256_v61 = vld [vmem:[%s3525_s28 + $0x108] sm:$0xff] }
  0x99   : > { %v1015_v19 = vand.u32 2147483647, %v759_v0  ;;  %v2552_v20 = vsel %vm1784_vm6, %v1013_v2, 0.0  ;;  %v1277_v23 = vadd.s32 224, %v3538_v1  ;;  %v1532_v24 = vadd.s32 %v3546_v7, %v1275_v6  ;;  %v512_v62 = vld [vmem:[%s3532_s24 + $0x108] sm:$0xff]  ;;  %v257_v6 = vld [vmem:[%s3525_s28 + $0x110] sm:$0xff] }
  0x9a   : > { %v2803_v63 = vadd.f32 %v2802_v55, %v2548_v50  ;;  %vm1786_vm8 = vcmp.lt.s32.totalorder %v1530_v8, 2560  ;;  %v762_v26 = vsub.f32 %v250_v13, %v506_v14  ;;  %v1016_v27 = vand.u32 2147483647, %v760_v10  ;;  %v513_v8 = vld [vmem:[%s3532_s24 + $0x110] sm:$0xff] }
  0x9b   : > { %v2553_v28 = vsel %vm1785_vm7, %v1014_v11, 0.0  ;;  %v1278_v31 = vadd.s32 232, %v3538_v1  ;;  %v1533_v32 = vadd.s32 %v3546_v7, %v1276_v15  ;;  %vm1787_vm9 = vcmp.lt.s32.totalorder %v1531_v16, 2560  ;;  %v258_v15 = vld [vmem:[%s3525_s28 + $0x118] sm:$0xff] }
  0x9c   : > { %v2804_v9 = vadd.f32 %v2803_v63, %v2549_v58  ;;  %v763_v34 = vsub.f32 %v251_v21, %v507_v22  ;;  %v1017_v35 = vand.u32 2147483647, %v761_v18  ;;  %v2554_v36 = vsel %vm1786_vm8, %v1015_v19, 0.0  ;;  %v514_v16 = vld [vmem:[%s3532_s24 + $0x118] sm:$0xff] }
  0x9d   : > { %v1279_v39 = vadd.s32 240, %v3538_v1  ;;  %v1534_v40 = vadd.s32 %v3546_v7, %v1277_v23  ;;  %vm1788_vm10 = vcmp.lt.s32.totalorder %v1532_v24, 2560  ;;  %v764_v42 = vsub.f32 %v252_v29, %v508_v30  ;;  %v259_v23 = vld [vmem:[%s3525_s28 + $0x120] sm:$0xff] }
  0x9e   : > { %v2805_v17 = vadd.f32 %v2804_v9, %v2550_v3  ;;  %v1018_v43 = vand.u32 2147483647, %v762_v26  ;;  %v2555_v44 = vsel %vm1787_vm9, %v1016_v27, 0.0  ;;  %v1280_v47 = vadd.s32 248, %v3538_v1  ;;  %v515_v24 = vld [vmem:[%s3532_s24 + $0x120] sm:$0xff] }
  0x9f   : > { %v1535_v48 = vadd.s32 %v3546_v7, %v1278_v31  ;;  %vm1789_vm11 = vcmp.lt.s32.totalorder %v1533_v32, 2560  ;;  %v765_v50 = vsub.f32 %v253_v37, %v509_v38  ;;  %v1019_v51 = vand.u32 2147483647, %v763_v34  ;;  %v260_v31 = vld [vmem:[%s3525_s28 + $0x128] sm:$0xff] }
  0xa0   : > { %v2806_v25 = vadd.f32 %v2805_v17, %v2551_v12  ;;  %v2556_v52 = vsel %vm1788_vm10, %v1017_v35, 0.0  ;;  %v1281_v55 = vadd.s32 256, %v3538_v1  ;;  %v1536_v56 = vadd.s32 %v3546_v7, %v1279_v39  ;;  %v516_v32 = vld [vmem:[%s3532_s24 + $0x128] sm:$0xff]  ;;  %v261_v39 = vld [vmem:[%s3525_s28 + $0x130] sm:$0xff] }
  0xa1   : > { %vm1790_vm12 = vcmp.lt.s32.totalorder %v1534_v40, 2560  ;;  %v766_v58 = vsub.f32 %v254_v45, %v510_v46  ;;  %v1020_v59 = vand.u32 2147483647, %v764_v42  ;;  %v2557_v60 = vsel %vm1789_vm11, %v1018_v43, 0.0  ;;  %v517_v40 = vld [vmem:[%s3532_s24 + $0x130] sm:$0xff] }
  0xa2   : > { %v2807_v33 = vadd.f32 %v2806_v25, %v2552_v20  ;;  %v1282_v63 = vadd.s32 264, %v3538_v1  ;;  %v1537_v0 = vadd.s32 %v3546_v7, %v1280_v47  ;;  %vm1791_vm13 = vcmp.lt.s32.totalorder %v1535_v48, 2560  ;;  %v262_v47 = vld [vmem:[%s3525_s28 + $0x138] sm:$0xff] }
  0xa3   : > { %v767_v3 = vsub.f32 %v255_v53, %v511_v54  ;;  %v1021_v4 = vand.u32 2147483647, %v765_v50  ;;  %v2558_v5 = vsel %vm1790_vm12, %v1019_v51, 0.0  ;;  %v1283_v9 = vadd.s32 272, %v3538_v1  ;;  %v518_v48 = vld [vmem:[%s3532_s24 + $0x138] sm:$0xff] }
  0xa4   : > { %v2808_v41 = vadd.f32 %v2807_v33, %v2553_v28  ;;  %v1538_v10 = vadd.s32 %v3546_v7, %v1281_v55  ;;  %vm1792_vm14 = vcmp.lt.s32.totalorder %v1536_v56, 2560  ;;  %v768_v12 = vsub.f32 %v256_v61, %v512_v62  ;;  %v263_v55 = vld [vmem:[%s3525_s28 + $0x140] sm:$0xff] }
  0xa5   : > { %v1022_v13 = vand.u32 2147483647, %v766_v58  ;;  %v2559_v14 = vsel %vm1791_vm13, %v1020_v59, 0.0  ;;  %v1284_v17 = vadd.s32 280, %v3538_v1  ;;  %v1539_v18 = vadd.s32 %v3546_v7, %v1282_v63  ;;  %v519_v56 = vld [vmem:[%s3532_s24 + $0x140] sm:$0xff]  ;;  %v264_v63 = vld [vmem:[%s3525_s28 + $0x148] sm:$0xff] }
  0xa6   : > { %v2809_v49 = vadd.f32 %v2808_v41, %v2554_v36  ;;  %vm1793_vm15 = vcmp.lt.s32.totalorder %v1537_v0, 2560  ;;  %v769_v20 = vsub.f32 %v257_v6, %v513_v8  ;;  %v1023_v21 = vand.u32 2147483647, %v767_v3  ;;  %v520_v0 = vld [vmem:[%s3532_s24 + $0x148] sm:$0xff] }
  0xa7   : > { %v2560_v22 = vsel %vm1792_vm14, %v1021_v4, 0.0  ;;  %v1285_v25 = vadd.s32 288, %v3538_v1  ;;  %v1540_v26 = vadd.s32 %v3546_v7, %v1283_v9  ;;  %vm1794_vm0 = vcmp.lt.s32.totalorder %v1538_v10, 2560  ;;  %v265_v9 = vld [vmem:[%s3525_s28 + $0x150] sm:$0xff] }
  0xa8   : > { %v2810_v57 = vadd.f32 %v2809_v49, %v2555_v44  ;;  %v770_v28 = vsub.f32 %v258_v15, %v514_v16  ;;  %v1024_v29 = vand.u32 2147483647, %v768_v12  ;;  %v2561_v30 = vsel %vm1793_vm15, %v1022_v13, 0.0  ;;  %v521_v10 = vld [vmem:[%s3532_s24 + $0x150] sm:$0xff] }
  0xa9   : > { %v1286_v33 = vadd.s32 296, %v3538_v1  ;;  %v1541_v34 = vadd.s32 %v3546_v7, %v1284_v17  ;;  %vm1795_vm1 = vcmp.lt.s32.totalorder %v1539_v18, 2560  ;;  %v771_v36 = vsub.f32 %v259_v23, %v515_v24  ;;  %v266_v17 = vld [vmem:[%s3525_s28 + $0x158] sm:$0xff] }
  0xaa   : > { %v2811_v2 = vadd.f32 %v2810_v57, %v2556_v52  ;;  %v1025_v37 = vand.u32 2147483647, %v769_v20  ;;  %v2562_v38 = vsel %vm1794_vm0, %v1023_v21, 0.0  ;;  %v1287_v41 = vadd.s32 304, %v3538_v1  ;;  %v522_v18 = vld [vmem:[%s3532_s24 + $0x158] sm:$0xff] }
  0xab   : > { %v1542_v42 = vadd.s32 %v3546_v7, %v1285_v25  ;;  %vm1796_vm2 = vcmp.lt.s32.totalorder %v1540_v26, 2560  ;;  %v772_v44 = vsub.f32 %v260_v31, %v516_v32  ;;  %v1026_v45 = vand.u32 2147483647, %v770_v28  ;;  %v267_v25 = vld [vmem:[%s3525_s28 + $0x160] sm:$0xff] }
  0xac   : > { %v2812_v11 = vadd.f32 %v2811_v2, %v2557_v60  ;;  %v2563_v46 = vsel %vm1795_vm1, %v1024_v29, 0.0  ;;  %v1288_v49 = vadd.s32 312, %v3538_v1  ;;  %v1543_v50 = vadd.s32 %v3546_v7, %v1286_v33  ;;  %v523_v26 = vld [vmem:[%s3532_s24 + $0x160] sm:$0xff]  ;;  %v268_v33 = vld [vmem:[%s3525_s28 + $0x168] sm:$0xff] }
  0xad   : > { %vm1797_vm3 = vcmp.lt.s32.totalorder %v1541_v34, 2560  ;;  %v773_v52 = vsub.f32 %v261_v39, %v517_v40  ;;  %v1027_v53 = vand.u32 2147483647, %v771_v36  ;;  %v2564_v54 = vsel %vm1796_vm2, %v1025_v37, 0.0  ;;  %v524_v34 = vld [vmem:[%s3532_s24 + $0x168] sm:$0xff] }
  0xae   : > { %v2813_v19 = vadd.f32 %v2812_v11, %v2558_v5  ;;  %v1289_v57 = vadd.s32 320, %v3538_v1  ;;  %v1544_v58 = vadd.s32 %v3546_v7, %v1287_v41  ;;  %vm1798_vm4 = vcmp.lt.s32.totalorder %v1542_v42, 2560  ;;  %v269_v41 = vld [vmem:[%s3525_s28 + $0x170] sm:$0xff] }
  0xaf   : > { %v774_v60 = vsub.f32 %v262_v47, %v518_v48  ;;  %v1028_v61 = vand.u32 2147483647, %v772_v44  ;;  %v2565_v62 = vsel %vm1797_vm3, %v1026_v45, 0.0  ;;  %v1290_v2 = vadd.s32 328, %v3538_v1  ;;  %v525_v42 = vld [vmem:[%s3532_s24 + $0x170] sm:$0xff] }
  0xb0   : > { %v2814_v27 = vadd.f32 %v2813_v19, %v2559_v14  ;;  %v1545_v3 = vadd.s32 %v3546_v7, %v1288_v49  ;;  %vm1799_vm5 = vcmp.lt.s32.totalorder %v1543_v50, 2560  ;;  %v775_v5 = vsub.f32 %v263_v55, %v519_v56  ;;  %v270_v49 = vld [vmem:[%s3525_s28 + $0x178] sm:$0xff] }
  0xb1   : > { %v1029_v6 = vand.u32 2147483647, %v773_v52  ;;  %v2566_v8 = vsel %vm1798_vm4, %v1027_v53, 0.0  ;;  %v1291_v11 = vadd.s32 336, %v3538_v1  ;;  %v1546_v12 = vadd.s32 %v3546_v7, %v1289_v57  ;;  %v526_v50 = vld [vmem:[%s3532_s24 + $0x178] sm:$0xff]  ;;  %v271_v57 = vld [vmem:[%s3525_s28 + $0x180] sm:$0xff] }
  0xb2   : > { %v2815_v35 = vadd.f32 %v2814_v27, %v2560_v22  ;;  %vm1800_vm6 = vcmp.lt.s32.totalorder %v1544_v58, 2560  ;;  %v776_v14 = vsub.f32 %v264_v63, %v520_v0  ;;  %v1030_v15 = vand.u32 2147483647, %v774_v60  ;;  %v527_v58 = vld [vmem:[%s3532_s24 + $0x180] sm:$0xff] }
  0xb3   : > { %v2567_v16 = vsel %vm1799_vm5, %v1028_v61, 0.0  ;;  %v1292_v19 = vadd.s32 344, %v3538_v1  ;;  %v1547_v20 = vadd.s32 %v3546_v7, %v1290_v2  ;;  %vm1801_vm7 = vcmp.lt.s32.totalorder %v1545_v3, 2560  ;;  %v272_v2 = vld [vmem:[%s3525_s28 + $0x188] sm:$0xff] }
  0xb4   : > { %v2816_v43 = vadd.f32 %v2815_v35, %v2561_v30  ;;  %v777_v22 = vsub.f32 %v265_v9, %v521_v10  ;;  %v1031_v23 = vand.u32 2147483647, %v775_v5  ;;  %v2568_v24 = vsel %vm1800_vm6, %v1029_v6, 0.0  ;;  %v528_v3 = vld [vmem:[%s3532_s24 + $0x188] sm:$0xff] }
  0xb5   : > { %v1293_v27 = vadd.s32 352, %v3538_v1  ;;  %v1548_v28 = vadd.s32 %v3546_v7, %v1291_v11  ;;  %vm1802_vm8 = vcmp.lt.s32.totalorder %v1546_v12, 2560  ;;  %v778_v30 = vsub.f32 %v266_v17, %v522_v18  ;;  %v273_v11 = vld [vmem:[%s3525_s28 + $0x190] sm:$0xff] }
  0xb6   : > { %v2817_v51 = vadd.f32 %v2816_v43, %v2562_v38  ;;  %v1032_v31 = vand.u32 2147483647, %v776_v14  ;;  %v2569_v32 = vsel %vm1801_vm7, %v1030_v15, 0.0  ;;  %v1294_v35 = vadd.s32 360, %v3538_v1  ;;  %v529_v12 = vld [vmem:[%s3532_s24 + $0x190] sm:$0xff] }
  0xb7   : > { %v1549_v36 = vadd.s32 %v3546_v7, %v1292_v19  ;;  %vm1803_vm9 = vcmp.lt.s32.totalorder %v1547_v20, 2560  ;;  %v779_v38 = vsub.f32 %v267_v25, %v523_v26  ;;  %v1033_v39 = vand.u32 2147483647, %v777_v22  ;;  %v274_v19 = vld [vmem:[%s3525_s28 + $0x198] sm:$0xff] }
  0xb8   : > { %v2818_v59 = vadd.f32 %v2817_v51, %v2563_v46  ;;  %v2570_v40 = vsel %vm1802_vm8, %v1031_v23, 0.0  ;;  %v1295_v43 = vadd.s32 368, %v3538_v1  ;;  %v1550_v44 = vadd.s32 %v3546_v7, %v1293_v27  ;;  %v530_v20 = vld [vmem:[%s3532_s24 + $0x198] sm:$0xff]  ;;  %v275_v27 = vld [vmem:[%s3525_s28 + $0x1a0] sm:$0xff] }
  0xb9   : > { %vm1804_vm10 = vcmp.lt.s32.totalorder %v1548_v28, 2560  ;;  %v780_v46 = vsub.f32 %v268_v33, %v524_v34  ;;  %v1034_v47 = vand.u32 2147483647, %v778_v30  ;;  %v2571_v48 = vsel %vm1803_vm9, %v1032_v31, 0.0  ;;  %v531_v28 = vld [vmem:[%s3532_s24 + $0x1a0] sm:$0xff] }
  0xba   : > { %v2819_v4 = vadd.f32 %v2818_v59, %v2564_v54  ;;  %v1296_v51 = vadd.s32 376, %v3538_v1  ;;  %v1551_v52 = vadd.s32 %v3546_v7, %v1294_v35  ;;  %vm1805_vm11 = vcmp.lt.s32.totalorder %v1549_v36, 2560  ;;  %v276_v35 = vld [vmem:[%s3525_s28 + $0x1a8] sm:$0xff] }
  0xbb   : > { %v781_v54 = vsub.f32 %v269_v41, %v525_v42  ;;  %v1035_v55 = vand.u32 2147483647, %v779_v38  ;;  %v2572_v56 = vsel %vm1804_vm10, %v1033_v39, 0.0  ;;  %v1297_v59 = vadd.s32 384, %v3538_v1  ;;  %v532_v36 = vld [vmem:[%s3532_s24 + $0x1a8] sm:$0xff] }
  0xbc   : > { %v2820_v13 = vadd.f32 %v2819_v4, %v2565_v62  ;;  %v1552_v60 = vadd.s32 %v3546_v7, %v1295_v43  ;;  %vm1806_vm12 = vcmp.lt.s32.totalorder %v1550_v44, 2560  ;;  %v782_v62 = vsub.f32 %v270_v49, %v526_v50  ;;  %v277_v43 = vld [vmem:[%s3525_s28 + $0x1b0] sm:$0xff] }
  0xbd   : > { %v1036_v63 = vand.u32 2147483647, %v780_v46  ;;  %v2573_v0 = vsel %vm1805_vm11, %v1034_v47, 0.0  ;;  %v1298_v4 = vadd.s32 392, %v3538_v1  ;;  %v1553_v5 = vadd.s32 %v3546_v7, %v1296_v51  ;;  %v533_v44 = vld [vmem:[%s3532_s24 + $0x1b0] sm:$0xff]  ;;  %v278_v51 = vld [vmem:[%s3525_s28 + $0x1b8] sm:$0xff] }
  0xbe   : > { %v2821_v21 = vadd.f32 %v2820_v13, %v2566_v8  ;;  %vm1807_vm13 = vcmp.lt.s32.totalorder %v1551_v52, 2560  ;;  %v783_v8 = vsub.f32 %v271_v57, %v527_v58  ;;  %v1037_v9 = vand.u32 2147483647, %v781_v54  ;;  %v534_v52 = vld [vmem:[%s3532_s24 + $0x1b8] sm:$0xff] }
  0xbf   : > { %v2574_v10 = vsel %vm1806_vm12, %v1035_v55, 0.0  ;;  %v1299_v13 = vadd.s32 400, %v3538_v1  ;;  %v1554_v14 = vadd.s32 %v3546_v7, %v1297_v59  ;;  %vm1808_vm14 = vcmp.lt.s32.totalorder %v1552_v60, 2560  ;;  %v279_v59 = vld [vmem:[%s3525_s28 + $0x1c0] sm:$0xff] }
  0xc0   : > { %v2822_v29 = vadd.f32 %v2821_v21, %v2567_v16  ;;  %v784_v16 = vsub.f32 %v272_v2, %v528_v3  ;;  %v1038_v17 = vand.u32 2147483647, %v782_v62  ;;  %v2575_v18 = vsel %vm1807_vm13, %v1036_v63, 0.0  ;;  %v535_v60 = vld [vmem:[%s3532_s24 + $0x1c0] sm:$0xff] }
  0xc1   : > { %v1300_v21 = vadd.s32 408, %v3538_v1  ;;  %v1555_v22 = vadd.s32 %v3546_v7, %v1298_v4  ;;  %vm1809_vm15 = vcmp.lt.s32.totalorder %v1553_v5, 2560  ;;  %v1039_v25 = vand.u32 2147483647, %v783_v8  ;;  %v280_v4 = vld [vmem:[%s3525_s28 + $0x1c8] sm:$0xff] }
  0xc2   : > { %v2823_v37 = vadd.f32 %v2822_v29, %v2568_v24  ;;  %v785_v24 = vsub.f32 %v273_v11, %v529_v12  ;;  %v2576_v26 = vsel %vm1808_vm14, %v1037_v9, 0.0  ;;  %v1301_v29 = vadd.s32 416, %v3538_v1  ;;  %v536_v5 = vld [vmem:[%s3532_s24 + $0x1c8] sm:$0xff] }
  0xc3   : > { %v1556_v30 = vadd.s32 %v3546_v7, %v1299_v13  ;;  %vm1810_vm0 = vcmp.lt.s32.totalorder %v1554_v14, 2560  ;;  %v1040_v33 = vand.u32 2147483647, %v784_v16  ;;  %v2577_v34 = vsel %vm1809_vm15, %v1038_v17, 0.0  ;;  %v281_v13 = vld [vmem:[%s3525_s28 + $0x1d0] sm:$0xff] }
  0xc4   : > { %v2824_v45 = vadd.f32 %v2823_v37, %v2569_v32  ;;  %v786_v32 = vsub.f32 %v274_v19, %v530_v20  ;;  %v1302_v37 = vadd.s32 424, %v3538_v1  ;;  %v1557_v38 = vadd.s32 %v3546_v7, %v1300_v21  ;;  %v537_v14 = vld [vmem:[%s3532_s24 + $0x1d0] sm:$0xff]  ;;  %v282_v21 = vld [vmem:[%s3525_s28 + $0x1d8] sm:$0xff] }
  0xc5   : > { %vm1811_vm1 = vcmp.lt.s32.totalorder %v1555_v22, 2560  ;;  %v1041_v41 = vand.u32 2147483647, %v785_v24  ;;  %v2578_v42 = vsel %vm1810_vm0, %v1039_v25, 0.0  ;;  %v1558_v46 = vadd.s32 %v3546_v7, %v1301_v29  ;;  %v538_v22 = vld [vmem:[%s3532_s24 + $0x1d8] sm:$0xff]  ;;  %v283_v29 = vld [vmem:[%s3525_s28 + $0x1e0] sm:$0xff] }
  0xc6   : > { %v2825_v53 = vadd.f32 %v2824_v45, %v2570_v40  ;;  %v787_v40 = vsub.f32 %v275_v27, %v531_v28  ;;  %v1303_v45 = vadd.s32 432, %v3538_v1  ;;  %vm1812_vm2 = vcmp.lt.s32.totalorder %v1556_v30, 2560  ;;  %v539_v30 = vld [vmem:[%s3532_s24 + $0x1e0] sm:$0xff] }
  0xc7   : > { %v1042_v49 = vand.u32 2147483647, %v786_v32  ;;  %v2579_v50 = vsel %vm1811_vm1, %v1040_v33, 0.0  ;;  %v1559_v54 = vadd.s32 %v3546_v7, %v1302_v37  ;;  %vm1813_vm3 = vcmp.lt.s32.totalorder %v1557_v38, 2560  ;;  %v284_v37 = vld [vmem:[%s3525_s28 + $0x1e8] sm:$0xff] }
  0xc8   : > { %v2826_v61 = vadd.f32 %v2825_v53, %v2571_v48  ;;  %v788_v48 = vsub.f32 %v276_v35, %v532_v36  ;;  %v1304_v53 = vadd.s32 440, %v3538_v1  ;;  %v1043_v57 = vand.u32 2147483647, %v787_v40  ;;  %v540_v38 = vld [vmem:[%s3532_s24 + $0x1e8] sm:$0xff] }
  0xc9   : > { %v2580_v58 = vsel %vm1812_vm2, %v1041_v41, 0.0  ;;  %v1560_v62 = vadd.s32 %v3546_v7, %v1303_v45  ;;  %vm1814_vm4 = vcmp.lt.s32.totalorder %v1558_v46, 2560  ;;  %v2581_v3 = vsel %vm1813_vm3, %v1042_v49, 0.0  ;;  %v285_v45 = vld [vmem:[%s3525_s28 + $0x1f0] sm:$0xff] }
  0xca   : > { %v2827_v6 = vadd.f32 %v2826_v61, %v2572_v56  ;;  %v789_v56 = vsub.f32 %v277_v43, %v533_v44  ;;  %v1305_v61 = vadd.s32 448, %v3538_v1  ;;  %v1044_v2 = vand.u32 2147483647, %v788_v48  ;;  %v541_v46 = vld [vmem:[%s3532_s24 + $0x1f0] sm:$0xff] }
  0xcb   : > { %v1561_v8 = vadd.s32 %v3546_v7, %v1304_v53  ;;  %vm1815_vm5 = vcmp.lt.s32.totalorder %v1559_v54, 2560  ;;  %v2582_v12 = vsel %vm1814_vm4, %v1043_v57, 0.0  ;;  %vm1816_vm6 = vcmp.lt.s32.totalorder %v1560_v62, 2560  ;;  %v286_v53 = vld [vmem:[%s3525_s28 + $0x1f8] sm:$0xff]  ;;  %v543_v62 = vld [vmem:[%s3532_s24 + $0x200] sm:$0xff] }
  0xcc   : > { %v2828_v15 = vadd.f32 %v2827_v6, %v2573_v0  ;;  %v790_v0 = vsub.f32 %v278_v51, %v534_v52  ;;  %v1306_v6 = vadd.s32 456, %v3538_v1  ;;  %v1045_v11 = vand.u32 2147483647, %v789_v56  ;;  %v542_v54 = vld [vmem:[%s3532_s24 + $0x1f8] sm:$0xff] }
  0xcd   : > { %v1562_v16 = vadd.s32 %v3546_v7, %v1305_v61  ;;  %v2583_v20 = vsel %vm1815_vm5, %v1044_v2, 0.0  ;;  %vm1817_vm7 = vcmp.lt.s32.totalorder %v1561_v8, 2560  ;;  %v287_v61 = vld [vmem:[%s3525_s28 + $0x200] sm:$0xff]  ;;  %v544_v8 = vld [vmem:[%s3532_s24 + $0x208] sm:$0xff] }
  0xce   : > { %v2829_v23 = vadd.f32 %v2828_v15, %v2574_v10  ;;  %v791_v10 = vsub.f32 %v279_v59, %v535_v60  ;;  %v1307_v15 = vadd.s32 464, %v3538_v1  ;;  %v1046_v19 = vand.u32 2147483647, %v790_v0 }
  0xcf   : > { %v1563_v24 = vadd.s32 %v3546_v7, %v1306_v6  ;;  %v2584_v28 = vsel %vm1816_vm6, %v1045_v11, 0.0  ;;  %vm1818_vm8 = vcmp.lt.s32.totalorder %v1562_v16, 2560  ;;  %v288_v6 = vld [vmem:[%s3525_s28 + $0x208] sm:$0xff]  ;;  %v545_v16 = vld [vmem:[%s3532_s24 + $0x210] sm:$0xff] }
  0xd0   : > { %v2830_v31 = vadd.f32 %v2829_v23, %v2575_v18  ;;  %v792_v18 = vsub.f32 %v280_v4, %v536_v5  ;;  %v1308_v23 = vadd.s32 472, %v3538_v1  ;;  %v1047_v27 = vand.u32 2147483647, %v791_v10 }
  0xd1   : > { %v1564_v32 = vadd.s32 %v3546_v7, %v1307_v15  ;;  %v2585_v36 = vsel %vm1817_vm7, %v1046_v19, 0.0  ;;  %vm1819_vm9 = vcmp.lt.s32.totalorder %v1563_v24, 2560  ;;  %v289_v15 = vld [vmem:[%s3525_s28 + $0x210] sm:$0xff]  ;;  %v546_v24 = vld [vmem:[%s3532_s24 + $0x218] sm:$0xff] }
  0xd2   : > { %v2831_v39 = vadd.f32 %v2830_v31, %v2576_v26  ;;  %v793_v26 = vsub.f32 %v281_v13, %v537_v14  ;;  %v1309_v31 = vadd.s32 480, %v3538_v1  ;;  %v1048_v35 = vand.u32 2147483647, %v792_v18 }
  0xd3   : > { %v1565_v40 = vadd.s32 %v3546_v7, %v1308_v23  ;;  %v2586_v44 = vsel %vm1818_vm8, %v1047_v27, 0.0  ;;  %vm1820_vm10 = vcmp.lt.s32.totalorder %v1564_v32, 2560  ;;  %v290_v23 = vld [vmem:[%s3525_s28 + $0x218] sm:$0xff]  ;;  %v547_v32 = vld [vmem:[%s3532_s24 + $0x220] sm:$0xff] }
  0xd4   : > { %v2832_v47 = vadd.f32 %v2831_v39, %v2577_v34  ;;  %v794_v34 = vsub.f32 %v282_v21, %v538_v22  ;;  %v1310_v39 = vadd.s32 488, %v3538_v1  ;;  %v1049_v43 = vand.u32 2147483647, %v793_v26 }
  0xd5   : > { %v1566_v48 = vadd.s32 %v3546_v7, %v1309_v31  ;;  %v2587_v52 = vsel %vm1819_vm9, %v1048_v35, 0.0  ;;  %vm1821_vm11 = vcmp.lt.s32.totalorder %v1565_v40, 2560  ;;  %v291_v31 = vld [vmem:[%s3525_s28 + $0x220] sm:$0xff]  ;;  %v548_v40 = vld [vmem:[%s3532_s24 + $0x228] sm:$0xff] }
  0xd6   : > { %v2833_v55 = vadd.f32 %v2832_v47, %v2578_v42  ;;  %v795_v42 = vsub.f32 %v283_v29, %v539_v30  ;;  %v1311_v47 = vadd.s32 496, %v3538_v1  ;;  %v1050_v51 = vand.u32 2147483647, %v794_v34 }
  0xd7   : > { %v1567_v56 = vadd.s32 %v3546_v7, %v1310_v39  ;;  %v2588_v60 = vsel %vm1820_vm10, %v1049_v43, 0.0  ;;  %vm1822_vm12 = vcmp.lt.s32.totalorder %v1566_v48, 2560  ;;  %v292_v39 = vld [vmem:[%s3525_s28 + $0x228] sm:$0xff]  ;;  %v549_v48 = vld [vmem:[%s3532_s24 + $0x230] sm:$0xff] }
  0xd8   : > { %v2834_v63 = vadd.f32 %v2833_v55, %v2579_v50  ;;  %v796_v50 = vsub.f32 %v284_v37, %v540_v38  ;;  %v1312_v55 = vadd.s32 504, %v3538_v1  ;;  %v1051_v59 = vand.u32 2147483647, %v795_v42 }
  0xd9   : > { %v1568_v0 = vadd.s32 %v3546_v7, %v1311_v47  ;;  %v2589_v5 = vsel %vm1821_vm11, %v1050_v51, 0.0  ;;  %vm1823_vm13 = vcmp.lt.s32.totalorder %v1567_v56, 2560  ;;  %v293_v47 = vld [vmem:[%s3525_s28 + $0x230] sm:$0xff]  ;;  %v550_v56 = vld [vmem:[%s3532_s24 + $0x238] sm:$0xff] }
  0xda   : > { %v2835_v9 = vadd.f32 %v2834_v63, %v2580_v58  ;;  %v797_v58 = vsub.f32 %v285_v45, %v541_v46  ;;  %v1313_v63 = vadd.s32 512, %v3538_v1  ;;  %v1052_v4 = vand.u32 2147483647, %v796_v50 }
  0xdb   : > { %v1569_v10 = vadd.s32 %v3546_v7, %v1312_v55  ;;  %v2590_v14 = vsel %vm1822_vm12, %v1051_v59, 0.0  ;;  %vm1824_vm14 = vcmp.lt.s32.totalorder %v1568_v0, 2560  ;;  %v294_v55 = vld [vmem:[%s3525_s28 + $0x238] sm:$0xff]  ;;  %v551_v0 = vld [vmem:[%s3532_s24 + $0x240] sm:$0xff] }
  0xdc   : > { %v2836_v17 = vadd.f32 %v2835_v9, %v2581_v3  ;;  %v798_v3 = vsub.f32 %v286_v53, %v542_v54  ;;  %v1314_v9 = vadd.s32 520, %v3538_v1  ;;  %v1053_v13 = vand.u32 2147483647, %v797_v58 }
  0xdd   : > { %v1570_v18 = vadd.s32 %v3546_v7, %v1313_v63  ;;  %v2591_v22 = vsel %vm1823_vm13, %v1052_v4, 0.0  ;;  %vm1825_vm15 = vcmp.lt.s32.totalorder %v1569_v10, 2560  ;;  %v295_v63 = vld [vmem:[%s3525_s28 + $0x240] sm:$0xff]  ;;  %v552_v10 = vld [vmem:[%s3532_s24 + $0x248] sm:$0xff] }
  0xde   : > { %v2837_v25 = vadd.f32 %v2836_v17, %v2582_v12  ;;  %v799_v12 = vsub.f32 %v287_v61, %v543_v62  ;;  %v1315_v17 = vadd.s32 528, %v3538_v1  ;;  %v1054_v21 = vand.u32 2147483647, %v798_v3 }
  0xdf   : > { %v1571_v26 = vadd.s32 %v3546_v7, %v1314_v9  ;;  %v2592_v30 = vsel %vm1824_vm14, %v1053_v13, 0.0  ;;  %vm1826_vm0 = vcmp.lt.s32.totalorder %v1570_v18, 2560  ;;  %v296_v9 = vld [vmem:[%s3525_s28 + $0x248] sm:$0xff]  ;;  %v553_v18 = vld [vmem:[%s3532_s24 + $0x250] sm:$0xff] }
  0xe0   : > { %v2838_v33 = vadd.f32 %v2837_v25, %v2583_v20  ;;  %v800_v20 = vsub.f32 %v288_v6, %v544_v8  ;;  %v1316_v25 = vadd.s32 536, %v3538_v1  ;;  %v1055_v29 = vand.u32 2147483647, %v799_v12 }
  0xe1   : > { %v1572_v34 = vadd.s32 %v3546_v7, %v1315_v17  ;;  %v2593_v38 = vsel %vm1825_vm15, %v1054_v21, 0.0  ;;  %vm1827_vm1 = vcmp.lt.s32.totalorder %v1571_v26, 2560  ;;  %v297_v17 = vld [vmem:[%s3525_s28 + $0x250] sm:$0xff]  ;;  %v554_v26 = vld [vmem:[%s3532_s24 + $0x258] sm:$0xff] }
  0xe2   : > { %v2839_v41 = vadd.f32 %v2838_v33, %v2584_v28  ;;  %v801_v28 = vsub.f32 %v289_v15, %v545_v16  ;;  %v1317_v33 = vadd.s32 544, %v3538_v1  ;;  %v1056_v37 = vand.u32 2147483647, %v800_v20 }
  0xe3   : > { %v1573_v42 = vadd.s32 %v3546_v7, %v1316_v25  ;;  %v2594_v46 = vsel %vm1826_vm0, %v1055_v29, 0.0  ;;  %vm1828_vm2 = vcmp.lt.s32.totalorder %v1572_v34, 2560  ;;  %v298_v25 = vld [vmem:[%s3525_s28 + $0x258] sm:$0xff]  ;;  %v555_v34 = vld [vmem:[%s3532_s24 + $0x260] sm:$0xff] }
  0xe4   : > { %v2840_v49 = vadd.f32 %v2839_v41, %v2585_v36  ;;  %v802_v36 = vsub.f32 %v290_v23, %v546_v24  ;;  %v1318_v41 = vadd.s32 552, %v3538_v1  ;;  %v1057_v45 = vand.u32 2147483647, %v801_v28 }
  0xe5   : > { %v1574_v50 = vadd.s32 %v3546_v7, %v1317_v33  ;;  %v2595_v54 = vsel %vm1827_vm1, %v1056_v37, 0.0  ;;  %vm1829_vm3 = vcmp.lt.s32.totalorder %v1573_v42, 2560  ;;  %v299_v33 = vld [vmem:[%s3525_s28 + $0x260] sm:$0xff]  ;;  %v556_v42 = vld [vmem:[%s3532_s24 + $0x268] sm:$0xff] }
  0xe6   : > { %v2841_v57 = vadd.f32 %v2840_v49, %v2586_v44  ;;  %v803_v44 = vsub.f32 %v291_v31, %v547_v32  ;;  %v1319_v49 = vadd.s32 560, %v3538_v1  ;;  %v1058_v53 = vand.u32 2147483647, %v802_v36 }
  0xe7   : > { %v1575_v58 = vadd.s32 %v3546_v7, %v1318_v41  ;;  %v2596_v62 = vsel %vm1828_vm2, %v1057_v45, 0.0  ;;  %vm1830_vm4 = vcmp.lt.s32.totalorder %v1574_v50, 2560  ;;  %v300_v41 = vld [vmem:[%s3525_s28 + $0x268] sm:$0xff]  ;;  %v557_v50 = vld [vmem:[%s3532_s24 + $0x270] sm:$0xff] }
  0xe8   : > { %v2842_v2 = vadd.f32 %v2841_v57, %v2587_v52  ;;  %v804_v52 = vsub.f32 %v292_v39, %v548_v40  ;;  %v1320_v57 = vadd.s32 568, %v3538_v1  ;;  %v1059_v61 = vand.u32 2147483647, %v803_v44 }
  0xe9   : > { %v1576_v3 = vadd.s32 %v3546_v7, %v1319_v49  ;;  %v2597_v8 = vsel %vm1829_vm3, %v1058_v53, 0.0  ;;  %vm1831_vm5 = vcmp.lt.s32.totalorder %v1575_v58, 2560  ;;  %v301_v49 = vld [vmem:[%s3525_s28 + $0x270] sm:$0xff]  ;;  %v558_v58 = vld [vmem:[%s3532_s24 + $0x278] sm:$0xff] }
  0xea   : > { %v2843_v11 = vadd.f32 %v2842_v2, %v2588_v60  ;;  %v805_v60 = vsub.f32 %v293_v47, %v549_v48  ;;  %v1321_v2 = vadd.s32 576, %v3538_v1  ;;  %v1060_v6 = vand.u32 2147483647, %v804_v52 }
  0xeb   : > { %v1577_v12 = vadd.s32 %v3546_v7, %v1320_v57  ;;  %v2598_v16 = vsel %vm1830_vm4, %v1059_v61, 0.0  ;;  %vm1832_vm6 = vcmp.lt.s32.totalorder %v1576_v3, 2560  ;;  %v302_v57 = vld [vmem:[%s3525_s28 + $0x278] sm:$0xff]  ;;  %v559_v3 = vld [vmem:[%s3532_s24 + $0x280] sm:$0xff] }
  0xec   : > { %v2844_v19 = vadd.f32 %v2843_v11, %v2589_v5  ;;  %v806_v5 = vsub.f32 %v294_v55, %v550_v56  ;;  %v1322_v11 = vadd.s32 584, %v3538_v1  ;;  %v1061_v15 = vand.u32 2147483647, %v805_v60 }
  0xed   : > { %v1578_v20 = vadd.s32 %v3546_v7, %v1321_v2  ;;  %v2599_v24 = vsel %vm1831_vm5, %v1060_v6, 0.0  ;;  %vm1833_vm7 = vcmp.lt.s32.totalorder %v1577_v12, 2560  ;;  %v303_v2 = vld [vmem:[%s3525_s28 + $0x280] sm:$0xff]  ;;  %v560_v12 = vld [vmem:[%s3532_s24 + $0x288] sm:$0xff] }
  0xee   : > { %v2845_v27 = vadd.f32 %v2844_v19, %v2590_v14  ;;  %v807_v14 = vsub.f32 %v295_v63, %v551_v0  ;;  %v1323_v19 = vadd.s32 592, %v3538_v1  ;;  %v1062_v23 = vand.u32 2147483647, %v806_v5 }
  0xef   : > { %v1579_v28 = vadd.s32 %v3546_v7, %v1322_v11  ;;  %v2600_v32 = vsel %vm1832_vm6, %v1061_v15, 0.0  ;;  %vm1834_vm8 = vcmp.lt.s32.totalorder %v1578_v20, 2560  ;;  %v304_v11 = vld [vmem:[%s3525_s28 + $0x288] sm:$0xff]  ;;  %v561_v20 = vld [vmem:[%s3532_s24 + $0x290] sm:$0xff] }
  0xf0   : > { %v2846_v35 = vadd.f32 %v2845_v27, %v2591_v22  ;;  %v808_v22 = vsub.f32 %v296_v9, %v552_v10  ;;  %v1324_v27 = vadd.s32 600, %v3538_v1  ;;  %v1063_v31 = vand.u32 2147483647, %v807_v14 }
  0xf1   : > { %v1580_v36 = vadd.s32 %v3546_v7, %v1323_v19  ;;  %v2601_v40 = vsel %vm1833_vm7, %v1062_v23, 0.0  ;;  %vm1835_vm9 = vcmp.lt.s32.totalorder %v1579_v28, 2560  ;;  %v305_v19 = vld [vmem:[%s3525_s28 + $0x290] sm:$0xff]  ;;  %v562_v28 = vld [vmem:[%s3532_s24 + $0x298] sm:$0xff] }
  0xf2   : > { %v2847_v43 = vadd.f32 %v2846_v35, %v2592_v30  ;;  %v809_v30 = vsub.f32 %v297_v17, %v553_v18  ;;  %v1325_v35 = vadd.s32 608, %v3538_v1  ;;  %v1064_v39 = vand.u32 2147483647, %v808_v22 }
  0xf3   : > { %v1581_v44 = vadd.s32 %v3546_v7, %v1324_v27  ;;  %v2602_v48 = vsel %vm1834_vm8, %v1063_v31, 0.0  ;;  %vm1836_vm10 = vcmp.lt.s32.totalorder %v1580_v36, 2560  ;;  %v306_v27 = vld [vmem:[%s3525_s28 + $0x298] sm:$0xff]  ;;  %v563_v36 = vld [vmem:[%s3532_s24 + $0x2a0] sm:$0xff] }
  0xf4   : > { %v2848_v51 = vadd.f32 %v2847_v43, %v2593_v38  ;;  %v810_v38 = vsub.f32 %v298_v25, %v554_v26  ;;  %v1326_v43 = vadd.s32 616, %v3538_v1  ;;  %v1065_v47 = vand.u32 2147483647, %v809_v30 }
  0xf5   : > { %v1582_v52 = vadd.s32 %v3546_v7, %v1325_v35  ;;  %v2603_v56 = vsel %vm1835_vm9, %v1064_v39, 0.0  ;;  %vm1837_vm11 = vcmp.lt.s32.totalorder %v1581_v44, 2560  ;;  %v307_v35 = vld [vmem:[%s3525_s28 + $0x2a0] sm:$0xff]  ;;  %v564_v44 = vld [vmem:[%s3532_s24 + $0x2a8] sm:$0xff] }
  0xf6   : > { %v2849_v59 = vadd.f32 %v2848_v51, %v2594_v46  ;;  %v811_v46 = vsub.f32 %v299_v33, %v555_v34  ;;  %v1327_v51 = vadd.s32 624, %v3538_v1  ;;  %v1066_v55 = vand.u32 2147483647, %v810_v38 }
  0xf7   : > { %v1583_v60 = vadd.s32 %v3546_v7, %v1326_v43  ;;  %v2604_v0 = vsel %vm1836_vm10, %v1065_v47, 0.0  ;;  %vm1838_vm12 = vcmp.lt.s32.totalorder %v1582_v52, 2560  ;;  %v308_v43 = vld [vmem:[%s3525_s28 + $0x2a8] sm:$0xff]  ;;  %v565_v52 = vld [vmem:[%s3532_s24 + $0x2b0] sm:$0xff] }
  0xf8   : > { %v2850_v4 = vadd.f32 %v2849_v59, %v2595_v54  ;;  %v812_v54 = vsub.f32 %v300_v41, %v556_v42  ;;  %v1328_v59 = vadd.s32 632, %v3538_v1  ;;  %v1067_v63 = vand.u32 2147483647, %v811_v46 }
  0xf9   : > { %v1584_v5 = vadd.s32 %v3546_v7, %v1327_v51  ;;  %v2605_v10 = vsel %vm1837_vm11, %v1066_v55, 0.0  ;;  %vm1839_vm13 = vcmp.lt.s32.totalorder %v1583_v60, 2560  ;;  %v309_v51 = vld [vmem:[%s3525_s28 + $0x2b0] sm:$0xff]  ;;  %v566_v60 = vld [vmem:[%s3532_s24 + $0x2b8] sm:$0xff] }
  0xfa   : > { %v2851_v13 = vadd.f32 %v2850_v4, %v2596_v62  ;;  %v813_v62 = vsub.f32 %v301_v49, %v557_v50  ;;  %v1329_v4 = vadd.s32 640, %v3538_v1  ;;  %v1068_v9 = vand.u32 2147483647, %v812_v54 }
  0xfb   : > { %v1585_v14 = vadd.s32 %v3546_v7, %v1328_v59  ;;  %v2606_v18 = vsel %vm1838_vm12, %v1067_v63, 0.0  ;;  %vm1840_vm14 = vcmp.lt.s32.totalorder %v1584_v5, 2560  ;;  %v310_v59 = vld [vmem:[%s3525_s28 + $0x2b8] sm:$0xff]  ;;  %v567_v5 = vld [vmem:[%s3532_s24 + $0x2c0] sm:$0xff] }
  0xfc   : > { %v2852_v21 = vadd.f32 %v2851_v13, %v2597_v8  ;;  %v814_v8 = vsub.f32 %v302_v57, %v558_v58  ;;  %v1330_v13 = vadd.s32 648, %v3538_v1  ;;  %v1069_v17 = vand.u32 2147483647, %v813_v62 }
  0xfd   : > { %v1586_v22 = vadd.s32 %v3546_v7, %v1329_v4  ;;  %v2607_v26 = vsel %vm1839_vm13, %v1068_v9, 0.0  ;;  %vm1841_vm15 = vcmp.lt.s32.totalorder %v1585_v14, 2560  ;;  %v311_v4 = vld [vmem:[%s3525_s28 + $0x2c0] sm:$0xff]  ;;  %v568_v14 = vld [vmem:[%s3532_s24 + $0x2c8] sm:$0xff] }
  0xfe   : > { %v2853_v29 = vadd.f32 %v2852_v21, %v2598_v16  ;;  %v815_v16 = vsub.f32 %v303_v2, %v559_v3  ;;  %v1331_v21 = vadd.s32 656, %v3538_v1  ;;  %v1070_v25 = vand.u32 2147483647, %v814_v8 }
  0xff   : > { %v1587_v30 = vadd.s32 %v3546_v7, %v1330_v13  ;;  %v2608_v34 = vsel %vm1840_vm14, %v1069_v17, 0.0  ;;  %vm1842_vm0 = vcmp.lt.s32.totalorder %v1586_v22, 2560  ;;  %v312_v13 = vld [vmem:[%s3525_s28 + $0x2c8] sm:$0xff]  ;;  %v569_v22 = vld [vmem:[%s3532_s24 + $0x2d0] sm:$0xff] }
 0x100   : > { %v2854_v37 = vadd.f32 %v2853_v29, %v2599_v24  ;;  %v816_v24 = vsub.f32 %v304_v11, %v560_v12  ;;  %v1332_v29 = vadd.s32 664, %v3538_v1  ;;  %v1071_v33 = vand.u32 2147483647, %v815_v16 }
 0x101   : > { %v1588_v38 = vadd.s32 %v3546_v7, %v1331_v21  ;;  %v2609_v42 = vsel %vm1841_vm15, %v1070_v25, 0.0  ;;  %vm1843_vm1 = vcmp.lt.s32.totalorder %v1587_v30, 2560  ;;  %v313_v21 = vld [vmem:[%s3525_s28 + $0x2d0] sm:$0xff]  ;;  %v570_v30 = vld [vmem:[%s3532_s24 + $0x2d8] sm:$0xff] }
 0x102   : > { %v2855_v45 = vadd.f32 %v2854_v37, %v2600_v32  ;;  %v817_v32 = vsub.f32 %v305_v19, %v561_v20  ;;  %v1333_v37 = vadd.s32 672, %v3538_v1  ;;  %v1072_v41 = vand.u32 2147483647, %v816_v24 }
 0x103   : > { %v1589_v46 = vadd.s32 %v3546_v7, %v1332_v29  ;;  %v2610_v50 = vsel %vm1842_vm0, %v1071_v33, 0.0  ;;  %vm1844_vm2 = vcmp.lt.s32.totalorder %v1588_v38, 2560  ;;  %v314_v29 = vld [vmem:[%s3525_s28 + $0x2d8] sm:$0xff]  ;;  %v571_v38 = vld [vmem:[%s3532_s24 + $0x2e0] sm:$0xff] }
 0x104   : > { %v2856_v53 = vadd.f32 %v2855_v45, %v2601_v40  ;;  %v818_v40 = vsub.f32 %v306_v27, %v562_v28  ;;  %v1334_v45 = vadd.s32 680, %v3538_v1  ;;  %v1073_v49 = vand.u32 2147483647, %v817_v32 }
 0x105   : > { %v1590_v54 = vadd.s32 %v3546_v7, %v1333_v37  ;;  %v2611_v58 = vsel %vm1843_vm1, %v1072_v41, 0.0  ;;  %vm1845_vm3 = vcmp.lt.s32.totalorder %v1589_v46, 2560  ;;  %v315_v37 = vld [vmem:[%s3525_s28 + $0x2e0] sm:$0xff]  ;;  %v572_v46 = vld [vmem:[%s3532_s24 + $0x2e8] sm:$0xff] }
 0x106   : > { %v2857_v61 = vadd.f32 %v2856_v53, %v2602_v48  ;;  %v819_v48 = vsub.f32 %v307_v35, %v563_v36  ;;  %v1335_v53 = vadd.s32 688, %v3538_v1  ;;  %v1074_v57 = vand.u32 2147483647, %v818_v40 }
 0x107   : > { %v1591_v62 = vadd.s32 %v3546_v7, %v1334_v45  ;;  %v2612_v3 = vsel %vm1844_vm2, %v1073_v49, 0.0  ;;  %vm1846_vm4 = vcmp.lt.s32.totalorder %v1590_v54, 2560  ;;  %v316_v45 = vld [vmem:[%s3525_s28 + $0x2e8] sm:$0xff]  ;;  %v573_v54 = vld [vmem:[%s3532_s24 + $0x2f0] sm:$0xff] }
 0x108   : > { %v2858_v6 = vadd.f32 %v2857_v61, %v2603_v56  ;;  %v820_v56 = vsub.f32 %v308_v43, %v564_v44  ;;  %v1336_v61 = vadd.s32 696, %v3538_v1  ;;  %v1075_v2 = vand.u32 2147483647, %v819_v48 }
 0x109   : > { %v1592_v8 = vadd.s32 %v3546_v7, %v1335_v53  ;;  %v2613_v12 = vsel %vm1845_vm3, %v1074_v57, 0.0  ;;  %vm1847_vm5 = vcmp.lt.s32.totalorder %v1591_v62, 2560  ;;  %v317_v53 = vld [vmem:[%s3525_s28 + $0x2f0] sm:$0xff]  ;;  %v574_v62 = vld [vmem:[%s3532_s24 + $0x2f8] sm:$0xff] }
 0x10a   : > { %v2859_v15 = vadd.f32 %v2858_v6, %v2604_v0  ;;  %v821_v0 = vsub.f32 %v309_v51, %v565_v52  ;;  %v1337_v6 = vadd.s32 704, %v3538_v1  ;;  %v1076_v11 = vand.u32 2147483647, %v820_v56 }
 0x10b   : > { %v1593_v16 = vadd.s32 %v3546_v7, %v1336_v61  ;;  %v2614_v20 = vsel %vm1846_vm4, %v1075_v2, 0.0  ;;  %vm1848_vm6 = vcmp.lt.s32.totalorder %v1592_v8, 2560  ;;  %v318_v61 = vld [vmem:[%s3525_s28 + $0x2f8] sm:$0xff]  ;;  %v575_v8 = vld [vmem:[%s3532_s24 + $0x300] sm:$0xff] }
 0x10c   : > { %v2860_v23 = vadd.f32 %v2859_v15, %v2605_v10  ;;  %v822_v10 = vsub.f32 %v310_v59, %v566_v60  ;;  %v1338_v15 = vadd.s32 712, %v3538_v1  ;;  %v1077_v19 = vand.u32 2147483647, %v821_v0 }
 0x10d   : > { %v1594_v24 = vadd.s32 %v3546_v7, %v1337_v6  ;;  %v2615_v28 = vsel %vm1847_vm5, %v1076_v11, 0.0  ;;  %vm1849_vm7 = vcmp.lt.s32.totalorder %v1593_v16, 2560  ;;  %v319_v6 = vld [vmem:[%s3525_s28 + $0x300] sm:$0xff]  ;;  %v576_v16 = vld [vmem:[%s3532_s24 + $0x308] sm:$0xff] }
 0x10e   : > { %v2861_v31 = vadd.f32 %v2860_v23, %v2606_v18  ;;  %v823_v18 = vsub.f32 %v311_v4, %v567_v5  ;;  %v1339_v23 = vadd.s32 720, %v3538_v1  ;;  %v1078_v27 = vand.u32 2147483647, %v822_v10 }
 0x10f   : > { %v1595_v32 = vadd.s32 %v3546_v7, %v1338_v15  ;;  %v2616_v36 = vsel %vm1848_vm6, %v1077_v19, 0.0  ;;  %vm1850_vm8 = vcmp.lt.s32.totalorder %v1594_v24, 2560  ;;  %v320_v15 = vld [vmem:[%s3525_s28 + $0x308] sm:$0xff]  ;;  %v577_v24 = vld [vmem:[%s3532_s24 + $0x310] sm:$0xff] }
 0x110   : > { %v2862_v39 = vadd.f32 %v2861_v31, %v2607_v26  ;;  %v824_v26 = vsub.f32 %v312_v13, %v568_v14  ;;  %v1340_v31 = vadd.s32 728, %v3538_v1  ;;  %v1079_v35 = vand.u32 2147483647, %v823_v18 }
 0x111   : > { %v1596_v40 = vadd.s32 %v3546_v7, %v1339_v23  ;;  %v2617_v44 = vsel %vm1849_vm7, %v1078_v27, 0.0  ;;  %vm1851_vm9 = vcmp.lt.s32.totalorder %v1595_v32, 2560  ;;  %v321_v23 = vld [vmem:[%s3525_s28 + $0x310] sm:$0xff]  ;;  %v578_v32 = vld [vmem:[%s3532_s24 + $0x318] sm:$0xff] }
 0x112   : > { %v2863_v47 = vadd.f32 %v2862_v39, %v2608_v34  ;;  %v825_v34 = vsub.f32 %v313_v21, %v569_v22  ;;  %v1341_v39 = vadd.s32 736, %v3538_v1  ;;  %v1080_v43 = vand.u32 2147483647, %v824_v26 }
 0x113   : > { %v1597_v48 = vadd.s32 %v3546_v7, %v1340_v31  ;;  %v2618_v52 = vsel %vm1850_vm8, %v1079_v35, 0.0  ;;  %vm1852_vm10 = vcmp.lt.s32.totalorder %v1596_v40, 2560  ;;  %v322_v31 = vld [vmem:[%s3525_s28 + $0x318] sm:$0xff]  ;;  %v579_v40 = vld [vmem:[%s3532_s24 + $0x320] sm:$0xff] }
 0x114   : > { %v2864_v55 = vadd.f32 %v2863_v47, %v2609_v42  ;;  %v826_v42 = vsub.f32 %v314_v29, %v570_v30  ;;  %v1342_v47 = vadd.s32 744, %v3538_v1  ;;  %v1081_v51 = vand.u32 2147483647, %v825_v34 }
 0x115   : > { %v1598_v56 = vadd.s32 %v3546_v7, %v1341_v39  ;;  %v2619_v60 = vsel %vm1851_vm9, %v1080_v43, 0.0  ;;  %vm1853_vm11 = vcmp.lt.s32.totalorder %v1597_v48, 2560  ;;  %v323_v39 = vld [vmem:[%s3525_s28 + $0x320] sm:$0xff]  ;;  %v580_v48 = vld [vmem:[%s3532_s24 + $0x328] sm:$0xff] }
 0x116   : > { %v2865_v63 = vadd.f32 %v2864_v55, %v2610_v50  ;;  %v827_v50 = vsub.f32 %v315_v37, %v571_v38  ;;  %v1343_v55 = vadd.s32 752, %v3538_v1  ;;  %v1082_v59 = vand.u32 2147483647, %v826_v42 }
 0x117   : > { %v1599_v0 = vadd.s32 %v3546_v7, %v1342_v47  ;;  %v2620_v5 = vsel %vm1852_vm10, %v1081_v51, 0.0  ;;  %vm1854_vm12 = vcmp.lt.s32.totalorder %v1598_v56, 2560  ;;  %v324_v47 = vld [vmem:[%s3525_s28 + $0x328] sm:$0xff]  ;;  %v581_v56 = vld [vmem:[%s3532_s24 + $0x330] sm:$0xff] }
 0x118   : > { %v2866_v9 = vadd.f32 %v2865_v63, %v2611_v58  ;;  %v828_v58 = vsub.f32 %v316_v45, %v572_v46  ;;  %v1344_v63 = vadd.s32 760, %v3538_v1  ;;  %v1083_v4 = vand.u32 2147483647, %v827_v50 }
 0x119   : > { %v1600_v10 = vadd.s32 %v3546_v7, %v1343_v55  ;;  %v2621_v14 = vsel %vm1853_vm11, %v1082_v59, 0.0  ;;  %vm1855_vm13 = vcmp.lt.s32.totalorder %v1599_v0, 2560  ;;  %v325_v55 = vld [vmem:[%s3525_s28 + $0x330] sm:$0xff]  ;;  %v582_v0 = vld [vmem:[%s3532_s24 + $0x338] sm:$0xff] }
 0x11a   : > { %v2867_v17 = vadd.f32 %v2866_v9, %v2612_v3  ;;  %v829_v3 = vsub.f32 %v317_v53, %v573_v54  ;;  %v1345_v9 = vadd.s32 768, %v3538_v1  ;;  %v1084_v13 = vand.u32 2147483647, %v828_v58 }
 0x11b   : > { %v1601_v18 = vadd.s32 %v3546_v7, %v1344_v63  ;;  %v2622_v22 = vsel %vm1854_vm12, %v1083_v4, 0.0  ;;  %vm1856_vm14 = vcmp.lt.s32.totalorder %v1600_v10, 2560  ;;  %v326_v63 = vld [vmem:[%s3525_s28 + $0x338] sm:$0xff]  ;;  %v583_v10 = vld [vmem:[%s3532_s24 + $0x340] sm:$0xff] }
 0x11c   : > { %v2868_v25 = vadd.f32 %v2867_v17, %v2613_v12  ;;  %v830_v12 = vsub.f32 %v318_v61, %v574_v62  ;;  %v1346_v17 = vadd.s32 776, %v3538_v1  ;;  %v1085_v21 = vand.u32 2147483647, %v829_v3 }
 0x11d   : > { %v1602_v26 = vadd.s32 %v3546_v7, %v1345_v9  ;;  %v2623_v30 = vsel %vm1855_vm13, %v1084_v13, 0.0  ;;  %vm1857_vm15 = vcmp.lt.s32.totalorder %v1601_v18, 2560  ;;  %v327_v9 = vld [vmem:[%s3525_s28 + $0x340] sm:$0xff]  ;;  %v584_v18 = vld [vmem:[%s3532_s24 + $0x348] sm:$0xff] }
 0x11e   : > { %v2869_v33 = vadd.f32 %v2868_v25, %v2614_v20  ;;  %v831_v20 = vsub.f32 %v319_v6, %v575_v8  ;;  %v1347_v25 = vadd.s32 784, %v3538_v1  ;;  %v1086_v29 = vand.u32 2147483647, %v830_v12 }
 0x11f   : > { %v1603_v34 = vadd.s32 %v3546_v7, %v1346_v17  ;;  %v2624_v38 = vsel %vm1856_vm14, %v1085_v21, 0.0  ;;  %vm1858_vm0 = vcmp.lt.s32.totalorder %v1602_v26, 2560  ;;  %v328_v17 = vld [vmem:[%s3525_s28 + $0x348] sm:$0xff]  ;;  %v585_v26 = vld [vmem:[%s3532_s24 + $0x350] sm:$0xff] }
 0x120   : > { %v2870_v41 = vadd.f32 %v2869_v33, %v2615_v28  ;;  %v832_v28 = vsub.f32 %v320_v15, %v576_v16  ;;  %v1348_v33 = vadd.s32 792, %v3538_v1  ;;  %v1087_v37 = vand.u32 2147483647, %v831_v20 }
 0x121   : > { %v1604_v42 = vadd.s32 %v3546_v7, %v1347_v25  ;;  %v2625_v46 = vsel %vm1857_vm15, %v1086_v29, 0.0  ;;  %vm1859_vm1 = vcmp.lt.s32.totalorder %v1603_v34, 2560  ;;  %v329_v25 = vld [vmem:[%s3525_s28 + $0x350] sm:$0xff]  ;;  %v586_v34 = vld [vmem:[%s3532_s24 + $0x358] sm:$0xff] }
 0x122   : > { %v2871_v49 = vadd.f32 %v2870_v41, %v2616_v36  ;;  %v833_v36 = vsub.f32 %v321_v23, %v577_v24  ;;  %v1349_v41 = vadd.s32 800, %v3538_v1  ;;  %v1088_v45 = vand.u32 2147483647, %v832_v28 }
 0x123   : > { %v1605_v50 = vadd.s32 %v3546_v7, %v1348_v33  ;;  %v2626_v54 = vsel %vm1858_vm0, %v1087_v37, 0.0  ;;  %vm1860_vm2 = vcmp.lt.s32.totalorder %v1604_v42, 2560  ;;  %v330_v33 = vld [vmem:[%s3525_s28 + $0x358] sm:$0xff]  ;;  %v587_v42 = vld [vmem:[%s3532_s24 + $0x360] sm:$0xff] }
 0x124   : > { %v2872_v57 = vadd.f32 %v2871_v49, %v2617_v44  ;;  %v834_v44 = vsub.f32 %v322_v31, %v578_v32  ;;  %v1350_v49 = vadd.s32 808, %v3538_v1  ;;  %v1089_v53 = vand.u32 2147483647, %v833_v36 }
 0x125   : > { %v1606_v58 = vadd.s32 %v3546_v7, %v1349_v41  ;;  %v2627_v62 = vsel %vm1859_vm1, %v1088_v45, 0.0  ;;  %vm1861_vm3 = vcmp.lt.s32.totalorder %v1605_v50, 2560  ;;  %v331_v41 = vld [vmem:[%s3525_s28 + $0x360] sm:$0xff]  ;;  %v588_v50 = vld [vmem:[%s3532_s24 + $0x368] sm:$0xff] }
 0x126   : > { %v2873_v2 = vadd.f32 %v2872_v57, %v2618_v52  ;;  %v835_v52 = vsub.f32 %v323_v39, %v579_v40  ;;  %v1351_v57 = vadd.s32 816, %v3538_v1  ;;  %v1090_v61 = vand.u32 2147483647, %v834_v44 }
 0x127   : > { %v1607_v3 = vadd.s32 %v3546_v7, %v1350_v49  ;;  %v2628_v8 = vsel %vm1860_vm2, %v1089_v53, 0.0  ;;  %vm1862_vm4 = vcmp.lt.s32.totalorder %v1606_v58, 2560  ;;  %v332_v49 = vld [vmem:[%s3525_s28 + $0x368] sm:$0xff]  ;;  %v589_v58 = vld [vmem:[%s3532_s24 + $0x370] sm:$0xff] }
 0x128   : > { %v2874_v11 = vadd.f32 %v2873_v2, %v2619_v60  ;;  %v836_v60 = vsub.f32 %v324_v47, %v580_v48  ;;  %v1352_v2 = vadd.s32 824, %v3538_v1  ;;  %v1091_v6 = vand.u32 2147483647, %v835_v52 }
 0x129   : > { %v1608_v12 = vadd.s32 %v3546_v7, %v1351_v57  ;;  %v2629_v16 = vsel %vm1861_vm3, %v1090_v61, 0.0  ;;  %vm1863_vm5 = vcmp.lt.s32.totalorder %v1607_v3, 2560  ;;  %v333_v57 = vld [vmem:[%s3525_s28 + $0x370] sm:$0xff]  ;;  %v590_v3 = vld [vmem:[%s3532_s24 + $0x378] sm:$0xff] }
 0x12a   : > { %v2875_v19 = vadd.f32 %v2874_v11, %v2620_v5  ;;  %v837_v5 = vsub.f32 %v325_v55, %v581_v56  ;;  %v1353_v11 = vadd.s32 832, %v3538_v1  ;;  %v1092_v15 = vand.u32 2147483647, %v836_v60 }
 0x12b   : > { %v1609_v20 = vadd.s32 %v3546_v7, %v1352_v2  ;;  %v2630_v24 = vsel %vm1862_vm4, %v1091_v6, 0.0  ;;  %vm1864_vm6 = vcmp.lt.s32.totalorder %v1608_v12, 2560  ;;  %v334_v2 = vld [vmem:[%s3525_s28 + $0x378] sm:$0xff]  ;;  %v591_v12 = vld [vmem:[%s3532_s24 + $0x380] sm:$0xff] }
 0x12c   : > { %v2876_v27 = vadd.f32 %v2875_v19, %v2621_v14  ;;  %v838_v14 = vsub.f32 %v326_v63, %v582_v0  ;;  %v1354_v19 = vadd.s32 840, %v3538_v1  ;;  %v1093_v23 = vand.u32 2147483647, %v837_v5 }
 0x12d   : > { %v1610_v28 = vadd.s32 %v3546_v7, %v1353_v11  ;;  %v2631_v32 = vsel %vm1863_vm5, %v1092_v15, 0.0  ;;  %vm1865_vm7 = vcmp.lt.s32.totalorder %v1609_v20, 2560  ;;  %v335_v11 = vld [vmem:[%s3525_s28 + $0x380] sm:$0xff]  ;;  %v592_v20 = vld [vmem:[%s3532_s24 + $0x388] sm:$0xff] }
 0x12e   : > { %v2877_v35 = vadd.f32 %v2876_v27, %v2622_v22  ;;  %v839_v22 = vsub.f32 %v327_v9, %v583_v10  ;;  %v1355_v27 = vadd.s32 848, %v3538_v1  ;;  %v1094_v31 = vand.u32 2147483647, %v838_v14 }
 0x12f   : > { %v1611_v36 = vadd.s32 %v3546_v7, %v1354_v19  ;;  %v2632_v40 = vsel %vm1864_vm6, %v1093_v23, 0.0  ;;  %vm1866_vm8 = vcmp.lt.s32.totalorder %v1610_v28, 2560  ;;  %v336_v19 = vld [vmem:[%s3525_s28 + $0x388] sm:$0xff]  ;;  %v593_v28 = vld [vmem:[%s3532_s24 + $0x390] sm:$0xff] }
 0x130   : > { %v2878_v43 = vadd.f32 %v2877_v35, %v2623_v30  ;;  %v840_v30 = vsub.f32 %v328_v17, %v584_v18  ;;  %v1356_v35 = vadd.s32 856, %v3538_v1  ;;  %v1095_v39 = vand.u32 2147483647, %v839_v22 }
 0x131   : > { %v1612_v44 = vadd.s32 %v3546_v7, %v1355_v27  ;;  %v2633_v48 = vsel %vm1865_vm7, %v1094_v31, 0.0  ;;  %vm1867_vm9 = vcmp.lt.s32.totalorder %v1611_v36, 2560  ;;  %v337_v27 = vld [vmem:[%s3525_s28 + $0x390] sm:$0xff]  ;;  %v594_v36 = vld [vmem:[%s3532_s24 + $0x398] sm:$0xff] }
 0x132   : > { %v2879_v51 = vadd.f32 %v2878_v43, %v2624_v38  ;;  %v841_v38 = vsub.f32 %v329_v25, %v585_v26  ;;  %v1357_v43 = vadd.s32 864, %v3538_v1  ;;  %v1096_v47 = vand.u32 2147483647, %v840_v30 }
 0x133   : > { %v1613_v52 = vadd.s32 %v3546_v7, %v1356_v35  ;;  %v2634_v56 = vsel %vm1866_vm8, %v1095_v39, 0.0  ;;  %vm1868_vm10 = vcmp.lt.s32.totalorder %v1612_v44, 2560  ;;  %v338_v35 = vld [vmem:[%s3525_s28 + $0x398] sm:$0xff]  ;;  %v595_v44 = vld [vmem:[%s3532_s24 + $0x3a0] sm:$0xff] }
 0x134   : > { %v2880_v59 = vadd.f32 %v2879_v51, %v2625_v46  ;;  %v842_v46 = vsub.f32 %v330_v33, %v586_v34  ;;  %v1358_v51 = vadd.s32 872, %v3538_v1  ;;  %v1097_v55 = vand.u32 2147483647, %v841_v38 }
 0x135   : > { %v1614_v60 = vadd.s32 %v3546_v7, %v1357_v43  ;;  %v2635_v0 = vsel %vm1867_vm9, %v1096_v47, 0.0  ;;  %vm1869_vm11 = vcmp.lt.s32.totalorder %v1613_v52, 2560  ;;  %v339_v43 = vld [vmem:[%s3525_s28 + $0x3a0] sm:$0xff]  ;;  %v596_v52 = vld [vmem:[%s3532_s24 + $0x3a8] sm:$0xff] }
 0x136   : > { %v2881_v4 = vadd.f32 %v2880_v59, %v2626_v54  ;;  %v843_v54 = vsub.f32 %v331_v41, %v587_v42  ;;  %v1359_v59 = vadd.s32 880, %v3538_v1  ;;  %v1098_v63 = vand.u32 2147483647, %v842_v46 }
 0x137   : > { %v1615_v5 = vadd.s32 %v3546_v7, %v1358_v51  ;;  %v2636_v10 = vsel %vm1868_vm10, %v1097_v55, 0.0  ;;  %vm1870_vm12 = vcmp.lt.s32.totalorder %v1614_v60, 2560  ;;  %v340_v51 = vld [vmem:[%s3525_s28 + $0x3a8] sm:$0xff]  ;;  %v597_v60 = vld [vmem:[%s3532_s24 + $0x3b0] sm:$0xff] }
 0x138   : > { %v2882_v13 = vadd.f32 %v2881_v4, %v2627_v62  ;;  %v844_v62 = vsub.f32 %v332_v49, %v588_v50  ;;  %v1360_v4 = vadd.s32 888, %v3538_v1  ;;  %v1099_v9 = vand.u32 2147483647, %v843_v54 }
 0x139   : > { %v1616_v14 = vadd.s32 %v3546_v7, %v1359_v59  ;;  %v2637_v18 = vsel %vm1869_vm11, %v1098_v63, 0.0  ;;  %vm1871_vm13 = vcmp.lt.s32.totalorder %v1615_v5, 2560  ;;  %v341_v59 = vld [vmem:[%s3525_s28 + $0x3b0] sm:$0xff]  ;;  %v598_v5 = vld [vmem:[%s3532_s24 + $0x3b8] sm:$0xff] }
 0x13a   : > { %v2883_v21 = vadd.f32 %v2882_v13, %v2628_v8  ;;  %v845_v8 = vsub.f32 %v333_v57, %v589_v58  ;;  %v1361_v13 = vadd.s32 896, %v3538_v1  ;;  %v1100_v17 = vand.u32 2147483647, %v844_v62 }
 0x13b   : > { %v1617_v22 = vadd.s32 %v3546_v7, %v1360_v4  ;;  %v2638_v26 = vsel %vm1870_vm12, %v1099_v9, 0.0  ;;  %vm1872_vm14 = vcmp.lt.s32.totalorder %v1616_v14, 2560  ;;  %v342_v4 = vld [vmem:[%s3525_s28 + $0x3b8] sm:$0xff]  ;;  %v599_v14 = vld [vmem:[%s3532_s24 + $0x3c0] sm:$0xff] }
 0x13c   : > { %v2884_v29 = vadd.f32 %v2883_v21, %v2629_v16  ;;  %v846_v16 = vsub.f32 %v334_v2, %v590_v3  ;;  %v1362_v21 = vadd.s32 904, %v3538_v1  ;;  %v1101_v25 = vand.u32 2147483647, %v845_v8 }
 0x13d   : > { %v1618_v30 = vadd.s32 %v3546_v7, %v1361_v13  ;;  %v2639_v34 = vsel %vm1871_vm13, %v1100_v17, 0.0  ;;  %vm1873_vm15 = vcmp.lt.s32.totalorder %v1617_v22, 2560  ;;  %v343_v13 = vld [vmem:[%s3525_s28 + $0x3c0] sm:$0xff]  ;;  %v600_v22 = vld [vmem:[%s3532_s24 + $0x3c8] sm:$0xff] }
 0x13e   : > { %v2885_v37 = vadd.f32 %v2884_v29, %v2630_v24  ;;  %v847_v24 = vsub.f32 %v335_v11, %v591_v12  ;;  %v1363_v29 = vadd.s32 912, %v3538_v1  ;;  %v1102_v33 = vand.u32 2147483647, %v846_v16 }
 0x13f   : > { %v1619_v38 = vadd.s32 %v3546_v7, %v1362_v21  ;;  %v2640_v42 = vsel %vm1872_vm14, %v1101_v25, 0.0  ;;  %vm1874_vm0 = vcmp.lt.s32.totalorder %v1618_v30, 2560  ;;  %v344_v21 = vld [vmem:[%s3525_s28 + $0x3c8] sm:$0xff]  ;;  %v601_v30 = vld [vmem:[%s3532_s24 + $0x3d0] sm:$0xff] }
 0x140   : > { %v2886_v45 = vadd.f32 %v2885_v37, %v2631_v32  ;;  %v848_v32 = vsub.f32 %v336_v19, %v592_v20  ;;  %v1364_v37 = vadd.s32 920, %v3538_v1  ;;  %v1103_v41 = vand.u32 2147483647, %v847_v24 }
 0x141   : > { %v1620_v46 = vadd.s32 %v3546_v7, %v1363_v29  ;;  %v2641_v50 = vsel %vm1873_vm15, %v1102_v33, 0.0  ;;  %vm1875_vm1 = vcmp.lt.s32.totalorder %v1619_v38, 2560  ;;  %v345_v29 = vld [vmem:[%s3525_s28 + $0x3d0] sm:$0xff]  ;;  %v602_v38 = vld [vmem:[%s3532_s24 + $0x3d8] sm:$0xff] }
 0x142   : > { %v2887_v53 = vadd.f32 %v2886_v45, %v2632_v40  ;;  %v849_v40 = vsub.f32 %v337_v27, %v593_v28  ;;  %v1365_v45 = vadd.s32 928, %v3538_v1  ;;  %v1104_v49 = vand.u32 2147483647, %v848_v32 }
 0x143   : > { %v1621_v54 = vadd.s32 %v3546_v7, %v1364_v37  ;;  %v2642_v58 = vsel %vm1874_vm0, %v1103_v41, 0.0  ;;  %vm1876_vm2 = vcmp.lt.s32.totalorder %v1620_v46, 2560  ;;  %v346_v37 = vld [vmem:[%s3525_s28 + $0x3d8] sm:$0xff]  ;;  %v603_v46 = vld [vmem:[%s3532_s24 + $0x3e0] sm:$0xff] }
 0x144   : > { %v2888_v61 = vadd.f32 %v2887_v53, %v2633_v48  ;;  %v850_v48 = vsub.f32 %v338_v35, %v594_v36  ;;  %v1366_v53 = vadd.s32 936, %v3538_v1  ;;  %v1105_v57 = vand.u32 2147483647, %v849_v40 }
 0x145   : > { %v1622_v62 = vadd.s32 %v3546_v7, %v1365_v45  ;;  %v2643_v3 = vsel %vm1875_vm1, %v1104_v49, 0.0  ;;  %vm1877_vm3 = vcmp.lt.s32.totalorder %v1621_v54, 2560  ;;  %v347_v45 = vld [vmem:[%s3525_s28 + $0x3e0] sm:$0xff]  ;;  %v604_v54 = vld [vmem:[%s3532_s24 + $0x3e8] sm:$0xff] }
 0x146   : > { %v2889_v6 = vadd.f32 %v2888_v61, %v2634_v56  ;;  %v851_v56 = vsub.f32 %v339_v43, %v595_v44  ;;  %v1367_v61 = vadd.s32 944, %v3538_v1  ;;  %v1106_v2 = vand.u32 2147483647, %v850_v48 }
 0x147   : > { %v1623_v8 = vadd.s32 %v3546_v7, %v1366_v53  ;;  %v2644_v12 = vsel %vm1876_vm2, %v1105_v57, 0.0  ;;  %vm1878_vm4 = vcmp.lt.s32.totalorder %v1622_v62, 2560  ;;  %v348_v53 = vld [vmem:[%s3525_s28 + $0x3e8] sm:$0xff]  ;;  %v605_v62 = vld [vmem:[%s3532_s24 + $0x3f0] sm:$0xff] }
 0x148   : > { %v2890_v15 = vadd.f32 %v2889_v6, %v2635_v0  ;;  %v852_v0 = vsub.f32 %v340_v51, %v596_v52  ;;  %v1368_v6 = vadd.s32 952, %v3538_v1  ;;  %v1107_v11 = vand.u32 2147483647, %v851_v56 }
 0x149   : > { %v1624_v16 = vadd.s32 %v3546_v7, %v1367_v61  ;;  %v2645_v20 = vsel %vm1877_vm3, %v1106_v2, 0.0  ;;  %vm1879_vm5 = vcmp.lt.s32.totalorder %v1623_v8, 2560  ;;  %v349_v61 = vld [vmem:[%s3525_s28 + $0x3f0] sm:$0xff]  ;;  %v606_v8 = vld [vmem:[%s3532_s24 + $0x3f8] sm:$0xff] }
 0x14a   : > { %v2891_v23 = vadd.f32 %v2890_v15, %v2636_v10  ;;  %v853_v10 = vsub.f32 %v341_v59, %v597_v60  ;;  %v1369_v15 = vadd.s32 960, %v3538_v1  ;;  %v1108_v19 = vand.u32 2147483647, %v852_v0 }
 0x14b   : > { %v1625_v24 = vadd.s32 %v3546_v7, %v1368_v6  ;;  %v2646_v28 = vsel %vm1878_vm4, %v1107_v11, 0.0  ;;  %vm1880_vm6 = vcmp.lt.s32.totalorder %v1624_v16, 2560  ;;  %v350_v6 = vld [vmem:[%s3525_s28 + $0x3f8] sm:$0xff]  ;;  %v607_v16 = vld [vmem:[%s3532_s24 + $0x400] sm:$0xff] }
 0x14c   : > { %v2892_v31 = vadd.f32 %v2891_v23, %v2637_v18  ;;  %v854_v18 = vsub.f32 %v342_v4, %v598_v5  ;;  %v1370_v23 = vadd.s32 968, %v3538_v1  ;;  %v1109_v27 = vand.u32 2147483647, %v853_v10 }
 0x14d   : > { %v1626_v32 = vadd.s32 %v3546_v7, %v1369_v15  ;;  %v2647_v36 = vsel %vm1879_vm5, %v1108_v19, 0.0  ;;  %vm1881_vm7 = vcmp.lt.s32.totalorder %v1625_v24, 2560  ;;  %v351_v15 = vld [vmem:[%s3525_s28 + $0x400] sm:$0xff]  ;;  %v608_v24 = vld [vmem:[%s3532_s24 + $0x408] sm:$0xff] }
 0x14e   : > { %v2893_v39 = vadd.f32 %v2892_v31, %v2638_v26  ;;  %v855_v26 = vsub.f32 %v343_v13, %v599_v14  ;;  %v1371_v31 = vadd.s32 976, %v3538_v1  ;;  %v1110_v35 = vand.u32 2147483647, %v854_v18 }
 0x14f   : > { %v1627_v40 = vadd.s32 %v3546_v7, %v1370_v23  ;;  %v2648_v44 = vsel %vm1880_vm6, %v1109_v27, 0.0  ;;  %vm1882_vm8 = vcmp.lt.s32.totalorder %v1626_v32, 2560  ;;  %v352_v23 = vld [vmem:[%s3525_s28 + $0x408] sm:$0xff]  ;;  %v609_v32 = vld [vmem:[%s3532_s24 + $0x410] sm:$0xff] }
 0x150   : > { %v2894_v47 = vadd.f32 %v2893_v39, %v2639_v34  ;;  %v856_v34 = vsub.f32 %v344_v21, %v600_v22  ;;  %v1372_v39 = vadd.s32 984, %v3538_v1  ;;  %v1111_v43 = vand.u32 2147483647, %v855_v26 }
 0x151   : > { %v1628_v48 = vadd.s32 %v3546_v7, %v1371_v31  ;;  %v2649_v52 = vsel %vm1881_vm7, %v1110_v35, 0.0  ;;  %vm1883_vm9 = vcmp.lt.s32.totalorder %v1627_v40, 2560  ;;  %v353_v31 = vld [vmem:[%s3525_s28 + $0x410] sm:$0xff]  ;;  %v610_v40 = vld [vmem:[%s3532_s24 + $0x418] sm:$0xff] }
 0x152   : > { %v2895_v55 = vadd.f32 %v2894_v47, %v2640_v42  ;;  %v857_v42 = vsub.f32 %v345_v29, %v601_v30  ;;  %v1373_v47 = vadd.s32 992, %v3538_v1  ;;  %v1112_v51 = vand.u32 2147483647, %v856_v34 }
 0x153   : > { %v1629_v56 = vadd.s32 %v3546_v7, %v1372_v39  ;;  %v2650_v60 = vsel %vm1882_vm8, %v1111_v43, 0.0  ;;  %vm1884_vm10 = vcmp.lt.s32.totalorder %v1628_v48, 2560  ;;  %v354_v39 = vld [vmem:[%s3525_s28 + $0x418] sm:$0xff]  ;;  %v611_v48 = vld [vmem:[%s3532_s24 + $0x420] sm:$0xff] }
 0x154   : > { %v2896_v63 = vadd.f32 %v2895_v55, %v2641_v50  ;;  %v858_v50 = vsub.f32 %v346_v37, %v602_v38  ;;  %v1374_v55 = vadd.s32 1000, %v3538_v1  ;;  %v1113_v59 = vand.u32 2147483647, %v857_v42 }
 0x155   : > { %v1630_v0 = vadd.s32 %v3546_v7, %v1373_v47  ;;  %v2651_v5 = vsel %vm1883_vm9, %v1112_v51, 0.0  ;;  %vm1885_vm11 = vcmp.lt.s32.totalorder %v1629_v56, 2560  ;;  %v355_v47 = vld [vmem:[%s3525_s28 + $0x420] sm:$0xff]  ;;  %v612_v56 = vld [vmem:[%s3532_s24 + $0x428] sm:$0xff] }
 0x156   : > { %v2897_v9 = vadd.f32 %v2896_v63, %v2642_v58  ;;  %v859_v58 = vsub.f32 %v347_v45, %v603_v46  ;;  %v1375_v63 = vadd.s32 1008, %v3538_v1  ;;  %v1114_v4 = vand.u32 2147483647, %v858_v50 }
 0x157   : > { %v1631_v10 = vadd.s32 %v3546_v7, %v1374_v55  ;;  %v2652_v14 = vsel %vm1884_vm10, %v1113_v59, 0.0  ;;  %vm1886_vm12 = vcmp.lt.s32.totalorder %v1630_v0, 2560  ;;  %v356_v55 = vld [vmem:[%s3525_s28 + $0x428] sm:$0xff]  ;;  %v613_v0 = vld [vmem:[%s3532_s24 + $0x430] sm:$0xff] }
 0x158   : > { %v2898_v17 = vadd.f32 %v2897_v9, %v2643_v3  ;;  %v860_v3 = vsub.f32 %v348_v53, %v604_v54  ;;  %v1376_v9 = vadd.s32 1016, %v3538_v1  ;;  %v1115_v13 = vand.u32 2147483647, %v859_v58 }
 0x159   : > { %v1632_v18 = vadd.s32 %v3546_v7, %v1375_v63  ;;  %v2653_v22 = vsel %vm1885_vm11, %v1114_v4, 0.0  ;;  %vm1887_vm13 = vcmp.lt.s32.totalorder %v1631_v10, 2560  ;;  %v357_v63 = vld [vmem:[%s3525_s28 + $0x430] sm:$0xff]  ;;  %v614_v10 = vld [vmem:[%s3532_s24 + $0x438] sm:$0xff] }
 0x15a   : > { %v2899_v25 = vadd.f32 %v2898_v17, %v2644_v12  ;;  %v861_v12 = vsub.f32 %v349_v61, %v605_v62  ;;  %v1377_v17 = vadd.s32 1024, %v3538_v1  ;;  %v1116_v21 = vand.u32 2147483647, %v860_v3 }
 0x15b   : > { %v1633_v26 = vadd.s32 %v3546_v7, %v1376_v9  ;;  %v2654_v30 = vsel %vm1886_vm12, %v1115_v13, 0.0  ;;  %vm1888_vm14 = vcmp.lt.s32.totalorder %v1632_v18, 2560  ;;  %v358_v9 = vld [vmem:[%s3525_s28 + $0x438] sm:$0xff]  ;;  %v615_v18 = vld [vmem:[%s3532_s24 + $0x440] sm:$0xff] }
 0x15c   : > { %v2900_v33 = vadd.f32 %v2899_v25, %v2645_v20  ;;  %v862_v20 = vsub.f32 %v350_v6, %v606_v8  ;;  %v1378_v25 = vadd.s32 1032, %v3538_v1  ;;  %v1117_v29 = vand.u32 2147483647, %v861_v12 }
 0x15d   : > { %v1634_v34 = vadd.s32 %v3546_v7, %v1377_v17  ;;  %v2655_v38 = vsel %vm1887_vm13, %v1116_v21, 0.0  ;;  %vm1889_vm15 = vcmp.lt.s32.totalorder %v1633_v26, 2560  ;;  %v359_v17 = vld [vmem:[%s3525_s28 + $0x440] sm:$0xff]  ;;  %v616_v26 = vld [vmem:[%s3532_s24 + $0x448] sm:$0xff] }
 0x15e   : > { %v2901_v41 = vadd.f32 %v2900_v33, %v2646_v28  ;;  %v863_v28 = vsub.f32 %v351_v15, %v607_v16  ;;  %v1379_v33 = vadd.s32 1040, %v3538_v1  ;;  %v1118_v37 = vand.u32 2147483647, %v862_v20 }
 0x15f   : > { %v1635_v42 = vadd.s32 %v3546_v7, %v1378_v25  ;;  %v2656_v46 = vsel %vm1888_vm14, %v1117_v29, 0.0  ;;  %vm1890_vm0 = vcmp.lt.s32.totalorder %v1634_v34, 2560  ;;  %v360_v25 = vld [vmem:[%s3525_s28 + $0x448] sm:$0xff]  ;;  %v617_v34 = vld [vmem:[%s3532_s24 + $0x450] sm:$0xff] }
 0x160   : > { %v2902_v49 = vadd.f32 %v2901_v41, %v2647_v36  ;;  %v864_v36 = vsub.f32 %v352_v23, %v608_v24  ;;  %v1380_v41 = vadd.s32 1048, %v3538_v1  ;;  %v1119_v45 = vand.u32 2147483647, %v863_v28 }
 0x161   : > { %v1636_v50 = vadd.s32 %v3546_v7, %v1379_v33  ;;  %v2657_v54 = vsel %vm1889_vm15, %v1118_v37, 0.0  ;;  %vm1891_vm1 = vcmp.lt.s32.totalorder %v1635_v42, 2560  ;;  %v361_v33 = vld [vmem:[%s3525_s28 + $0x450] sm:$0xff]  ;;  %v618_v42 = vld [vmem:[%s3532_s24 + $0x458] sm:$0xff] }
 0x162   : > { %v2903_v57 = vadd.f32 %v2902_v49, %v2648_v44  ;;  %v865_v44 = vsub.f32 %v353_v31, %v609_v32  ;;  %v1381_v49 = vadd.s32 1056, %v3538_v1  ;;  %v1120_v53 = vand.u32 2147483647, %v864_v36 }
 0x163   : > { %v1637_v58 = vadd.s32 %v3546_v7, %v1380_v41  ;;  %v2658_v62 = vsel %vm1890_vm0, %v1119_v45, 0.0  ;;  %vm1892_vm2 = vcmp.lt.s32.totalorder %v1636_v50, 2560  ;;  %v362_v41 = vld [vmem:[%s3525_s28 + $0x458] sm:$0xff]  ;;  %v619_v50 = vld [vmem:[%s3532_s24 + $0x460] sm:$0xff] }
 0x164   : > { %v2904_v2 = vadd.f32 %v2903_v57, %v2649_v52  ;;  %v866_v52 = vsub.f32 %v354_v39, %v610_v40  ;;  %v1382_v57 = vadd.s32 1064, %v3538_v1  ;;  %v1121_v61 = vand.u32 2147483647, %v865_v44 }
 0x165   : > { %v1638_v3 = vadd.s32 %v3546_v7, %v1381_v49  ;;  %v2659_v8 = vsel %vm1891_vm1, %v1120_v53, 0.0  ;;  %vm1893_vm3 = vcmp.lt.s32.totalorder %v1637_v58, 2560  ;;  %v363_v49 = vld [vmem:[%s3525_s28 + $0x460] sm:$0xff]  ;;  %v620_v58 = vld [vmem:[%s3532_s24 + $0x468] sm:$0xff] }
 0x166   : > { %v2905_v11 = vadd.f32 %v2904_v2, %v2650_v60  ;;  %v867_v60 = vsub.f32 %v355_v47, %v611_v48  ;;  %v1383_v2 = vadd.s32 1072, %v3538_v1  ;;  %v1122_v6 = vand.u32 2147483647, %v866_v52 }
 0x167   : > { %v1639_v12 = vadd.s32 %v3546_v7, %v1382_v57  ;;  %v2660_v16 = vsel %vm1892_vm2, %v1121_v61, 0.0  ;;  %vm1894_vm4 = vcmp.lt.s32.totalorder %v1638_v3, 2560  ;;  %v364_v57 = vld [vmem:[%s3525_s28 + $0x468] sm:$0xff]  ;;  %v621_v3 = vld [vmem:[%s3532_s24 + $0x470] sm:$0xff] }
 0x168   : > { %v2906_v19 = vadd.f32 %v2905_v11, %v2651_v5  ;;  %v868_v5 = vsub.f32 %v356_v55, %v612_v56  ;;  %v1384_v11 = vadd.s32 1080, %v3538_v1  ;;  %v1123_v15 = vand.u32 2147483647, %v867_v60 }
 0x169   : > { %v1640_v20 = vadd.s32 %v3546_v7, %v1383_v2  ;;  %v2661_v24 = vsel %vm1893_vm3, %v1122_v6, 0.0  ;;  %vm1895_vm5 = vcmp.lt.s32.totalorder %v1639_v12, 2560  ;;  %v365_v2 = vld [vmem:[%s3525_s28 + $0x470] sm:$0xff]  ;;  %v622_v12 = vld [vmem:[%s3532_s24 + $0x478] sm:$0xff] }
 0x16a   : > { %v2907_v27 = vadd.f32 %v2906_v19, %v2652_v14  ;;  %v869_v14 = vsub.f32 %v357_v63, %v613_v0  ;;  %v1385_v19 = vadd.s32 1088, %v3538_v1  ;;  %v1124_v23 = vand.u32 2147483647, %v868_v5 }
 0x16b   : > { %v1641_v28 = vadd.s32 %v3546_v7, %v1384_v11  ;;  %v2662_v32 = vsel %vm1894_vm4, %v1123_v15, 0.0  ;;  %vm1896_vm6 = vcmp.lt.s32.totalorder %v1640_v20, 2560  ;;  %v366_v11 = vld [vmem:[%s3525_s28 + $0x478] sm:$0xff]  ;;  %v623_v20 = vld [vmem:[%s3532_s24 + $0x480] sm:$0xff] }
 0x16c   : > { %v2908_v35 = vadd.f32 %v2907_v27, %v2653_v22  ;;  %v870_v22 = vsub.f32 %v358_v9, %v614_v10  ;;  %v1386_v27 = vadd.s32 1096, %v3538_v1  ;;  %v1125_v31 = vand.u32 2147483647, %v869_v14 }
 0x16d   : > { %v1642_v36 = vadd.s32 %v3546_v7, %v1385_v19  ;;  %v2663_v40 = vsel %vm1895_vm5, %v1124_v23, 0.0  ;;  %vm1897_vm7 = vcmp.lt.s32.totalorder %v1641_v28, 2560  ;;  %v367_v19 = vld [vmem:[%s3525_s28 + $0x480] sm:$0xff]  ;;  %v624_v28 = vld [vmem:[%s3532_s24 + $0x488] sm:$0xff] }
 0x16e   : > { %v2909_v43 = vadd.f32 %v2908_v35, %v2654_v30  ;;  %v871_v30 = vsub.f32 %v359_v17, %v615_v18  ;;  %v1387_v35 = vadd.s32 1104, %v3538_v1  ;;  %v1126_v39 = vand.u32 2147483647, %v870_v22 }
 0x16f   : > { %v1643_v44 = vadd.s32 %v3546_v7, %v1386_v27  ;;  %v2664_v48 = vsel %vm1896_vm6, %v1125_v31, 0.0  ;;  %vm1898_vm8 = vcmp.lt.s32.totalorder %v1642_v36, 2560  ;;  %v368_v27 = vld [vmem:[%s3525_s28 + $0x488] sm:$0xff]  ;;  %v625_v36 = vld [vmem:[%s3532_s24 + $0x490] sm:$0xff] }
 0x170   : > { %v2910_v51 = vadd.f32 %v2909_v43, %v2655_v38  ;;  %v872_v38 = vsub.f32 %v360_v25, %v616_v26  ;;  %v1388_v43 = vadd.s32 1112, %v3538_v1  ;;  %v1127_v47 = vand.u32 2147483647, %v871_v30 }
 0x171   : > { %v1644_v52 = vadd.s32 %v3546_v7, %v1387_v35  ;;  %v2665_v56 = vsel %vm1897_vm7, %v1126_v39, 0.0  ;;  %vm1899_vm9 = vcmp.lt.s32.totalorder %v1643_v44, 2560  ;;  %v369_v35 = vld [vmem:[%s3525_s28 + $0x490] sm:$0xff]  ;;  %v626_v44 = vld [vmem:[%s3532_s24 + $0x498] sm:$0xff] }
 0x172   : > { %v2911_v59 = vadd.f32 %v2910_v51, %v2656_v46  ;;  %v873_v46 = vsub.f32 %v361_v33, %v617_v34  ;;  %v1389_v51 = vadd.s32 1120, %v3538_v1  ;;  %v1128_v55 = vand.u32 2147483647, %v872_v38 }
 0x173   : > { %v1645_v60 = vadd.s32 %v3546_v7, %v1388_v43  ;;  %v2666_v0 = vsel %vm1898_vm8, %v1127_v47, 0.0  ;;  %vm1900_vm10 = vcmp.lt.s32.totalorder %v1644_v52, 2560  ;;  %v370_v43 = vld [vmem:[%s3525_s28 + $0x498] sm:$0xff]  ;;  %v627_v52 = vld [vmem:[%s3532_s24 + $0x4a0] sm:$0xff] }
 0x174   : > { %v2912_v4 = vadd.f32 %v2911_v59, %v2657_v54  ;;  %v874_v54 = vsub.f32 %v362_v41, %v618_v42  ;;  %v1390_v59 = vadd.s32 1128, %v3538_v1  ;;  %v1129_v63 = vand.u32 2147483647, %v873_v46 }
 0x175   : > { %v1646_v5 = vadd.s32 %v3546_v7, %v1389_v51  ;;  %v2667_v10 = vsel %vm1899_vm9, %v1128_v55, 0.0  ;;  %vm1901_vm11 = vcmp.lt.s32.totalorder %v1645_v60, 2560  ;;  %v371_v51 = vld [vmem:[%s3525_s28 + $0x4a0] sm:$0xff]  ;;  %v628_v60 = vld [vmem:[%s3532_s24 + $0x4a8] sm:$0xff] }
 0x176   : > { %v2913_v13 = vadd.f32 %v2912_v4, %v2658_v62  ;;  %v875_v62 = vsub.f32 %v363_v49, %v619_v50  ;;  %v1391_v4 = vadd.s32 1136, %v3538_v1  ;;  %v1130_v9 = vand.u32 2147483647, %v874_v54 }
 0x177   : > { %v1647_v14 = vadd.s32 %v3546_v7, %v1390_v59  ;;  %v2668_v18 = vsel %vm1900_vm10, %v1129_v63, 0.0  ;;  %vm1902_vm12 = vcmp.lt.s32.totalorder %v1646_v5, 2560  ;;  %v372_v59 = vld [vmem:[%s3525_s28 + $0x4a8] sm:$0xff]  ;;  %v629_v5 = vld [vmem:[%s3532_s24 + $0x4b0] sm:$0xff] }
 0x178   : > { %v2914_v21 = vadd.f32 %v2913_v13, %v2659_v8  ;;  %v876_v8 = vsub.f32 %v364_v57, %v620_v58  ;;  %v1392_v13 = vadd.s32 1144, %v3538_v1  ;;  %v1131_v17 = vand.u32 2147483647, %v875_v62 }
 0x179   : > { %v1648_v22 = vadd.s32 %v3546_v7, %v1391_v4  ;;  %v2669_v26 = vsel %vm1901_vm11, %v1130_v9, 0.0  ;;  %vm1903_vm13 = vcmp.lt.s32.totalorder %v1647_v14, 2560  ;;  %v373_v4 = vld [vmem:[%s3525_s28 + $0x4b0] sm:$0xff]  ;;  %v630_v14 = vld [vmem:[%s3532_s24 + $0x4b8] sm:$0xff] }
 0x17a   : > { %v2915_v29 = vadd.f32 %v2914_v21, %v2660_v16  ;;  %v877_v16 = vsub.f32 %v365_v2, %v621_v3  ;;  %v1393_v21 = vadd.s32 1152, %v3538_v1  ;;  %v1132_v25 = vand.u32 2147483647, %v876_v8 }
 0x17b   : > { %v1649_v30 = vadd.s32 %v3546_v7, %v1392_v13  ;;  %v2670_v34 = vsel %vm1902_vm12, %v1131_v17, 0.0  ;;  %vm1904_vm14 = vcmp.lt.s32.totalorder %v1648_v22, 2560  ;;  %v374_v13 = vld [vmem:[%s3525_s28 + $0x4b8] sm:$0xff]  ;;  %v631_v22 = vld [vmem:[%s3532_s24 + $0x4c0] sm:$0xff] }
 0x17c   : > { %v2916_v37 = vadd.f32 %v2915_v29, %v2661_v24  ;;  %v878_v24 = vsub.f32 %v366_v11, %v622_v12  ;;  %v1394_v29 = vadd.s32 1160, %v3538_v1  ;;  %v1133_v33 = vand.u32 2147483647, %v877_v16 }
 0x17d   : > { %v1650_v38 = vadd.s32 %v3546_v7, %v1393_v21  ;;  %v2671_v42 = vsel %vm1903_vm13, %v1132_v25, 0.0  ;;  %vm1905_vm15 = vcmp.lt.s32.totalorder %v1649_v30, 2560  ;;  %v375_v21 = vld [vmem:[%s3525_s28 + $0x4c0] sm:$0xff]  ;;  %v632_v30 = vld [vmem:[%s3532_s24 + $0x4c8] sm:$0xff] }
 0x17e   : > { %v2917_v45 = vadd.f32 %v2916_v37, %v2662_v32  ;;  %v879_v32 = vsub.f32 %v367_v19, %v623_v20  ;;  %v1395_v37 = vadd.s32 1168, %v3538_v1  ;;  %v1134_v41 = vand.u32 2147483647, %v878_v24 }
 0x17f   : > { %v1651_v46 = vadd.s32 %v3546_v7, %v1394_v29  ;;  %v2672_v50 = vsel %vm1904_vm14, %v1133_v33, 0.0  ;;  %vm1906_vm0 = vcmp.lt.s32.totalorder %v1650_v38, 2560  ;;  %v376_v29 = vld [vmem:[%s3525_s28 + $0x4c8] sm:$0xff]  ;;  %v633_v38 = vld [vmem:[%s3532_s24 + $0x4d0] sm:$0xff] }
 0x180   : > { %v2918_v53 = vadd.f32 %v2917_v45, %v2663_v40  ;;  %v880_v40 = vsub.f32 %v368_v27, %v624_v28  ;;  %v1396_v45 = vadd.s32 1176, %v3538_v1  ;;  %v1135_v49 = vand.u32 2147483647, %v879_v32 }
 0x181   : > { %v1652_v54 = vadd.s32 %v3546_v7, %v1395_v37  ;;  %v2673_v58 = vsel %vm1905_vm15, %v1134_v41, 0.0  ;;  %vm1907_vm1 = vcmp.lt.s32.totalorder %v1651_v46, 2560  ;;  %v377_v37 = vld [vmem:[%s3525_s28 + $0x4d0] sm:$0xff]  ;;  %v634_v46 = vld [vmem:[%s3532_s24 + $0x4d8] sm:$0xff] }
 0x182   : > { %v2919_v61 = vadd.f32 %v2918_v53, %v2664_v48  ;;  %v881_v48 = vsub.f32 %v369_v35, %v625_v36  ;;  %v1397_v53 = vadd.s32 1184, %v3538_v1  ;;  %v1136_v57 = vand.u32 2147483647, %v880_v40 }
 0x183   : > { %v1653_v62 = vadd.s32 %v3546_v7, %v1396_v45  ;;  %v2674_v3 = vsel %vm1906_vm0, %v1135_v49, 0.0  ;;  %vm1908_vm2 = vcmp.lt.s32.totalorder %v1652_v54, 2560  ;;  %v378_v45 = vld [vmem:[%s3525_s28 + $0x4d8] sm:$0xff]  ;;  %v635_v54 = vld [vmem:[%s3532_s24 + $0x4e0] sm:$0xff] }
 0x184   : > { %v2920_v6 = vadd.f32 %v2919_v61, %v2665_v56  ;;  %v882_v56 = vsub.f32 %v370_v43, %v626_v44  ;;  %v1398_v61 = vadd.s32 1192, %v3538_v1  ;;  %v1137_v2 = vand.u32 2147483647, %v881_v48 }
 0x185   : > { %v1654_v8 = vadd.s32 %v3546_v7, %v1397_v53  ;;  %v2675_v12 = vsel %vm1907_vm1, %v1136_v57, 0.0  ;;  %vm1909_vm3 = vcmp.lt.s32.totalorder %v1653_v62, 2560  ;;  %v379_v53 = vld [vmem:[%s3525_s28 + $0x4e0] sm:$0xff]  ;;  %v636_v62 = vld [vmem:[%s3532_s24 + $0x4e8] sm:$0xff] }
 0x186   : > { %v2921_v15 = vadd.f32 %v2920_v6, %v2666_v0  ;;  %v883_v0 = vsub.f32 %v371_v51, %v627_v52  ;;  %v1399_v6 = vadd.s32 1200, %v3538_v1  ;;  %v1138_v11 = vand.u32 2147483647, %v882_v56 }
 0x187   : > { %v1655_v16 = vadd.s32 %v3546_v7, %v1398_v61  ;;  %v2676_v20 = vsel %vm1908_vm2, %v1137_v2, 0.0  ;;  %vm1910_vm4 = vcmp.lt.s32.totalorder %v1654_v8, 2560  ;;  %v380_v61 = vld [vmem:[%s3525_s28 + $0x4e8] sm:$0xff]  ;;  %v637_v8 = vld [vmem:[%s3532_s24 + $0x4f0] sm:$0xff] }
 0x188   : > { %v2922_v23 = vadd.f32 %v2921_v15, %v2667_v10  ;;  %v884_v10 = vsub.f32 %v372_v59, %v628_v60  ;;  %v1400_v15 = vadd.s32 1208, %v3538_v1  ;;  %v1139_v19 = vand.u32 2147483647, %v883_v0 }
 0x189   : > { %v1656_v24 = vadd.s32 %v3546_v7, %v1399_v6  ;;  %v2677_v28 = vsel %vm1909_vm3, %v1138_v11, 0.0  ;;  %vm1911_vm5 = vcmp.lt.s32.totalorder %v1655_v16, 2560  ;;  %v381_v6 = vld [vmem:[%s3525_s28 + $0x4f0] sm:$0xff]  ;;  %v638_v16 = vld [vmem:[%s3532_s24 + $0x4f8] sm:$0xff] }
 0x18a   : > { %v2923_v31 = vadd.f32 %v2922_v23, %v2668_v18  ;;  %v885_v18 = vsub.f32 %v373_v4, %v629_v5  ;;  %v1401_v23 = vadd.s32 1216, %v3538_v1  ;;  %v1140_v27 = vand.u32 2147483647, %v884_v10 }
 0x18b   : > { %v1657_v32 = vadd.s32 %v3546_v7, %v1400_v15  ;;  %v2678_v36 = vsel %vm1910_vm4, %v1139_v19, 0.0  ;;  %vm1912_vm6 = vcmp.lt.s32.totalorder %v1656_v24, 2560  ;;  %v382_v15 = vld [vmem:[%s3525_s28 + $0x4f8] sm:$0xff]  ;;  %v639_v24 = vld [vmem:[%s3532_s24 + $0x500] sm:$0xff] }
 0x18c   : > { %v2924_v39 = vadd.f32 %v2923_v31, %v2669_v26  ;;  %v886_v26 = vsub.f32 %v374_v13, %v630_v14  ;;  %v1402_v31 = vadd.s32 1224, %v3538_v1  ;;  %v1141_v35 = vand.u32 2147483647, %v885_v18 }
 0x18d   : > { %v1658_v40 = vadd.s32 %v3546_v7, %v1401_v23  ;;  %v2679_v44 = vsel %vm1911_vm5, %v1140_v27, 0.0  ;;  %vm1913_vm7 = vcmp.lt.s32.totalorder %v1657_v32, 2560  ;;  %v383_v23 = vld [vmem:[%s3525_s28 + $0x500] sm:$0xff]  ;;  %v640_v32 = vld [vmem:[%s3532_s24 + $0x508] sm:$0xff] }
 0x18e   : > { %v2925_v47 = vadd.f32 %v2924_v39, %v2670_v34  ;;  %v887_v34 = vsub.f32 %v375_v21, %v631_v22  ;;  %v1403_v39 = vadd.s32 1232, %v3538_v1  ;;  %v1142_v43 = vand.u32 2147483647, %v886_v26 }
 0x18f   : > { %v1659_v48 = vadd.s32 %v3546_v7, %v1402_v31  ;;  %v2680_v52 = vsel %vm1912_vm6, %v1141_v35, 0.0  ;;  %vm1914_vm8 = vcmp.lt.s32.totalorder %v1658_v40, 2560  ;;  %v384_v31 = vld [vmem:[%s3525_s28 + $0x508] sm:$0xff]  ;;  %v641_v40 = vld [vmem:[%s3532_s24 + $0x510] sm:$0xff] }
 0x190   : > { %v2926_v55 = vadd.f32 %v2925_v47, %v2671_v42  ;;  %v888_v42 = vsub.f32 %v376_v29, %v632_v30  ;;  %v1404_v47 = vadd.s32 1240, %v3538_v1  ;;  %v1143_v51 = vand.u32 2147483647, %v887_v34 }
 0x191   : > { %v1660_v56 = vadd.s32 %v3546_v7, %v1403_v39  ;;  %v2681_v60 = vsel %vm1913_vm7, %v1142_v43, 0.0  ;;  %vm1915_vm9 = vcmp.lt.s32.totalorder %v1659_v48, 2560  ;;  %v385_v39 = vld [vmem:[%s3525_s28 + $0x510] sm:$0xff]  ;;  %v642_v48 = vld [vmem:[%s3532_s24 + $0x518] sm:$0xff] }
 0x192   : > { %v2927_v63 = vadd.f32 %v2926_v55, %v2672_v50  ;;  %v889_v50 = vsub.f32 %v377_v37, %v633_v38  ;;  %v1405_v55 = vadd.s32 1248, %v3538_v1  ;;  %v1144_v59 = vand.u32 2147483647, %v888_v42 }
 0x193   : > { %v1661_v0 = vadd.s32 %v3546_v7, %v1404_v47  ;;  %v2682_v5 = vsel %vm1914_vm8, %v1143_v51, 0.0  ;;  %vm1916_vm10 = vcmp.lt.s32.totalorder %v1660_v56, 2560  ;;  %v386_v47 = vld [vmem:[%s3525_s28 + $0x518] sm:$0xff]  ;;  %v643_v56 = vld [vmem:[%s3532_s24 + $0x520] sm:$0xff] }
 0x194   : > { %v2928_v9 = vadd.f32 %v2927_v63, %v2673_v58  ;;  %v890_v58 = vsub.f32 %v378_v45, %v634_v46  ;;  %v1406_v63 = vadd.s32 1256, %v3538_v1  ;;  %v1145_v4 = vand.u32 2147483647, %v889_v50 }
 0x195   : > { %v1662_v10 = vadd.s32 %v3546_v7, %v1405_v55  ;;  %v2683_v14 = vsel %vm1915_vm9, %v1144_v59, 0.0  ;;  %vm1917_vm11 = vcmp.lt.s32.totalorder %v1661_v0, 2560  ;;  %v387_v55 = vld [vmem:[%s3525_s28 + $0x520] sm:$0xff]  ;;  %v644_v0 = vld [vmem:[%s3532_s24 + $0x528] sm:$0xff] }
 0x196   : > { %v2929_v17 = vadd.f32 %v2928_v9, %v2674_v3  ;;  %v891_v3 = vsub.f32 %v379_v53, %v635_v54  ;;  %v1407_v9 = vadd.s32 1264, %v3538_v1  ;;  %v1146_v13 = vand.u32 2147483647, %v890_v58 }
 0x197   : > { %v1663_v18 = vadd.s32 %v3546_v7, %v1406_v63  ;;  %v2684_v22 = vsel %vm1916_vm10, %v1145_v4, 0.0  ;;  %vm1918_vm12 = vcmp.lt.s32.totalorder %v1662_v10, 2560  ;;  %v388_v63 = vld [vmem:[%s3525_s28 + $0x528] sm:$0xff]  ;;  %v645_v10 = vld [vmem:[%s3532_s24 + $0x530] sm:$0xff] }
 0x198   : > { %v2930_v25 = vadd.f32 %v2929_v17, %v2675_v12  ;;  %v892_v12 = vsub.f32 %v380_v61, %v636_v62  ;;  %v1408_v17 = vadd.s32 1272, %v3538_v1  ;;  %v1147_v21 = vand.u32 2147483647, %v891_v3 }
 0x199   : > { %v1664_v26 = vadd.s32 %v3546_v7, %v1407_v9  ;;  %v2685_v30 = vsel %vm1917_vm11, %v1146_v13, 0.0  ;;  %vm1919_vm13 = vcmp.lt.s32.totalorder %v1663_v18, 2560  ;;  %v389_v9 = vld [vmem:[%s3525_s28 + $0x530] sm:$0xff]  ;;  %v646_v18 = vld [vmem:[%s3532_s24 + $0x538] sm:$0xff] }
 0x19a   : > { %v2931_v33 = vadd.f32 %v2930_v25, %v2676_v20  ;;  %v893_v20 = vsub.f32 %v381_v6, %v637_v8  ;;  %v1409_v25 = vadd.s32 1280, %v3538_v1  ;;  %v1148_v29 = vand.u32 2147483647, %v892_v12 }
 0x19b   : > { %v1665_v34 = vadd.s32 %v3546_v7, %v1408_v17  ;;  %v2686_v38 = vsel %vm1918_vm12, %v1147_v21, 0.0  ;;  %vm1920_vm14 = vcmp.lt.s32.totalorder %v1664_v26, 2560  ;;  %v390_v17 = vld [vmem:[%s3525_s28 + $0x538] sm:$0xff]  ;;  %v647_v26 = vld [vmem:[%s3532_s24 + $0x540] sm:$0xff] }
 0x19c   : > { %v2932_v41 = vadd.f32 %v2931_v33, %v2677_v28  ;;  %v894_v28 = vsub.f32 %v382_v15, %v638_v16  ;;  %v1410_v33 = vadd.s32 1288, %v3538_v1  ;;  %v1149_v37 = vand.u32 2147483647, %v893_v20 }
 0x19d   : > { %v1666_v42 = vadd.s32 %v3546_v7, %v1409_v25  ;;  %v2687_v46 = vsel %vm1919_vm13, %v1148_v29, 0.0  ;;  %vm1921_vm15 = vcmp.lt.s32.totalorder %v1665_v34, 2560  ;;  %v391_v25 = vld [vmem:[%s3525_s28 + $0x540] sm:$0xff]  ;;  %v648_v34 = vld [vmem:[%s3532_s24 + $0x548] sm:$0xff] }
 0x19e   : > { %v2933_v49 = vadd.f32 %v2932_v41, %v2678_v36  ;;  %v895_v36 = vsub.f32 %v383_v23, %v639_v24  ;;  %v1411_v41 = vadd.s32 1296, %v3538_v1  ;;  %v1150_v45 = vand.u32 2147483647, %v894_v28 }
 0x19f   : > { %v1667_v50 = vadd.s32 %v3546_v7, %v1410_v33  ;;  %v2688_v54 = vsel %vm1920_vm14, %v1149_v37, 0.0  ;;  %vm1922_vm0 = vcmp.lt.s32.totalorder %v1666_v42, 2560  ;;  %v392_v33 = vld [vmem:[%s3525_s28 + $0x548] sm:$0xff]  ;;  %v649_v42 = vld [vmem:[%s3532_s24 + $0x550] sm:$0xff] }
 0x1a0   : > { %v2934_v57 = vadd.f32 %v2933_v49, %v2679_v44  ;;  %v896_v44 = vsub.f32 %v384_v31, %v640_v32  ;;  %v1412_v49 = vadd.s32 1304, %v3538_v1  ;;  %v1151_v53 = vand.u32 2147483647, %v895_v36 }
 0x1a1   : > { %v1668_v58 = vadd.s32 %v3546_v7, %v1411_v41  ;;  %v2689_v62 = vsel %vm1921_vm15, %v1150_v45, 0.0  ;;  %vm1923_vm1 = vcmp.lt.s32.totalorder %v1667_v50, 2560  ;;  %v393_v41 = vld [vmem:[%s3525_s28 + $0x550] sm:$0xff]  ;;  %v650_v50 = vld [vmem:[%s3532_s24 + $0x558] sm:$0xff] }
 0x1a2   : > { %v2935_v2 = vadd.f32 %v2934_v57, %v2680_v52  ;;  %v897_v52 = vsub.f32 %v385_v39, %v641_v40  ;;  %v1413_v57 = vadd.s32 1312, %v3538_v1  ;;  %v1152_v61 = vand.u32 2147483647, %v896_v44 }
 0x1a3   : > { %v1669_v3 = vadd.s32 %v3546_v7, %v1412_v49  ;;  %v2690_v8 = vsel %vm1922_vm0, %v1151_v53, 0.0  ;;  %vm1924_vm2 = vcmp.lt.s32.totalorder %v1668_v58, 2560  ;;  %v394_v49 = vld [vmem:[%s3525_s28 + $0x558] sm:$0xff]  ;;  %v651_v58 = vld [vmem:[%s3532_s24 + $0x560] sm:$0xff] }
 0x1a4   : > { %v2936_v11 = vadd.f32 %v2935_v2, %v2681_v60  ;;  %v898_v60 = vsub.f32 %v386_v47, %v642_v48  ;;  %v1414_v2 = vadd.s32 1320, %v3538_v1  ;;  %v1153_v6 = vand.u32 2147483647, %v897_v52 }
 0x1a5   : > { %v1670_v12 = vadd.s32 %v3546_v7, %v1413_v57  ;;  %v2691_v16 = vsel %vm1923_vm1, %v1152_v61, 0.0  ;;  %vm1925_vm3 = vcmp.lt.s32.totalorder %v1669_v3, 2560  ;;  %v395_v57 = vld [vmem:[%s3525_s28 + $0x560] sm:$0xff]  ;;  %v652_v3 = vld [vmem:[%s3532_s24 + $0x568] sm:$0xff] }
 0x1a6   : > { %v2937_v19 = vadd.f32 %v2936_v11, %v2682_v5  ;;  %v899_v5 = vsub.f32 %v387_v55, %v643_v56  ;;  %v1415_v11 = vadd.s32 1328, %v3538_v1  ;;  %v1154_v15 = vand.u32 2147483647, %v898_v60 }
 0x1a7   : > { %v1671_v20 = vadd.s32 %v3546_v7, %v1414_v2  ;;  %v2692_v24 = vsel %vm1924_vm2, %v1153_v6, 0.0  ;;  %vm1926_vm4 = vcmp.lt.s32.totalorder %v1670_v12, 2560  ;;  %v396_v2 = vld [vmem:[%s3525_s28 + $0x568] sm:$0xff]  ;;  %v653_v12 = vld [vmem:[%s3532_s24 + $0x570] sm:$0xff] }
 0x1a8   : > { %v2938_v27 = vadd.f32 %v2937_v19, %v2683_v14  ;;  %v900_v14 = vsub.f32 %v388_v63, %v644_v0  ;;  %v1416_v19 = vadd.s32 1336, %v3538_v1  ;;  %v1155_v23 = vand.u32 2147483647, %v899_v5 }
 0x1a9   : > { %v1672_v28 = vadd.s32 %v3546_v7, %v1415_v11  ;;  %v2693_v32 = vsel %vm1925_vm3, %v1154_v15, 0.0  ;;  %vm1927_vm5 = vcmp.lt.s32.totalorder %v1671_v20, 2560  ;;  %v397_v11 = vld [vmem:[%s3525_s28 + $0x570] sm:$0xff]  ;;  %v654_v20 = vld [vmem:[%s3532_s24 + $0x578] sm:$0xff] }
 0x1aa   : > { %v2939_v35 = vadd.f32 %v2938_v27, %v2684_v22  ;;  %v901_v22 = vsub.f32 %v389_v9, %v645_v10  ;;  %v1417_v27 = vadd.s32 1344, %v3538_v1  ;;  %v1156_v31 = vand.u32 2147483647, %v900_v14 }
 0x1ab   : > { %v1673_v36 = vadd.s32 %v3546_v7, %v1416_v19  ;;  %v2694_v40 = vsel %vm1926_vm4, %v1155_v23, 0.0  ;;  %vm1928_vm6 = vcmp.lt.s32.totalorder %v1672_v28, 2560  ;;  %v398_v19 = vld [vmem:[%s3525_s28 + $0x578] sm:$0xff]  ;;  %v655_v28 = vld [vmem:[%s3532_s24 + $0x580] sm:$0xff] }
 0x1ac   : > { %v2940_v43 = vadd.f32 %v2939_v35, %v2685_v30  ;;  %v902_v30 = vsub.f32 %v390_v17, %v646_v18  ;;  %v1418_v35 = vadd.s32 1352, %v3538_v1  ;;  %v1157_v39 = vand.u32 2147483647, %v901_v22 }
 0x1ad   : > { %v1674_v44 = vadd.s32 %v3546_v7, %v1417_v27  ;;  %v2695_v48 = vsel %vm1927_vm5, %v1156_v31, 0.0  ;;  %vm1929_vm7 = vcmp.lt.s32.totalorder %v1673_v36, 2560  ;;  %v399_v27 = vld [vmem:[%s3525_s28 + $0x580] sm:$0xff]  ;;  %v656_v36 = vld [vmem:[%s3532_s24 + $0x588] sm:$0xff] }
 0x1ae   : > { %v2941_v51 = vadd.f32 %v2940_v43, %v2686_v38  ;;  %v903_v38 = vsub.f32 %v391_v25, %v647_v26  ;;  %v1419_v43 = vadd.s32 1360, %v3538_v1  ;;  %v1158_v47 = vand.u32 2147483647, %v902_v30 }
 0x1af   : > { %v1675_v52 = vadd.s32 %v3546_v7, %v1418_v35  ;;  %v2696_v56 = vsel %vm1928_vm6, %v1157_v39, 0.0  ;;  %vm1930_vm8 = vcmp.lt.s32.totalorder %v1674_v44, 2560  ;;  %v400_v35 = vld [vmem:[%s3525_s28 + $0x588] sm:$0xff]  ;;  %v657_v44 = vld [vmem:[%s3532_s24 + $0x590] sm:$0xff] }
 0x1b0   : > { %v2942_v59 = vadd.f32 %v2941_v51, %v2687_v46  ;;  %v904_v46 = vsub.f32 %v392_v33, %v648_v34  ;;  %v1420_v51 = vadd.s32 1368, %v3538_v1  ;;  %v1159_v55 = vand.u32 2147483647, %v903_v38 }
 0x1b1   : > { %v1676_v60 = vadd.s32 %v3546_v7, %v1419_v43  ;;  %v2697_v0 = vsel %vm1929_vm7, %v1158_v47, 0.0  ;;  %vm1931_vm9 = vcmp.lt.s32.totalorder %v1675_v52, 2560  ;;  %v401_v43 = vld [vmem:[%s3525_s28 + $0x590] sm:$0xff]  ;;  %v658_v52 = vld [vmem:[%s3532_s24 + $0x598] sm:$0xff] }
 0x1b2   : > { %v2943_v4 = vadd.f32 %v2942_v59, %v2688_v54  ;;  %v905_v54 = vsub.f32 %v393_v41, %v649_v42  ;;  %v1421_v59 = vadd.s32 1376, %v3538_v1  ;;  %v1160_v63 = vand.u32 2147483647, %v904_v46 }
 0x1b3   : > { %v1677_v5 = vadd.s32 %v3546_v7, %v1420_v51  ;;  %v2698_v10 = vsel %vm1930_vm8, %v1159_v55, 0.0  ;;  %vm1932_vm10 = vcmp.lt.s32.totalorder %v1676_v60, 2560  ;;  %v402_v51 = vld [vmem:[%s3525_s28 + $0x598] sm:$0xff]  ;;  %v659_v60 = vld [vmem:[%s3532_s24 + $0x5a0] sm:$0xff] }
 0x1b4   : > { %v2944_v13 = vadd.f32 %v2943_v4, %v2689_v62  ;;  %v906_v62 = vsub.f32 %v394_v49, %v650_v50  ;;  %v1422_v4 = vadd.s32 1384, %v3538_v1  ;;  %v1161_v9 = vand.u32 2147483647, %v905_v54 }
 0x1b5   : > { %v1678_v14 = vadd.s32 %v3546_v7, %v1421_v59  ;;  %v2699_v18 = vsel %vm1931_vm9, %v1160_v63, 0.0  ;;  %vm1933_vm11 = vcmp.lt.s32.totalorder %v1677_v5, 2560  ;;  %v403_v59 = vld [vmem:[%s3525_s28 + $0x5a0] sm:$0xff]  ;;  %v660_v5 = vld [vmem:[%s3532_s24 + $0x5a8] sm:$0xff] }
 0x1b6   : > { %v2945_v21 = vadd.f32 %v2944_v13, %v2690_v8  ;;  %v907_v8 = vsub.f32 %v395_v57, %v651_v58  ;;  %v1423_v13 = vadd.s32 1392, %v3538_v1  ;;  %v1162_v17 = vand.u32 2147483647, %v906_v62 }
 0x1b7   : > { %v1679_v22 = vadd.s32 %v3546_v7, %v1422_v4  ;;  %v2700_v26 = vsel %vm1932_vm10, %v1161_v9, 0.0  ;;  %vm1934_vm12 = vcmp.lt.s32.totalorder %v1678_v14, 2560  ;;  %v404_v4 = vld [vmem:[%s3525_s28 + $0x5a8] sm:$0xff]  ;;  %v661_v14 = vld [vmem:[%s3532_s24 + $0x5b0] sm:$0xff] }
 0x1b8   : > { %v2946_v29 = vadd.f32 %v2945_v21, %v2691_v16  ;;  %v908_v16 = vsub.f32 %v396_v2, %v652_v3  ;;  %v1424_v21 = vadd.s32 1400, %v3538_v1  ;;  %v1163_v25 = vand.u32 2147483647, %v907_v8 }
 0x1b9   : > { %v1680_v30 = vadd.s32 %v3546_v7, %v1423_v13  ;;  %v2701_v34 = vsel %vm1933_vm11, %v1162_v17, 0.0  ;;  %vm1935_vm13 = vcmp.lt.s32.totalorder %v1679_v22, 2560  ;;  %v405_v13 = vld [vmem:[%s3525_s28 + $0x5b0] sm:$0xff]  ;;  %v662_v22 = vld [vmem:[%s3532_s24 + $0x5b8] sm:$0xff] }
 0x1ba   : > { %v2947_v37 = vadd.f32 %v2946_v29, %v2692_v24  ;;  %v909_v24 = vsub.f32 %v397_v11, %v653_v12  ;;  %v1425_v29 = vadd.s32 1408, %v3538_v1  ;;  %v1164_v33 = vand.u32 2147483647, %v908_v16 }
 0x1bb   : > { %v1681_v38 = vadd.s32 %v3546_v7, %v1424_v21  ;;  %v2702_v42 = vsel %vm1934_vm12, %v1163_v25, 0.0  ;;  %vm1936_vm14 = vcmp.lt.s32.totalorder %v1680_v30, 2560  ;;  %v406_v21 = vld [vmem:[%s3525_s28 + $0x5b8] sm:$0xff]  ;;  %v663_v30 = vld [vmem:[%s3532_s24 + $0x5c0] sm:$0xff] }
 0x1bc   : > { %v2948_v45 = vadd.f32 %v2947_v37, %v2693_v32  ;;  %v910_v32 = vsub.f32 %v398_v19, %v654_v20  ;;  %v1426_v37 = vadd.s32 1416, %v3538_v1  ;;  %v1165_v41 = vand.u32 2147483647, %v909_v24 }
 0x1bd   : > { %v1682_v46 = vadd.s32 %v3546_v7, %v1425_v29  ;;  %v2703_v50 = vsel %vm1935_vm13, %v1164_v33, 0.0  ;;  %vm1937_vm15 = vcmp.lt.s32.totalorder %v1681_v38, 2560  ;;  %v407_v29 = vld [vmem:[%s3525_s28 + $0x5c0] sm:$0xff]  ;;  %v664_v38 = vld [vmem:[%s3532_s24 + $0x5c8] sm:$0xff] }
 0x1be   : > { %v2949_v53 = vadd.f32 %v2948_v45, %v2694_v40  ;;  %v911_v40 = vsub.f32 %v399_v27, %v655_v28  ;;  %v1427_v45 = vadd.s32 1424, %v3538_v1  ;;  %v1166_v49 = vand.u32 2147483647, %v910_v32 }
 0x1bf   : > { %v1683_v54 = vadd.s32 %v3546_v7, %v1426_v37  ;;  %v2704_v58 = vsel %vm1936_vm14, %v1165_v41, 0.0  ;;  %vm1938_vm0 = vcmp.lt.s32.totalorder %v1682_v46, 2560  ;;  %v408_v37 = vld [vmem:[%s3525_s28 + $0x5c8] sm:$0xff]  ;;  %v665_v46 = vld [vmem:[%s3532_s24 + $0x5d0] sm:$0xff] }
 0x1c0   : > { %v2950_v61 = vadd.f32 %v2949_v53, %v2695_v48  ;;  %v912_v48 = vsub.f32 %v400_v35, %v656_v36  ;;  %v1428_v53 = vadd.s32 1432, %v3538_v1  ;;  %v1167_v57 = vand.u32 2147483647, %v911_v40 }
 0x1c1   : > { %v1684_v62 = vadd.s32 %v3546_v7, %v1427_v45  ;;  %v2705_v3 = vsel %vm1937_vm15, %v1166_v49, 0.0  ;;  %vm1939_vm1 = vcmp.lt.s32.totalorder %v1683_v54, 2560  ;;  %v409_v45 = vld [vmem:[%s3525_s28 + $0x5d0] sm:$0xff]  ;;  %v666_v54 = vld [vmem:[%s3532_s24 + $0x5d8] sm:$0xff] }
 0x1c2   : > { %v2951_v6 = vadd.f32 %v2950_v61, %v2696_v56  ;;  %v913_v56 = vsub.f32 %v401_v43, %v657_v44  ;;  %v1429_v61 = vadd.s32 1440, %v3538_v1  ;;  %v1168_v2 = vand.u32 2147483647, %v912_v48 }
 0x1c3   : > { %v1685_v8 = vadd.s32 %v3546_v7, %v1428_v53  ;;  %v2706_v12 = vsel %vm1938_vm0, %v1167_v57, 0.0  ;;  %vm1940_vm2 = vcmp.lt.s32.totalorder %v1684_v62, 2560  ;;  %v410_v53 = vld [vmem:[%s3525_s28 + $0x5d8] sm:$0xff]  ;;  %v667_v62 = vld [vmem:[%s3532_s24 + $0x5e0] sm:$0xff] }
 0x1c4   : > { %v2952_v15 = vadd.f32 %v2951_v6, %v2697_v0  ;;  %v914_v0 = vsub.f32 %v402_v51, %v658_v52  ;;  %v1430_v6 = vadd.s32 1448, %v3538_v1  ;;  %v1169_v11 = vand.u32 2147483647, %v913_v56 }
 0x1c5   : > { %v1686_v16 = vadd.s32 %v3546_v7, %v1429_v61  ;;  %v2707_v20 = vsel %vm1939_vm1, %v1168_v2, 0.0  ;;  %vm1941_vm3 = vcmp.lt.s32.totalorder %v1685_v8, 2560  ;;  %v411_v61 = vld [vmem:[%s3525_s28 + $0x5e0] sm:$0xff]  ;;  %v668_v8 = vld [vmem:[%s3532_s24 + $0x5e8] sm:$0xff] }
 0x1c6   : > { %v2953_v23 = vadd.f32 %v2952_v15, %v2698_v10  ;;  %v915_v10 = vsub.f32 %v403_v59, %v659_v60  ;;  %v1431_v15 = vadd.s32 1456, %v3538_v1  ;;  %v1170_v19 = vand.u32 2147483647, %v914_v0 }
 0x1c7   : > { %v1687_v24 = vadd.s32 %v3546_v7, %v1430_v6  ;;  %v2708_v28 = vsel %vm1940_vm2, %v1169_v11, 0.0  ;;  %vm1942_vm4 = vcmp.lt.s32.totalorder %v1686_v16, 2560  ;;  %v412_v6 = vld [vmem:[%s3525_s28 + $0x5e8] sm:$0xff]  ;;  %v669_v16 = vld [vmem:[%s3532_s24 + $0x5f0] sm:$0xff] }
 0x1c8   : > { %v2954_v31 = vadd.f32 %v2953_v23, %v2699_v18  ;;  %v916_v18 = vsub.f32 %v404_v4, %v660_v5  ;;  %v1432_v23 = vadd.s32 1464, %v3538_v1  ;;  %v1171_v27 = vand.u32 2147483647, %v915_v10 }
 0x1c9   : > { %v1688_v32 = vadd.s32 %v3546_v7, %v1431_v15  ;;  %v2709_v36 = vsel %vm1941_vm3, %v1170_v19, 0.0  ;;  %vm1943_vm5 = vcmp.lt.s32.totalorder %v1687_v24, 2560  ;;  %v413_v15 = vld [vmem:[%s3525_s28 + $0x5f0] sm:$0xff]  ;;  %v670_v24 = vld [vmem:[%s3532_s24 + $0x5f8] sm:$0xff] }
 0x1ca   : > { %v2955_v39 = vadd.f32 %v2954_v31, %v2700_v26  ;;  %v917_v26 = vsub.f32 %v405_v13, %v661_v14  ;;  %v1433_v31 = vadd.s32 1472, %v3538_v1  ;;  %v1172_v35 = vand.u32 2147483647, %v916_v18 }
 0x1cb   : > { %v1689_v40 = vadd.s32 %v3546_v7, %v1432_v23  ;;  %v2710_v44 = vsel %vm1942_vm4, %v1171_v27, 0.0  ;;  %vm1944_vm6 = vcmp.lt.s32.totalorder %v1688_v32, 2560  ;;  %v414_v23 = vld [vmem:[%s3525_s28 + $0x5f8] sm:$0xff]  ;;  %v671_v32 = vld [vmem:[%s3532_s24 + $0x600] sm:$0xff] }
 0x1cc   : > { %v2956_v47 = vadd.f32 %v2955_v39, %v2701_v34  ;;  %v918_v34 = vsub.f32 %v406_v21, %v662_v22  ;;  %v1434_v39 = vadd.s32 1480, %v3538_v1  ;;  %v1173_v43 = vand.u32 2147483647, %v917_v26 }
 0x1cd   : > { %v1690_v48 = vadd.s32 %v3546_v7, %v1433_v31  ;;  %v2711_v52 = vsel %vm1943_vm5, %v1172_v35, 0.0  ;;  %vm1945_vm7 = vcmp.lt.s32.totalorder %v1689_v40, 2560  ;;  %v415_v31 = vld [vmem:[%s3525_s28 + $0x600] sm:$0xff]  ;;  %v672_v40 = vld [vmem:[%s3532_s24 + $0x608] sm:$0xff] }
 0x1ce   : > { %v2957_v55 = vadd.f32 %v2956_v47, %v2702_v42  ;;  %v919_v42 = vsub.f32 %v407_v29, %v663_v30  ;;  %v1435_v47 = vadd.s32 1488, %v3538_v1  ;;  %v1174_v51 = vand.u32 2147483647, %v918_v34 }
 0x1cf   : > { %v1691_v56 = vadd.s32 %v3546_v7, %v1434_v39  ;;  %v2712_v60 = vsel %vm1944_vm6, %v1173_v43, 0.0  ;;  %vm1946_vm8 = vcmp.lt.s32.totalorder %v1690_v48, 2560  ;;  %v416_v39 = vld [vmem:[%s3525_s28 + $0x608] sm:$0xff]  ;;  %v673_v48 = vld [vmem:[%s3532_s24 + $0x610] sm:$0xff] }
 0x1d0   : > { %v2958_v63 = vadd.f32 %v2957_v55, %v2703_v50  ;;  %v920_v50 = vsub.f32 %v408_v37, %v664_v38  ;;  %v1436_v55 = vadd.s32 1496, %v3538_v1  ;;  %v1175_v59 = vand.u32 2147483647, %v919_v42 }
 0x1d1   : > { %v1692_v0 = vadd.s32 %v3546_v7, %v1435_v47  ;;  %v2713_v5 = vsel %vm1945_vm7, %v1174_v51, 0.0  ;;  %vm1947_vm9 = vcmp.lt.s32.totalorder %v1691_v56, 2560  ;;  %v417_v47 = vld [vmem:[%s3525_s28 + $0x610] sm:$0xff]  ;;  %v674_v56 = vld [vmem:[%s3532_s24 + $0x618] sm:$0xff] }
 0x1d2   : > { %v2959_v9 = vadd.f32 %v2958_v63, %v2704_v58  ;;  %v921_v58 = vsub.f32 %v409_v45, %v665_v46  ;;  %v1437_v63 = vadd.s32 1504, %v3538_v1  ;;  %v1176_v4 = vand.u32 2147483647, %v920_v50 }
 0x1d3   : > { %v1693_v10 = vadd.s32 %v3546_v7, %v1436_v55  ;;  %v2714_v14 = vsel %vm1946_vm8, %v1175_v59, 0.0  ;;  %vm1948_vm10 = vcmp.lt.s32.totalorder %v1692_v0, 2560  ;;  %v418_v55 = vld [vmem:[%s3525_s28 + $0x618] sm:$0xff]  ;;  %v675_v0 = vld [vmem:[%s3532_s24 + $0x620] sm:$0xff] }
 0x1d4   : > { %v2960_v17 = vadd.f32 %v2959_v9, %v2705_v3  ;;  %v922_v3 = vsub.f32 %v410_v53, %v666_v54  ;;  %v1438_v9 = vadd.s32 1512, %v3538_v1  ;;  %v1177_v13 = vand.u32 2147483647, %v921_v58 }
 0x1d5   : > { %v1694_v18 = vadd.s32 %v3546_v7, %v1437_v63  ;;  %v2715_v22 = vsel %vm1947_vm9, %v1176_v4, 0.0  ;;  %vm1949_vm11 = vcmp.lt.s32.totalorder %v1693_v10, 2560  ;;  %v419_v63 = vld [vmem:[%s3525_s28 + $0x620] sm:$0xff]  ;;  %v676_v10 = vld [vmem:[%s3532_s24 + $0x628] sm:$0xff] }
 0x1d6   : > { %v2961_v25 = vadd.f32 %v2960_v17, %v2706_v12  ;;  %v923_v12 = vsub.f32 %v411_v61, %v667_v62  ;;  %v1439_v17 = vadd.s32 1520, %v3538_v1  ;;  %v1178_v21 = vand.u32 2147483647, %v922_v3 }
 0x1d7   : > { %v1695_v26 = vadd.s32 %v3546_v7, %v1438_v9  ;;  %v2716_v30 = vsel %vm1948_vm10, %v1177_v13, 0.0  ;;  %vm1950_vm12 = vcmp.lt.s32.totalorder %v1694_v18, 2560  ;;  %v420_v9 = vld [vmem:[%s3525_s28 + $0x628] sm:$0xff]  ;;  %v677_v18 = vld [vmem:[%s3532_s24 + $0x630] sm:$0xff] }
 0x1d8   : > { %v2962_v33 = vadd.f32 %v2961_v25, %v2707_v20  ;;  %v924_v20 = vsub.f32 %v412_v6, %v668_v8  ;;  %v1440_v25 = vadd.s32 1528, %v3538_v1  ;;  %v1179_v29 = vand.u32 2147483647, %v923_v12 }
 0x1d9   : > { %v1696_v34 = vadd.s32 %v3546_v7, %v1439_v17  ;;  %v2717_v38 = vsel %vm1949_vm11, %v1178_v21, 0.0  ;;  %vm1951_vm13 = vcmp.lt.s32.totalorder %v1695_v26, 2560  ;;  %v421_v17 = vld [vmem:[%s3525_s28 + $0x630] sm:$0xff]  ;;  %v678_v26 = vld [vmem:[%s3532_s24 + $0x638] sm:$0xff] }
 0x1da   : > { %v2963_v41 = vadd.f32 %v2962_v33, %v2708_v28  ;;  %v925_v28 = vsub.f32 %v413_v15, %v669_v16  ;;  %v1441_v33 = vadd.s32 1536, %v3538_v1  ;;  %v1180_v37 = vand.u32 2147483647, %v924_v20 }
 0x1db   : > { %v1697_v42 = vadd.s32 %v3546_v7, %v1440_v25  ;;  %v2718_v46 = vsel %vm1950_vm12, %v1179_v29, 0.0  ;;  %vm1952_vm14 = vcmp.lt.s32.totalorder %v1696_v34, 2560  ;;  %v422_v25 = vld [vmem:[%s3525_s28 + $0x638] sm:$0xff]  ;;  %v679_v34 = vld [vmem:[%s3532_s24 + $0x640] sm:$0xff] }
 0x1dc   : > { %v2964_v49 = vadd.f32 %v2963_v41, %v2709_v36  ;;  %v926_v36 = vsub.f32 %v414_v23, %v670_v24  ;;  %v1442_v41 = vadd.s32 1544, %v3538_v1  ;;  %v1181_v45 = vand.u32 2147483647, %v925_v28 }
 0x1dd   : > { %v1698_v50 = vadd.s32 %v3546_v7, %v1441_v33  ;;  %v2719_v54 = vsel %vm1951_vm13, %v1180_v37, 0.0  ;;  %vm1953_vm15 = vcmp.lt.s32.totalorder %v1697_v42, 2560  ;;  %v423_v33 = vld [vmem:[%s3525_s28 + $0x640] sm:$0xff]  ;;  %v680_v42 = vld [vmem:[%s3532_s24 + $0x648] sm:$0xff] }
 0x1de   : > { %v2965_v57 = vadd.f32 %v2964_v49, %v2710_v44  ;;  %v927_v44 = vsub.f32 %v415_v31, %v671_v32  ;;  %v1443_v49 = vadd.s32 1552, %v3538_v1  ;;  %v1182_v53 = vand.u32 2147483647, %v926_v36 }
 0x1df   : > { %v1699_v58 = vadd.s32 %v3546_v7, %v1442_v41  ;;  %v2720_v62 = vsel %vm1952_vm14, %v1181_v45, 0.0  ;;  %vm1954_vm0 = vcmp.lt.s32.totalorder %v1698_v50, 2560  ;;  %v424_v41 = vld [vmem:[%s3525_s28 + $0x648] sm:$0xff]  ;;  %v681_v50 = vld [vmem:[%s3532_s24 + $0x650] sm:$0xff] }
 0x1e0   : > { %v2966_v2 = vadd.f32 %v2965_v57, %v2711_v52  ;;  %v928_v52 = vsub.f32 %v416_v39, %v672_v40  ;;  %v1444_v57 = vadd.s32 1560, %v3538_v1  ;;  %v1183_v61 = vand.u32 2147483647, %v927_v44 }
 0x1e1   : > { %v1700_v3 = vadd.s32 %v3546_v7, %v1443_v49  ;;  %v2721_v8 = vsel %vm1953_vm15, %v1182_v53, 0.0  ;;  %vm1955_vm1 = vcmp.lt.s32.totalorder %v1699_v58, 2560  ;;  %v425_v49 = vld [vmem:[%s3525_s28 + $0x650] sm:$0xff]  ;;  %v682_v58 = vld [vmem:[%s3532_s24 + $0x658] sm:$0xff] }
 0x1e2   : > { %v2967_v11 = vadd.f32 %v2966_v2, %v2712_v60  ;;  %v929_v60 = vsub.f32 %v417_v47, %v673_v48  ;;  %v1445_v2 = vadd.s32 1568, %v3538_v1  ;;  %v1184_v6 = vand.u32 2147483647, %v928_v52 }
 0x1e3   : > { %v1701_v12 = vadd.s32 %v3546_v7, %v1444_v57  ;;  %v2722_v16 = vsel %vm1954_vm0, %v1183_v61, 0.0  ;;  %vm1956_vm2 = vcmp.lt.s32.totalorder %v1700_v3, 2560  ;;  %v426_v57 = vld [vmem:[%s3525_s28 + $0x658] sm:$0xff]  ;;  %v683_v3 = vld [vmem:[%s3532_s24 + $0x660] sm:$0xff] }
 0x1e4   : > { %v2968_v19 = vadd.f32 %v2967_v11, %v2713_v5  ;;  %v930_v5 = vsub.f32 %v418_v55, %v674_v56  ;;  %v1446_v11 = vadd.s32 1576, %v3538_v1  ;;  %v1185_v15 = vand.u32 2147483647, %v929_v60 }
 0x1e5   : > { %v1702_v20 = vadd.s32 %v3546_v7, %v1445_v2  ;;  %v2723_v24 = vsel %vm1955_vm1, %v1184_v6, 0.0  ;;  %vm1957_vm3 = vcmp.lt.s32.totalorder %v1701_v12, 2560  ;;  %v427_v2 = vld [vmem:[%s3525_s28 + $0x660] sm:$0xff]  ;;  %v684_v12 = vld [vmem:[%s3532_s24 + $0x668] sm:$0xff] }
 0x1e6   : > { %v2969_v27 = vadd.f32 %v2968_v19, %v2714_v14  ;;  %v931_v14 = vsub.f32 %v419_v63, %v675_v0  ;;  %v1447_v19 = vadd.s32 1584, %v3538_v1  ;;  %v1186_v23 = vand.u32 2147483647, %v930_v5 }
 0x1e7   : > { %v1703_v28 = vadd.s32 %v3546_v7, %v1446_v11  ;;  %v2724_v32 = vsel %vm1956_vm2, %v1185_v15, 0.0  ;;  %vm1958_vm4 = vcmp.lt.s32.totalorder %v1702_v20, 2560  ;;  %v428_v11 = vld [vmem:[%s3525_s28 + $0x668] sm:$0xff]  ;;  %v685_v20 = vld [vmem:[%s3532_s24 + $0x670] sm:$0xff] }
 0x1e8   : > { %v2970_v35 = vadd.f32 %v2969_v27, %v2715_v22  ;;  %v932_v22 = vsub.f32 %v420_v9, %v676_v10  ;;  %v1448_v27 = vadd.s32 1592, %v3538_v1  ;;  %v1187_v31 = vand.u32 2147483647, %v931_v14 }
 0x1e9   : > { %v1704_v36 = vadd.s32 %v3546_v7, %v1447_v19  ;;  %v2725_v40 = vsel %vm1957_vm3, %v1186_v23, 0.0  ;;  %vm1959_vm5 = vcmp.lt.s32.totalorder %v1703_v28, 2560  ;;  %v429_v19 = vld [vmem:[%s3525_s28 + $0x670] sm:$0xff]  ;;  %v686_v28 = vld [vmem:[%s3532_s24 + $0x678] sm:$0xff] }
 0x1ea   : > { %v2971_v43 = vadd.f32 %v2970_v35, %v2716_v30  ;;  %v933_v30 = vsub.f32 %v421_v17, %v677_v18  ;;  %v1449_v35 = vadd.s32 1600, %v3538_v1  ;;  %v1188_v39 = vand.u32 2147483647, %v932_v22 }
 0x1eb   : > { %v1705_v44 = vadd.s32 %v3546_v7, %v1448_v27  ;;  %v2726_v48 = vsel %vm1958_vm4, %v1187_v31, 0.0  ;;  %vm1960_vm6 = vcmp.lt.s32.totalorder %v1704_v36, 2560  ;;  %v430_v27 = vld [vmem:[%s3525_s28 + $0x678] sm:$0xff]  ;;  %v687_v36 = vld [vmem:[%s3532_s24 + $0x680] sm:$0xff] }
 0x1ec   : > { %v2972_v51 = vadd.f32 %v2971_v43, %v2717_v38  ;;  %v934_v38 = vsub.f32 %v422_v25, %v678_v26  ;;  %v1450_v43 = vadd.s32 1608, %v3538_v1  ;;  %v1189_v47 = vand.u32 2147483647, %v933_v30 }
 0x1ed   : > { %v1706_v52 = vadd.s32 %v3546_v7, %v1449_v35  ;;  %v2727_v56 = vsel %vm1959_vm5, %v1188_v39, 0.0  ;;  %vm1961_vm7 = vcmp.lt.s32.totalorder %v1705_v44, 2560  ;;  %v431_v35 = vld [vmem:[%s3525_s28 + $0x680] sm:$0xff]  ;;  %v688_v44 = vld [vmem:[%s3532_s24 + $0x688] sm:$0xff] }
 0x1ee   : > { %v2973_v59 = vadd.f32 %v2972_v51, %v2718_v46  ;;  %v935_v46 = vsub.f32 %v423_v33, %v679_v34  ;;  %v1451_v51 = vadd.s32 1616, %v3538_v1  ;;  %v1190_v55 = vand.u32 2147483647, %v934_v38 }
 0x1ef   : > { %v1707_v60 = vadd.s32 %v3546_v7, %v1450_v43  ;;  %v2728_v0 = vsel %vm1960_vm6, %v1189_v47, 0.0  ;;  %vm1962_vm8 = vcmp.lt.s32.totalorder %v1706_v52, 2560  ;;  %v432_v43 = vld [vmem:[%s3525_s28 + $0x688] sm:$0xff]  ;;  %v689_v52 = vld [vmem:[%s3532_s24 + $0x690] sm:$0xff] }
 0x1f0   : > { %v2974_v4 = vadd.f32 %v2973_v59, %v2719_v54  ;;  %v936_v54 = vsub.f32 %v424_v41, %v680_v42  ;;  %v1452_v59 = vadd.s32 1624, %v3538_v1  ;;  %v1191_v63 = vand.u32 2147483647, %v935_v46 }
 0x1f1   : > { %v1708_v5 = vadd.s32 %v3546_v7, %v1451_v51  ;;  %v2729_v10 = vsel %vm1961_vm7, %v1190_v55, 0.0  ;;  %vm1963_vm9 = vcmp.lt.s32.totalorder %v1707_v60, 2560  ;;  %v433_v51 = vld [vmem:[%s3525_s28 + $0x690] sm:$0xff]  ;;  %v690_v60 = vld [vmem:[%s3532_s24 + $0x698] sm:$0xff] }
 0x1f2   : > { %v2975_v13 = vadd.f32 %v2974_v4, %v2720_v62  ;;  %v937_v62 = vsub.f32 %v425_v49, %v681_v50  ;;  %v1453_v4 = vadd.s32 1632, %v3538_v1  ;;  %v1192_v9 = vand.u32 2147483647, %v936_v54 }
 0x1f3   : > { %v1709_v14 = vadd.s32 %v3546_v7, %v1452_v59  ;;  %v2730_v18 = vsel %vm1962_vm8, %v1191_v63, 0.0  ;;  %vm1964_vm10 = vcmp.lt.s32.totalorder %v1708_v5, 2560  ;;  %v434_v59 = vld [vmem:[%s3525_s28 + $0x698] sm:$0xff]  ;;  %v691_v5 = vld [vmem:[%s3532_s24 + $0x6a0] sm:$0xff] }
 0x1f4   : > { %v2976_v21 = vadd.f32 %v2975_v13, %v2721_v8  ;;  %v938_v8 = vsub.f32 %v426_v57, %v682_v58  ;;  %v1454_v13 = vadd.s32 1640, %v3538_v1  ;;  %v1193_v17 = vand.u32 2147483647, %v937_v62 }
 0x1f5   : > { %v1710_v22 = vadd.s32 %v3546_v7, %v1453_v4  ;;  %v2731_v26 = vsel %vm1963_vm9, %v1192_v9, 0.0  ;;  %vm1965_vm11 = vcmp.lt.s32.totalorder %v1709_v14, 2560  ;;  %v435_v4 = vld [vmem:[%s3525_s28 + $0x6a0] sm:$0xff]  ;;  %v692_v14 = vld [vmem:[%s3532_s24 + $0x6a8] sm:$0xff] }
 0x1f6   : > { %v2977_v29 = vadd.f32 %v2976_v21, %v2722_v16  ;;  %v939_v16 = vsub.f32 %v427_v2, %v683_v3  ;;  %v1455_v21 = vadd.s32 1648, %v3538_v1  ;;  %v1194_v25 = vand.u32 2147483647, %v938_v8 }
 0x1f7   : > { %v1711_v30 = vadd.s32 %v3546_v7, %v1454_v13  ;;  %v2732_v34 = vsel %vm1964_vm10, %v1193_v17, 0.0  ;;  %vm1966_vm12 = vcmp.lt.s32.totalorder %v1710_v22, 2560  ;;  %v436_v13 = vld [vmem:[%s3525_s28 + $0x6a8] sm:$0xff]  ;;  %v693_v22 = vld [vmem:[%s3532_s24 + $0x6b0] sm:$0xff] }
 0x1f8   : > { %v2978_v37 = vadd.f32 %v2977_v29, %v2723_v24  ;;  %v940_v24 = vsub.f32 %v428_v11, %v684_v12  ;;  %v1456_v29 = vadd.s32 1656, %v3538_v1  ;;  %v1195_v33 = vand.u32 2147483647, %v939_v16 }
 0x1f9   : > { %v1712_v38 = vadd.s32 %v3546_v7, %v1455_v21  ;;  %v2733_v42 = vsel %vm1965_vm11, %v1194_v25, 0.0  ;;  %vm1967_vm13 = vcmp.lt.s32.totalorder %v1711_v30, 2560  ;;  %v437_v21 = vld [vmem:[%s3525_s28 + $0x6b0] sm:$0xff]  ;;  %v694_v30 = vld [vmem:[%s3532_s24 + $0x6b8] sm:$0xff] }
 0x1fa   : > { %v2979_v45 = vadd.f32 %v2978_v37, %v2724_v32  ;;  %v941_v32 = vsub.f32 %v429_v19, %v685_v20  ;;  %v1457_v37 = vadd.s32 1664, %v3538_v1  ;;  %v1196_v41 = vand.u32 2147483647, %v940_v24 }
 0x1fb   : > { %v1713_v46 = vadd.s32 %v3546_v7, %v1456_v29  ;;  %v2734_v50 = vsel %vm1966_vm12, %v1195_v33, 0.0  ;;  %vm1968_vm14 = vcmp.lt.s32.totalorder %v1712_v38, 2560  ;;  %v438_v29 = vld [vmem:[%s3525_s28 + $0x6b8] sm:$0xff]  ;;  %v695_v38 = vld [vmem:[%s3532_s24 + $0x6c0] sm:$0xff] }
 0x1fc   : > { %v2980_v53 = vadd.f32 %v2979_v45, %v2725_v40  ;;  %v942_v40 = vsub.f32 %v430_v27, %v686_v28  ;;  %v1458_v45 = vadd.s32 1672, %v3538_v1  ;;  %v1197_v49 = vand.u32 2147483647, %v941_v32 }
 0x1fd   : > { %v1714_v54 = vadd.s32 %v3546_v7, %v1457_v37  ;;  %v2735_v58 = vsel %vm1967_vm13, %v1196_v41, 0.0  ;;  %vm1969_vm15 = vcmp.lt.s32.totalorder %v1713_v46, 2560  ;;  %v439_v37 = vld [vmem:[%s3525_s28 + $0x6c0] sm:$0xff]  ;;  %v696_v46 = vld [vmem:[%s3532_s24 + $0x6c8] sm:$0xff] }
 0x1fe   : > { %v2981_v61 = vadd.f32 %v2980_v53, %v2726_v48  ;;  %v943_v48 = vsub.f32 %v431_v35, %v687_v36  ;;  %v1459_v53 = vadd.s32 1680, %v3538_v1  ;;  %v1198_v57 = vand.u32 2147483647, %v942_v40 }
 0x1ff   : > { %v1715_v62 = vadd.s32 %v3546_v7, %v1458_v45  ;;  %v2736_v3 = vsel %vm1968_vm14, %v1197_v49, 0.0  ;;  %vm1970_vm0 = vcmp.lt.s32.totalorder %v1714_v54, 2560  ;;  %v440_v45 = vld [vmem:[%s3525_s28 + $0x6c8] sm:$0xff]  ;;  %v697_v54 = vld [vmem:[%s3532_s24 + $0x6d0] sm:$0xff] }
 0x200   : > { %v2982_v6 = vadd.f32 %v2981_v61, %v2727_v56  ;;  %v944_v56 = vsub.f32 %v432_v43, %v688_v44  ;;  %v1460_v61 = vadd.s32 1688, %v3538_v1  ;;  %v1199_v2 = vand.u32 2147483647, %v943_v48 }
 0x201   : > { %v1716_v8 = vadd.s32 %v3546_v7, %v1459_v53  ;;  %v2737_v12 = vsel %vm1969_vm15, %v1198_v57, 0.0  ;;  %vm1971_vm1 = vcmp.lt.s32.totalorder %v1715_v62, 2560  ;;  %v441_v53 = vld [vmem:[%s3525_s28 + $0x6d0] sm:$0xff]  ;;  %v698_v62 = vld [vmem:[%s3532_s24 + $0x6d8] sm:$0xff] }
 0x202   : > { %v2983_v15 = vadd.f32 %v2982_v6, %v2728_v0  ;;  %v945_v0 = vsub.f32 %v433_v51, %v689_v52  ;;  %v1461_v6 = vadd.s32 1696, %v3538_v1  ;;  %v1200_v11 = vand.u32 2147483647, %v944_v56 }
 0x203   : > { %v1717_v16 = vadd.s32 %v3546_v7, %v1460_v61  ;;  %v2738_v20 = vsel %vm1970_vm0, %v1199_v2, 0.0  ;;  %vm1972_vm2 = vcmp.lt.s32.totalorder %v1716_v8, 2560  ;;  %v442_v61 = vld [vmem:[%s3525_s28 + $0x6d8] sm:$0xff]  ;;  %v699_v8 = vld [vmem:[%s3532_s24 + $0x6e0] sm:$0xff] }
 0x204   : > { %v2984_v23 = vadd.f32 %v2983_v15, %v2729_v10  ;;  %v946_v10 = vsub.f32 %v434_v59, %v690_v60  ;;  %v1462_v15 = vadd.s32 1704, %v3538_v1  ;;  %v1201_v19 = vand.u32 2147483647, %v945_v0 }
 0x205   : > { %v1718_v24 = vadd.s32 %v3546_v7, %v1461_v6  ;;  %v2739_v28 = vsel %vm1971_vm1, %v1200_v11, 0.0  ;;  %vm1973_vm3 = vcmp.lt.s32.totalorder %v1717_v16, 2560  ;;  %v443_v6 = vld [vmem:[%s3525_s28 + $0x6e0] sm:$0xff]  ;;  %v700_v16 = vld [vmem:[%s3532_s24 + $0x6e8] sm:$0xff] }
 0x206   : > { %v2985_v31 = vadd.f32 %v2984_v23, %v2730_v18  ;;  %v947_v18 = vsub.f32 %v435_v4, %v691_v5  ;;  %v1463_v23 = vadd.s32 1712, %v3538_v1  ;;  %v1202_v27 = vand.u32 2147483647, %v946_v10 }
 0x207   : > { %v1719_v32 = vadd.s32 %v3546_v7, %v1462_v15  ;;  %v2740_v36 = vsel %vm1972_vm2, %v1201_v19, 0.0  ;;  %vm1974_vm4 = vcmp.lt.s32.totalorder %v1718_v24, 2560  ;;  %v444_v15 = vld [vmem:[%s3525_s28 + $0x6e8] sm:$0xff]  ;;  %v701_v24 = vld [vmem:[%s3532_s24 + $0x6f0] sm:$0xff] }
 0x208   : > { %v2986_v39 = vadd.f32 %v2985_v31, %v2731_v26  ;;  %v948_v26 = vsub.f32 %v436_v13, %v692_v14  ;;  %v1464_v31 = vadd.s32 1720, %v3538_v1  ;;  %v1203_v35 = vand.u32 2147483647, %v947_v18 }
 0x209   : > { %v1720_v40 = vadd.s32 %v3546_v7, %v1463_v23  ;;  %v2741_v44 = vsel %vm1973_vm3, %v1202_v27, 0.0  ;;  %vm1975_vm5 = vcmp.lt.s32.totalorder %v1719_v32, 2560  ;;  %v445_v23 = vld [vmem:[%s3525_s28 + $0x6f0] sm:$0xff]  ;;  %v702_v32 = vld [vmem:[%s3532_s24 + $0x6f8] sm:$0xff] }
 0x20a   : > { %v2987_v47 = vadd.f32 %v2986_v39, %v2732_v34  ;;  %v949_v34 = vsub.f32 %v437_v21, %v693_v22  ;;  %v1465_v39 = vadd.s32 1728, %v3538_v1  ;;  %v1204_v43 = vand.u32 2147483647, %v948_v26 }
 0x20b   : > { %v1721_v48 = vadd.s32 %v3546_v7, %v1464_v31  ;;  %v2742_v52 = vsel %vm1974_vm4, %v1203_v35, 0.0  ;;  %vm1976_vm6 = vcmp.lt.s32.totalorder %v1720_v40, 2560  ;;  %v446_v31 = vld [vmem:[%s3525_s28 + $0x6f8] sm:$0xff]  ;;  %v703_v40 = vld [vmem:[%s3532_s24 + $0x700] sm:$0xff] }
 0x20c   : > { %v2988_v55 = vadd.f32 %v2987_v47, %v2733_v42  ;;  %v950_v42 = vsub.f32 %v438_v29, %v694_v30  ;;  %v1466_v47 = vadd.s32 1736, %v3538_v1  ;;  %v1205_v51 = vand.u32 2147483647, %v949_v34 }
 0x20d   : > { %v1722_v56 = vadd.s32 %v3546_v7, %v1465_v39  ;;  %v2743_v60 = vsel %vm1975_vm5, %v1204_v43, 0.0  ;;  %vm1977_vm7 = vcmp.lt.s32.totalorder %v1721_v48, 2560  ;;  %v447_v39 = vld [vmem:[%s3525_s28 + $0x700] sm:$0xff]  ;;  %v704_v48 = vld [vmem:[%s3532_s24 + $0x708] sm:$0xff] }
 0x20e   : > { %v2989_v63 = vadd.f32 %v2988_v55, %v2734_v50  ;;  %v951_v50 = vsub.f32 %v439_v37, %v695_v38  ;;  %v1467_v55 = vadd.s32 1744, %v3538_v1  ;;  %v1206_v59 = vand.u32 2147483647, %v950_v42 }
 0x20f   : > { %v1723_v0 = vadd.s32 %v3546_v7, %v1466_v47  ;;  %v2744_v5 = vsel %vm1976_vm6, %v1205_v51, 0.0  ;;  %vm1978_vm8 = vcmp.lt.s32.totalorder %v1722_v56, 2560  ;;  %v448_v47 = vld [vmem:[%s3525_s28 + $0x708] sm:$0xff]  ;;  %v705_v56 = vld [vmem:[%s3532_s24 + $0x710] sm:$0xff] }
 0x210   : > { %v2990_v9 = vadd.f32 %v2989_v63, %v2735_v58  ;;  %v952_v58 = vsub.f32 %v440_v45, %v696_v46  ;;  %v1468_v63 = vadd.s32 1752, %v3538_v1  ;;  %v1207_v4 = vand.u32 2147483647, %v951_v50 }
 0x211   : > { %v1724_v10 = vadd.s32 %v3546_v7, %v1467_v55  ;;  %v2745_v14 = vsel %vm1977_vm7, %v1206_v59, 0.0  ;;  %vm1979_vm9 = vcmp.lt.s32.totalorder %v1723_v0, 2560  ;;  %v449_v55 = vld [vmem:[%s3525_s28 + $0x710] sm:$0xff]  ;;  %v706_v0 = vld [vmem:[%s3532_s24 + $0x718] sm:$0xff] }
 0x212   : > { %v2991_v17 = vadd.f32 %v2990_v9, %v2736_v3  ;;  %v953_v3 = vsub.f32 %v441_v53, %v697_v54  ;;  %v1469_v9 = vadd.s32 1760, %v3538_v1  ;;  %v1208_v13 = vand.u32 2147483647, %v952_v58 }
 0x213   : > { %v1725_v18 = vadd.s32 %v3546_v7, %v1468_v63  ;;  %v2746_v22 = vsel %vm1978_vm8, %v1207_v4, 0.0  ;;  %vm1980_vm10 = vcmp.lt.s32.totalorder %v1724_v10, 2560  ;;  %v450_v63 = vld [vmem:[%s3525_s28 + $0x718] sm:$0xff]  ;;  %v707_v10 = vld [vmem:[%s3532_s24 + $0x720] sm:$0xff] }
 0x214   : > { %v2992_v25 = vadd.f32 %v2991_v17, %v2737_v12  ;;  %v954_v12 = vsub.f32 %v442_v61, %v698_v62  ;;  %v1470_v17 = vadd.s32 1768, %v3538_v1  ;;  %v1209_v21 = vand.u32 2147483647, %v953_v3 }
 0x215   : > { %v1726_v26 = vadd.s32 %v3546_v7, %v1469_v9  ;;  %v2747_v30 = vsel %vm1979_vm9, %v1208_v13, 0.0  ;;  %vm1981_vm11 = vcmp.lt.s32.totalorder %v1725_v18, 2560  ;;  %v451_v9 = vld [vmem:[%s3525_s28 + $0x720] sm:$0xff]  ;;  %v708_v18 = vld [vmem:[%s3532_s24 + $0x728] sm:$0xff] }
 0x216   : > { %v2993_v33 = vadd.f32 %v2992_v25, %v2738_v20  ;;  %v955_v20 = vsub.f32 %v443_v6, %v699_v8  ;;  %v1471_v25 = vadd.s32 1776, %v3538_v1  ;;  %v1210_v29 = vand.u32 2147483647, %v954_v12 }
 0x217   : > { %v1727_v34 = vadd.s32 %v3546_v7, %v1470_v17  ;;  %v2748_v38 = vsel %vm1980_vm10, %v1209_v21, 0.0  ;;  %vm1982_vm12 = vcmp.lt.s32.totalorder %v1726_v26, 2560  ;;  %v452_v17 = vld [vmem:[%s3525_s28 + $0x728] sm:$0xff]  ;;  %v709_v26 = vld [vmem:[%s3532_s24 + $0x730] sm:$0xff] }
 0x218   : > { %v2994_v41 = vadd.f32 %v2993_v33, %v2739_v28  ;;  %v956_v28 = vsub.f32 %v444_v15, %v700_v16  ;;  %v1472_v33 = vadd.s32 1784, %v3538_v1  ;;  %v1211_v37 = vand.u32 2147483647, %v955_v20 }
 0x219   : > { %v1728_v42 = vadd.s32 %v3546_v7, %v1471_v25  ;;  %v2749_v46 = vsel %vm1981_vm11, %v1210_v29, 0.0  ;;  %vm1983_vm13 = vcmp.lt.s32.totalorder %v1727_v34, 2560  ;;  %v453_v25 = vld [vmem:[%s3525_s28 + $0x730] sm:$0xff]  ;;  %v710_v34 = vld [vmem:[%s3532_s24 + $0x738] sm:$0xff] }
 0x21a   : > { %v2995_v49 = vadd.f32 %v2994_v41, %v2740_v36  ;;  %v957_v36 = vsub.f32 %v445_v23, %v701_v24  ;;  %v1473_v41 = vadd.s32 1792, %v3538_v1  ;;  %v1212_v45 = vand.u32 2147483647, %v956_v28 }
 0x21b   : > { %v1729_v50 = vadd.s32 %v3546_v7, %v1472_v33  ;;  %v2750_v54 = vsel %vm1982_vm12, %v1211_v37, 0.0  ;;  %vm1984_vm14 = vcmp.lt.s32.totalorder %v1728_v42, 2560  ;;  %v454_v33 = vld [vmem:[%s3525_s28 + $0x738] sm:$0xff]  ;;  %v711_v42 = vld [vmem:[%s3532_s24 + $0x740] sm:$0xff] }
 0x21c   : > { %v2996_v57 = vadd.f32 %v2995_v49, %v2741_v44  ;;  %v958_v44 = vsub.f32 %v446_v31, %v702_v32  ;;  %v1474_v49 = vadd.s32 1800, %v3538_v1  ;;  %v1213_v53 = vand.u32 2147483647, %v957_v36 }
 0x21d   : > { %v1730_v58 = vadd.s32 %v3546_v7, %v1473_v41  ;;  %v2751_v62 = vsel %vm1983_vm13, %v1212_v45, 0.0  ;;  %vm1985_vm15 = vcmp.lt.s32.totalorder %v1729_v50, 2560  ;;  %v455_v41 = vld [vmem:[%s3525_s28 + $0x740] sm:$0xff]  ;;  %v712_v50 = vld [vmem:[%s3532_s24 + $0x748] sm:$0xff] }
 0x21e   : > { %v2997_v2 = vadd.f32 %v2996_v57, %v2742_v52  ;;  %v959_v52 = vsub.f32 %v447_v39, %v703_v40  ;;  %v1475_v57 = vadd.s32 1808, %v3538_v1  ;;  %v1214_v61 = vand.u32 2147483647, %v958_v44 }
 0x21f   : > { %v1731_v3 = vadd.s32 %v3546_v7, %v1474_v49  ;;  %v2752_v8 = vsel %vm1984_vm14, %v1213_v53, 0.0  ;;  %vm1986_vm0 = vcmp.lt.s32.totalorder %v1730_v58, 2560  ;;  %v456_v49 = vld [vmem:[%s3525_s28 + $0x748] sm:$0xff]  ;;  %v713_v58 = vld [vmem:[%s3532_s24 + $0x750] sm:$0xff] }
 0x220   : > { %v2998_v11 = vadd.f32 %v2997_v2, %v2743_v60  ;;  %v960_v60 = vsub.f32 %v448_v47, %v704_v48  ;;  %v1476_v2 = vadd.s32 1816, %v3538_v1  ;;  %v1215_v6 = vand.u32 2147483647, %v959_v52 }
 0x221   : > { %v1732_v12 = vadd.s32 %v3546_v7, %v1475_v57  ;;  %v2753_v16 = vsel %vm1985_vm15, %v1214_v61, 0.0  ;;  %vm1987_vm1 = vcmp.lt.s32.totalorder %v1731_v3, 2560  ;;  %v457_v57 = vld [vmem:[%s3525_s28 + $0x750] sm:$0xff]  ;;  %v714_v3 = vld [vmem:[%s3532_s24 + $0x758] sm:$0xff] }
 0x222   : > { %v2999_v19 = vadd.f32 %v2998_v11, %v2744_v5  ;;  %v961_v5 = vsub.f32 %v449_v55, %v705_v56  ;;  %v1477_v11 = vadd.s32 1824, %v3538_v1  ;;  %v1216_v15 = vand.u32 2147483647, %v960_v60 }
 0x223   : > { %v1733_v20 = vadd.s32 %v3546_v7, %v1476_v2  ;;  %v2754_v24 = vsel %vm1986_vm0, %v1215_v6, 0.0  ;;  %vm1988_vm2 = vcmp.lt.s32.totalorder %v1732_v12, 2560  ;;  %v458_v2 = vld [vmem:[%s3525_s28 + $0x758] sm:$0xff]  ;;  %v715_v12 = vld [vmem:[%s3532_s24 + $0x760] sm:$0xff] }
 0x224   : > { %v3000_v27 = vadd.f32 %v2999_v19, %v2745_v14  ;;  %v962_v14 = vsub.f32 %v450_v63, %v706_v0  ;;  %v1478_v19 = vadd.s32 1832, %v3538_v1  ;;  %v1217_v23 = vand.u32 2147483647, %v961_v5 }
 0x225   : > { %v1734_v28 = vadd.s32 %v3546_v7, %v1477_v11  ;;  %v2755_v32 = vsel %vm1987_vm1, %v1216_v15, 0.0  ;;  %vm1989_vm3 = vcmp.lt.s32.totalorder %v1733_v20, 2560  ;;  %v459_v11 = vld [vmem:[%s3525_s28 + $0x760] sm:$0xff]  ;;  %v716_v20 = vld [vmem:[%s3532_s24 + $0x768] sm:$0xff] }
 0x226   : > { %v3001_v35 = vadd.f32 %v3000_v27, %v2746_v22  ;;  %v963_v22 = vsub.f32 %v451_v9, %v707_v10  ;;  %v1479_v27 = vadd.s32 1840, %v3538_v1  ;;  %v1218_v31 = vand.u32 2147483647, %v962_v14 }
 0x227   : > { %v1735_v36 = vadd.s32 %v3546_v7, %v1478_v19  ;;  %v2756_v40 = vsel %vm1988_vm2, %v1217_v23, 0.0  ;;  %vm1990_vm4 = vcmp.lt.s32.totalorder %v1734_v28, 2560  ;;  %v460_v19 = vld [vmem:[%s3525_s28 + $0x768] sm:$0xff]  ;;  %v717_v28 = vld [vmem:[%s3532_s24 + $0x770] sm:$0xff] }
 0x228   : > { %v3002_v43 = vadd.f32 %v3001_v35, %v2747_v30  ;;  %v964_v30 = vsub.f32 %v452_v17, %v708_v18  ;;  %v1480_v35 = vadd.s32 1848, %v3538_v1  ;;  %v1219_v39 = vand.u32 2147483647, %v963_v22 }
 0x229   : > { %v1736_v44 = vadd.s32 %v3546_v7, %v1479_v27  ;;  %v2757_v48 = vsel %vm1989_vm3, %v1218_v31, 0.0  ;;  %vm1991_vm5 = vcmp.lt.s32.totalorder %v1735_v36, 2560  ;;  %v461_v27 = vld [vmem:[%s3525_s28 + $0x770] sm:$0xff]  ;;  %v718_v36 = vld [vmem:[%s3532_s24 + $0x778] sm:$0xff] }
 0x22a   : > { %v3003_v51 = vadd.f32 %v3002_v43, %v2748_v38  ;;  %v965_v38 = vsub.f32 %v453_v25, %v709_v26  ;;  %v1481_v43 = vadd.s32 1856, %v3538_v1  ;;  %v1220_v47 = vand.u32 2147483647, %v964_v30 }
 0x22b   : > { %v1737_v52 = vadd.s32 %v3546_v7, %v1480_v35  ;;  %v2758_v56 = vsel %vm1990_vm4, %v1219_v39, 0.0  ;;  %vm1992_vm6 = vcmp.lt.s32.totalorder %v1736_v44, 2560  ;;  %v462_v35 = vld [vmem:[%s3525_s28 + $0x778] sm:$0xff]  ;;  %v719_v44 = vld [vmem:[%s3532_s24 + $0x780] sm:$0xff] }
 0x22c   : > { %v3004_v59 = vadd.f32 %v3003_v51, %v2749_v46  ;;  %v966_v46 = vsub.f32 %v454_v33, %v710_v34  ;;  %v1482_v51 = vadd.s32 1864, %v3538_v1  ;;  %v1221_v55 = vand.u32 2147483647, %v965_v38 }
 0x22d   : > { %v1738_v60 = vadd.s32 %v3546_v7, %v1481_v43  ;;  %v2759_v0 = vsel %vm1991_vm5, %v1220_v47, 0.0  ;;  %vm1993_vm7 = vcmp.lt.s32.totalorder %v1737_v52, 2560  ;;  %v463_v43 = vld [vmem:[%s3525_s28 + $0x780] sm:$0xff]  ;;  %v720_v52 = vld [vmem:[%s3532_s24 + $0x788] sm:$0xff] }
 0x22e   : > { %v3005_v4 = vadd.f32 %v3004_v59, %v2750_v54  ;;  %v967_v54 = vsub.f32 %v455_v41, %v711_v42  ;;  %v1483_v59 = vadd.s32 1872, %v3538_v1  ;;  %v1222_v63 = vand.u32 2147483647, %v966_v46 }
 0x22f   : > { %v1739_v5 = vadd.s32 %v3546_v7, %v1482_v51  ;;  %v2760_v10 = vsel %vm1992_vm6, %v1221_v55, 0.0  ;;  %vm1994_vm8 = vcmp.lt.s32.totalorder %v1738_v60, 2560  ;;  %v464_v51 = vld [vmem:[%s3525_s28 + $0x788] sm:$0xff]  ;;  %v721_v60 = vld [vmem:[%s3532_s24 + $0x790] sm:$0xff] }
 0x230   : > { %v3006_v13 = vadd.f32 %v3005_v4, %v2751_v62  ;;  %v968_v62 = vsub.f32 %v456_v49, %v712_v50  ;;  %v1484_v4 = vadd.s32 1880, %v3538_v1  ;;  %v1223_v9 = vand.u32 2147483647, %v967_v54 }
 0x231   : > { %v1740_v14 = vadd.s32 %v3546_v7, %v1483_v59  ;;  %v2761_v18 = vsel %vm1993_vm7, %v1222_v63, 0.0  ;;  %vm1995_vm9 = vcmp.lt.s32.totalorder %v1739_v5, 2560  ;;  %v465_v59 = vld [vmem:[%s3525_s28 + $0x790] sm:$0xff]  ;;  %v722_v5 = vld [vmem:[%s3532_s24 + $0x798] sm:$0xff] }
 0x232   : > { %v3007_v21 = vadd.f32 %v3006_v13, %v2752_v8  ;;  %v969_v8 = vsub.f32 %v457_v57, %v713_v58  ;;  %v1485_v13 = vadd.s32 1888, %v3538_v1  ;;  %v1224_v17 = vand.u32 2147483647, %v968_v62 }
 0x233   : > { %v1741_v22 = vadd.s32 %v3546_v7, %v1484_v4  ;;  %v2762_v26 = vsel %vm1994_vm8, %v1223_v9, 0.0  ;;  %vm1996_vm10 = vcmp.lt.s32.totalorder %v1740_v14, 2560  ;;  %v466_v4 = vld [vmem:[%s3525_s28 + $0x798] sm:$0xff]  ;;  %v723_v14 = vld [vmem:[%s3532_s24 + $0x7a0] sm:$0xff] }
 0x234   : > { %v3008_v29 = vadd.f32 %v3007_v21, %v2753_v16  ;;  %v970_v16 = vsub.f32 %v458_v2, %v714_v3  ;;  %v1486_v21 = vadd.s32 1896, %v3538_v1  ;;  %v1225_v25 = vand.u32 2147483647, %v969_v8 }
 0x235   : > { %v1742_v30 = vadd.s32 %v3546_v7, %v1485_v13  ;;  %v2763_v34 = vsel %vm1995_vm9, %v1224_v17, 0.0  ;;  %vm1997_vm11 = vcmp.lt.s32.totalorder %v1741_v22, 2560  ;;  %v467_v13 = vld [vmem:[%s3525_s28 + $0x7a0] sm:$0xff]  ;;  %v724_v22 = vld [vmem:[%s3532_s24 + $0x7a8] sm:$0xff] }
 0x236   : > { %v3009_v37 = vadd.f32 %v3008_v29, %v2754_v24  ;;  %v971_v24 = vsub.f32 %v459_v11, %v715_v12  ;;  %v1487_v29 = vadd.s32 1904, %v3538_v1  ;;  %v1226_v33 = vand.u32 2147483647, %v970_v16 }
 0x237   : > { %v1743_v38 = vadd.s32 %v3546_v7, %v1486_v21  ;;  %v2764_v42 = vsel %vm1996_vm10, %v1225_v25, 0.0  ;;  %vm1998_vm12 = vcmp.lt.s32.totalorder %v1742_v30, 2560  ;;  %v468_v21 = vld [vmem:[%s3525_s28 + $0x7a8] sm:$0xff]  ;;  %v725_v30 = vld [vmem:[%s3532_s24 + $0x7b0] sm:$0xff] }
 0x238   : > { %v3010_v45 = vadd.f32 %v3009_v37, %v2755_v32  ;;  %v972_v32 = vsub.f32 %v460_v19, %v716_v20  ;;  %v1488_v37 = vadd.s32 1912, %v3538_v1  ;;  %v1227_v41 = vand.u32 2147483647, %v971_v24 }
 0x239   : > { %v1744_v46 = vadd.s32 %v3546_v7, %v1487_v29  ;;  %v2765_v50 = vsel %vm1997_vm11, %v1226_v33, 0.0  ;;  %vm1999_vm13 = vcmp.lt.s32.totalorder %v1743_v38, 2560  ;;  %v469_v29 = vld [vmem:[%s3525_s28 + $0x7b0] sm:$0xff]  ;;  %v726_v38 = vld [vmem:[%s3532_s24 + $0x7b8] sm:$0xff] }
 0x23a   : > { %v3011_v53 = vadd.f32 %v3010_v45, %v2756_v40  ;;  %v973_v40 = vsub.f32 %v461_v27, %v717_v28  ;;  %v1489_v45 = vadd.s32 1920, %v3538_v1  ;;  %v1228_v49 = vand.u32 2147483647, %v972_v32 }
 0x23b   : > { %v1745_v54 = vadd.s32 %v3546_v7, %v1488_v37  ;;  %v2766_v58 = vsel %vm1998_vm12, %v1227_v41, 0.0  ;;  %vm2000_vm14 = vcmp.lt.s32.totalorder %v1744_v46, 2560  ;;  %v470_v37 = vld [vmem:[%s3525_s28 + $0x7b8] sm:$0xff]  ;;  %v727_v46 = vld [vmem:[%s3532_s24 + $0x7c0] sm:$0xff] }
 0x23c   : > { %v3012_v61 = vadd.f32 %v3011_v53, %v2757_v48  ;;  %v974_v48 = vsub.f32 %v462_v35, %v718_v36  ;;  %v1490_v53 = vadd.s32 1928, %v3538_v1  ;;  %v1229_v57 = vand.u32 2147483647, %v973_v40 }
 0x23d   : > { %v1746_v62 = vadd.s32 %v3546_v7, %v1489_v45  ;;  %v2767_v3 = vsel %vm1999_vm13, %v1228_v49, 0.0  ;;  %vm2001_vm15 = vcmp.lt.s32.totalorder %v1745_v54, 2560  ;;  %v471_v45 = vld [vmem:[%s3525_s28 + $0x7c0] sm:$0xff]  ;;  %v728_v54 = vld [vmem:[%s3532_s24 + $0x7c8] sm:$0xff] }
 0x23e   : > { %v3013_v6 = vadd.f32 %v3012_v61, %v2758_v56  ;;  %v975_v56 = vsub.f32 %v463_v43, %v719_v44  ;;  %v1491_v61 = vadd.s32 1936, %v3538_v1  ;;  %v1230_v2 = vand.u32 2147483647, %v974_v48 }
 0x23f   : > { %v1747_v8 = vadd.s32 %v3546_v7, %v1490_v53  ;;  %v2768_v12 = vsel %vm2000_vm14, %v1229_v57, 0.0  ;;  %vm2002_vm0 = vcmp.lt.s32.totalorder %v1746_v62, 2560  ;;  %v472_v53 = vld [vmem:[%s3525_s28 + $0x7c8] sm:$0xff]  ;;  %v729_v62 = vld [vmem:[%s3532_s24 + $0x7d0] sm:$0xff] }
 0x240   : > { %v3014_v15 = vadd.f32 %v3013_v6, %v2759_v0  ;;  %v976_v0 = vsub.f32 %v464_v51, %v720_v52  ;;  %v1492_v6 = vadd.s32 1944, %v3538_v1  ;;  %v1231_v11 = vand.u32 2147483647, %v975_v56 }
 0x241   : > { %v1748_v16 = vadd.s32 %v3546_v7, %v1491_v61  ;;  %v2769_v20 = vsel %vm2001_vm15, %v1230_v2, 0.0  ;;  %vm2003_vm1 = vcmp.lt.s32.totalorder %v1747_v8, 2560  ;;  %v473_v61 = vld [vmem:[%s3525_s28 + $0x7d0] sm:$0xff]  ;;  %v730_v8 = vld [vmem:[%s3532_s24 + $0x7d8] sm:$0xff] }
 0x242   : > { %v3015_v23 = vadd.f32 %v3014_v15, %v2760_v10  ;;  %v977_v10 = vsub.f32 %v465_v59, %v721_v60  ;;  %v1493_v15 = vadd.s32 1952, %v3538_v1  ;;  %v1232_v19 = vand.u32 2147483647, %v976_v0 }
 0x243   : > { %v1749_v24 = vadd.s32 %v3546_v7, %v1492_v6  ;;  %v2770_v28 = vsel %vm2002_vm0, %v1231_v11, 0.0  ;;  %vm2004_vm2 = vcmp.lt.s32.totalorder %v1748_v16, 2560  ;;  %v474_v6 = vld [vmem:[%s3525_s28 + $0x7d8] sm:$0xff]  ;;  %v731_v16 = vld [vmem:[%s3532_s24 + $0x7e0] sm:$0xff] }
 0x244   : > { %v3016_v31 = vadd.f32 %v3015_v23, %v2761_v18  ;;  %v978_v18 = vsub.f32 %v466_v4, %v722_v5  ;;  %v1494_v23 = vadd.s32 1960, %v3538_v1  ;;  %v1233_v27 = vand.u32 2147483647, %v977_v10 }
 0x245   : > { %v1750_v32 = vadd.s32 %v3546_v7, %v1493_v15  ;;  %v2771_v36 = vsel %vm2003_vm1, %v1232_v19, 0.0  ;;  %vm2005_vm3 = vcmp.lt.s32.totalorder %v1749_v24, 2560  ;;  %v475_v15 = vld [vmem:[%s3525_s28 + $0x7e0] sm:$0xff]  ;;  %v732_v24 = vld [vmem:[%s3532_s24 + $0x7e8] sm:$0xff] }
 0x246   : > { %v3017_v39 = vadd.f32 %v3016_v31, %v2762_v26  ;;  %v979_v26 = vsub.f32 %v467_v13, %v723_v14  ;;  %v1495_v31 = vadd.s32 1968, %v3538_v1  ;;  %v1234_v35 = vand.u32 2147483647, %v978_v18 }
 0x247   : > { %v1751_v40 = vadd.s32 %v3546_v7, %v1494_v23  ;;  %v2772_v44 = vsel %vm2004_vm2, %v1233_v27, 0.0  ;;  %vm2006_vm4 = vcmp.lt.s32.totalorder %v1750_v32, 2560  ;;  %v476_v23 = vld [vmem:[%s3525_s28 + $0x7e8] sm:$0xff]  ;;  %v733_v32 = vld [vmem:[%s3532_s24 + $0x7f0] sm:$0xff] }
 0x248   : > { %v3018_v47 = vadd.f32 %v3017_v39, %v2763_v34  ;;  %v980_v34 = vsub.f32 %v468_v21, %v724_v22  ;;  %v1496_v39 = vadd.s32 1976, %v3538_v1  ;;  %v1235_v43 = vand.u32 2147483647, %v979_v26 }
 0x249   : > { %v1752_v48 = vadd.s32 %v3546_v7, %v1495_v31  ;;  %v2773_v52 = vsel %vm2005_vm3, %v1234_v35, 0.0  ;;  %vm2007_vm5 = vcmp.lt.s32.totalorder %v1751_v40, 2560  ;;  %v477_v31 = vld [vmem:[%s3525_s28 + $0x7f0] sm:$0xff]  ;;  %v734_v40 = vld [vmem:[%s3532_s24 + $0x7f8] sm:$0xff] }
 0x24a   : > { %v3019_v55 = vadd.f32 %v3018_v47, %v2764_v42  ;;  %v981_v42 = vsub.f32 %v469_v29, %v725_v30  ;;  %v1497_v47 = vadd.s32 1984, %v3538_v1  ;;  %v1236_v51 = vand.u32 2147483647, %v980_v34 }
 0x24b   : > { %v1753_v56 = vadd.s32 %v3546_v7, %v1496_v39  ;;  %v2774_v60 = vsel %vm2006_vm4, %v1235_v43, 0.0  ;;  %vm2008_vm6 = vcmp.lt.s32.totalorder %v1752_v48, 2560  ;;  %v478_v39 = vld [vmem:[%s3525_s28 + $0x7f8] sm:$0xff] }
 0x24c   : > { %v3020_v63 = vadd.f32 %v3019_v55, %v2765_v50  ;;  %v982_v50 = vsub.f32 %v470_v37, %v726_v38  ;;  %v1498_v55 = vadd.s32 1992, %v3538_v1  ;;  %v1237_v59 = vand.u32 2147483647, %v981_v42 }
 0x24d   : > { %v1754_v0 = vadd.s32 %v3546_v7, %v1497_v47  ;;  %v2775_v5 = vsel %vm2007_vm5, %v1236_v51, 0.0  ;;  %vm2009_vm7 = vcmp.lt.s32.totalorder %v1753_v56, 2560 }
 0x24e   : > { %v3021_v9 = vadd.f32 %v3020_v63, %v2766_v58  ;;  %v983_v58 = vsub.f32 %v471_v45, %v727_v46  ;;  %v1499_v63 = vadd.s32 2000, %v3538_v1  ;;  %v1238_v4 = vand.u32 2147483647, %v982_v50 }
 0x24f   : > { %v1755_v10 = vadd.s32 %v3546_v7, %v1498_v55  ;;  %v2776_v14 = vsel %vm2008_vm6, %v1237_v59, 0.0  ;;  %vm2010_vm8 = vcmp.lt.s32.totalorder %v1754_v0, 2560 }
 0x250   : > { %v3022_v17 = vadd.f32 %v3021_v9, %v2767_v3  ;;  %v984_v3 = vsub.f32 %v472_v53, %v728_v54  ;;  %v1500_v9 = vadd.s32 2008, %v3538_v1  ;;  %v1239_v13 = vand.u32 2147483647, %v983_v58 }
 0x251   : > { %v1756_v18 = vadd.s32 %v3546_v7, %v1499_v63  ;;  %v2777_v22 = vsel %vm2009_vm7, %v1238_v4, 0.0  ;;  %vm2011_vm9 = vcmp.lt.s32.totalorder %v1755_v10, 2560 }
 0x252   : > { %v3023_v25 = vadd.f32 %v3022_v17, %v2768_v12  ;;  %v985_v12 = vsub.f32 %v473_v61, %v729_v62  ;;  %v1501_v17 = vadd.s32 2016, %v3538_v1  ;;  %v1240_v21 = vand.u32 2147483647, %v984_v3 }
 0x253   : > { %v1757_v26 = vadd.s32 %v3546_v7, %v1500_v9  ;;  %v2778_v30 = vsel %vm2010_vm8, %v1239_v13, 0.0  ;;  %vm2012_vm10 = vcmp.lt.s32.totalorder %v1756_v18, 2560 }
 0x254   : > { %v3024_v33 = vadd.f32 %v3023_v25, %v2769_v20  ;;  %v986_v20 = vsub.f32 %v474_v6, %v730_v8  ;;  %v1502_v25 = vadd.s32 2024, %v3538_v1  ;;  %v1241_v29 = vand.u32 2147483647, %v985_v12 }
 0x255   : > { %v1758_v34 = vadd.s32 %v3546_v7, %v1501_v17  ;;  %v2779_v38 = vsel %vm2011_vm9, %v1240_v21, 0.0  ;;  %vm2013_vm11 = vcmp.lt.s32.totalorder %v1757_v26, 2560 }
 0x256   : > { %v3025_v41 = vadd.f32 %v3024_v33, %v2770_v28  ;;  %v987_v28 = vsub.f32 %v475_v15, %v731_v16  ;;  %v1503_v33 = vadd.s32 2032, %v3538_v1  ;;  %v1242_v37 = vand.u32 2147483647, %v986_v20 }
 0x257   : > { %v1759_v42 = vadd.s32 %v3546_v7, %v1502_v25  ;;  %v2780_v46 = vsel %vm2012_vm10, %v1241_v29, 0.0  ;;  %vm2014_vm12 = vcmp.lt.s32.totalorder %v1758_v34, 2560 }
 0x258   : > { %v3026_v49 = vadd.f32 %v3025_v41, %v2771_v36  ;;  %v988_v36 = vsub.f32 %v476_v23, %v732_v24  ;;  %v1504_v41 = vadd.s32 2040, %v3538_v1  ;;  %v1243_v45 = vand.u32 2147483647, %v987_v28 }
 0x259   : > { %v1760_v47 = vadd.s32 %v3546_v7, %v1503_v33  ;;  %v2781_v51 = vsel %vm2013_vm11, %v1242_v37, 0.0  ;;  %vm2015_vm13 = vcmp.lt.s32.totalorder %v1759_v42, 2560 }
 0x25a   : > { %v3027_v57 = vadd.f32 %v3026_v49, %v2772_v44  ;;  %v989_v44 = vsub.f32 %v477_v31, %v733_v32  ;;  %v990_v49 = vsub.f32 %v478_v39, %v734_v40  ;;  %v1244_v50 = vand.u32 2147483647, %v988_v36 }
 0x25b   : > { %v2782_v1 = vsel %vm2014_vm12, %v1243_v45, 0.0  ;;  %vm2016_vm14 = vcmp.lt.s32.totalorder %v1760_v47, 2560 }
 0x25c   : > { %v3028_v2 = vadd.f32 %v3027_v57, %v2773_v52  ;;  %v1761_v52 = vadd.s32 %v3546_v7, %v1504_v41  ;;  %v1245_v54 = vand.u32 2147483647, %v989_v44  ;;  %v1246_v56 = vand.u32 2147483647, %v990_v49 }
 0x25d   : > { %v2783_v57 = vsel %vm2015_vm13, %v1244_v50, 0.0 }
 0x25e   : > { %v3029_v11 = vadd.f32 %v3028_v2, %v2774_v60  ;;  %vm2017_vm15 = vcmp.lt.s32.totalorder %v1761_v52, 2560  ;;  %v2784_v59 = vsel %vm2016_vm14, %v1245_v54, 0.0 }
 0x25f   : > { %v2785_v61 = vsel %vm2017_vm15, %v1246_v56, 0.0 }
 0x260   : > { %v3030_v19 = vadd.f32 %v3029_v11, %v2775_v5 }
 0x262   : > { %v3031_v27 = vadd.f32 %v3030_v19, %v2776_v14 }
 0x264   : > { %v3032_v35 = vadd.f32 %v3031_v27, %v2777_v22 }
 0x266   : > { %v3033_v43 = vadd.f32 %v3032_v35, %v2778_v30 }
 0x268   : > { %v3034_v48 = vadd.f32 %v3033_v43, %v2779_v38 }
 0x26a   : > { %v3035_v53 = vadd.f32 %v3034_v48, %v2780_v46 }
 0x26c   : > { %v3036_v55 = vadd.f32 %v3035_v53, %v2781_v51 }
 0x26e   : > { %v3037_v58 = vadd.f32 %v3036_v55, %v2782_v1 }
 0x270   : > { %v3038_v60 = vadd.f32 %v3037_v58, %v2783_v57 }
 0x272   : > { %v3039_v62 = vadd.f32 %v3038_v60, %v2784_v59 }
 0x274   : > { %v3040_v63 = vadd.f32 %v3039_v62, %v2785_v61 }
 0x276   : > { %v3041_v7 = vrot.slane %v3040_v63, 4 }
 0x278   : > { %v3042_v0 = vadd.f32 %v3041_v7, %v3040_v63 }
 0x27a   : > { %v3043_v2 = vrot.slane %v3042_v0, 2 }
 0x27c   : > { %v3044_v3 = vadd.f32 %v3043_v2, %v3042_v0 }
 0x27e   : > { %v3045_v4 = vrot.slane %v3044_v3, 1 }
 0x280   : > { %v3046_v5 = vadd.f32 %v3045_v4, %v3044_v3 }
 0x282   : > { %3047 = vst [vmem:[%s212_s25] sm:$0x1] %v3046_v5 }
 0x283   : > { %3290 = shalt.err (!%p3287_p10)
}
 0x284   : > { %s3291_s27 = scalar_lea.hbm %s4572_s5, 16  ;;  %s3295_s6 = scalar_lea.hbm %s4618_s2, 32 }
 0x285   : > { %p3292_p11 = scmp.ne.s32.totalorder %s4572_s5, %s3291_s27  ;;  %p3296_p13 = scmp.lt.u32.totalorder %s4572_s5, %s4618_s2 }
 0x286   : > { %p3297_p12 = scmp.lt.u32.totalorder %s3295_s6, %s3291_s27  ;;  %p3299_p6 = scmp.lt.u32.totalorder %s3291_s27, %s4572_s5 }
 0x287   : > { %p3293_p2 = pnand %p3292_p11, %p4625_p5 }
 0x288   : > { %p3298_p0 = por %p3297_p12, %p3296_p13 }
 0x289   : > { %p3294_p8 = pneg %p3293_p2 }
 0x28a   : > { %p3300_p1 = por %p3299_p6, %p3298_p0 }
 0x28c   : > { %p3301_p3 = pnand %p3300_p1, %p3294_p8 }
 0x28e   : > { %3304 = shalt.err (!%p3301_p3)
}
 0x28f   : > { %3178 = dma.vmem_to_hbm [thread:$0]  (%p4625_p5), %s4574_s30, 16, %s4572_s5, %s3049_s8  }
 0x290 PF: > { %s3073_s17 = sand.u32 1, %s3335_s9   ;;  %p4626_p4 = scmp.ne.s32.totalorder %s4624_s22, 0 }
 0x291   : > { %p4627_p7 = scmp.ge.s32.totalorder %s3347_s12, 2  ;;  %s3074_s24 = scalar_lea.sflag [#allocation4], %s3073_s17 }
 0x293   : > { %p3181_p9 = pnand %p4627_p7, %p4626_p4 }
 0x295   : > { %3330 = dma.done.wait (!%p3181_p9), %s3074_s24, 16  }
 0x296   : > { %3332 = vsyncadd (!%p3181_p9), %s3074_s24, 4294967280  ;;  %p18_p10 = scmp.ge.s32.totalorder %s3396_s15, 4   ;;  %s4628_s9 = smov %s3339_s10 }
 0x297   : > { %s4629_s10 = smov %s3343_s11  ;;  %s4630_s11 = smov %s3408_s18 }
 0x298   : > { %s4631_s12 = smov %s3396_s15  ;;  %20 = sbr.rel (!%p18_p10) target bundleno = 7 (0x7), region = 86 }
 0x29f   :  { %3078 = vsyncpa [#allocation3], 1 }
 0x2a0   :  { %3080 = vsyncpa [#allocation3 + $0x1], 1 }
 0x2a1   :  { %3081 = vsyncpa [#allocation6], 1 }
 0x2a2   :  { %3083 = vsyncpa [#allocation6 + $0x1], 1 }
 0x2a3   :  { %3084 = vsyncpa [#allocation4], 1 }
 0x2a4   :  { %3086 = vsyncpa [#allocation4 + $0x1], 1 }

</bundles_post_ra>
